<compile_context>
chip_gen: v5e
topology: v5e:2x2
jax: 0.10.0
libtpu: 0.0.40
codegen_flags: <defaults>
</compile_context>

<pallas_src>
import math
import jax
import jax.numpy as jnp
from jax.experimental import pallas as pl
from jax.experimental.pallas import tpu as pltpu

# ---------------------------------------------------------------------------
# Stand-ins for the module-level constants referenced by the PyTorch code.
# ---------------------------------------------------------------------------
TF_D_MODEL = 32
D_STROKE = 4
TF_N_HEADS = 4
TF_DIM_FEEDFORWARD = 64   # linear1/linear2/norm3 exist in __init__ but are unused in forward()
OUT_CHANNELS = 8
KERNEL_SIZE = 3
STRIDE = 2
PADDING = KERNEL_SIZE
ALPHABET_SIZE = 30
MAX_STROKE_LEN = 64
MAX_CHAR_LEN = 16
TF_DROPOUT = 0.1          # eval mode -> dropout == identity
LN_EPS = 1e-5
NEG_INF = -1e30


# ---------------------------------------------------------------------------
# Packed-parameter layout (weight slab is bf16, bias slab is f32).
# Row starts are 8-aligned so static slices stay tile-friendly.
# ---------------------------------------------------------------------------
def _ru8(n):
    return -(-n // 8) * 8


_off = 0
ROW_TE = _off;   _off += _ru8(D_STROKE)                 # tgt_embed linear      [ds, D]
ROW_CONV = _off; _off += _ru8(KERNEL_SIZE * D_STROKE)   # conv1d (im2col)       [K*ds, OC]
ROW_TCE = _off;  _off += _ru8(OUT_CHANNELS)             # tgt_conv_embed        [OC, D]
ROW_CAI = _off;  _off += _ru8(TF_D_MODEL)               # conv_attention in_proj[D, 3D]
ROW_CAO = _off;  _off += _ru8(TF_D_MODEL)               # conv_attention out    [D, D]
ROW_MHI = _off;  _off += _ru8(TF_D_MODEL)               # multi_head_attn in    [D, 3D]
ROW_MHO = _off;  _off += _ru8(TF_D_MODEL)               # multi_head_attn out   [D, D]
ROW_GEN = _off;  _off += _ru8(TF_D_MODEL)               # generator             [D, ds]
W_ROWS = _ru8(_off)
W_COLS = max(128, -(-3 * TF_D_MODEL // 128) * 128)      # >= 3*D, 128-multiple

(BR_TE_B, BR_CONV_B, BR_TCE_B, BR_CA_IB, BR_CA_OB, BR_N1W, BR_N1B,
 BR_MH_IB, BR_MH_OB, BR_N2W, BR_N2B, BR_GEN_B) = range(12)
B_ROWS = _ru8(12)


def _unpack_weights(wp, bp):
    """Static slices; works on both Pallas Refs (kernel) and jnp arrays (reference)."""
    d, ds, oc, k = TF_D_MODEL, D_STROKE, OUT_CHANNELS, KERNEL_SIZE
    return dict(
        te_w=wp[ROW_TE:ROW_TE + ds, :d],
        conv_w=wp[ROW_CONV:ROW_CONV + k * ds, :oc],
        tce_w=wp[ROW_TCE:ROW_TCE + oc, :d],
        ca_iw=wp[ROW_CAI:ROW_CAI + d, :3 * d],
        ca_ow=wp[ROW_CAO:ROW_CAO + d, :d],
        mh_iw=wp[ROW_MHI:ROW_MHI + d, :3 * d],
        mh_ow=wp[ROW_MHO:ROW_MHO + d, :d],
        gen_w=wp[ROW_GEN:ROW_GEN + d, :ds],          # narrow (D, d_stroke) generator weight
        te_b=bp[BR_TE_B:BR_TE_B + 1, :d],
        conv_b=bp[BR_CONV_B:BR_CONV_B + 1, :oc],
        tce_b=bp[BR_TCE_B:BR_TCE_B + 1, :d],
        ca_ib=bp[BR_CA_IB:BR_CA_IB + 1, :3 * d],
        ca_ob=bp[BR_CA_OB:BR_CA_OB + 1, :d],
        n1_w=bp[BR_N1W:BR_N1W + 1, :d],
        n1_b=bp[BR_N1B:BR_N1B + 1, :d],
        mh_ib=bp[BR_MH_IB:BR_MH_IB + 1, :3 * d],
        mh_ob=bp[BR_MH_OB:BR_MH_OB + 1, :d],
        n2_w=bp[BR_N2W:BR_N2W + 1, :d],
        n2_b=bp[BR_N2B:BR_N2B + 1, :d],
        gen_b=bp[BR_GEN_B:BR_GEN_B + 1, :ds],
    )


# ---------------------------------------------------------------------------
# Shared math (traced inside the Pallas kernel AND by the JAX reference).
# ---------------------------------------------------------------------------
def _layernorm(x, w, b):
    mu = jnp.mean(x, axis=-1, keepdims=True)
    xc = x - mu
    var = jnp.mean(xc * xc, axis=-1, keepdims=True)
    return xc * jax.lax.rsqrt(var + LN_EPS) * w + b


def _mha_tile(q_in, kv_in, mask, in_w, in_b, out_w, out_b, tb, lq, lk, recip):
    """nn.MultiheadAttention (batch_first, eval) for a tile of `tb` batch elements.

    q_in: [tb*lq, D], kv_in: [tb*lk, D], mask: boolean [tb, lq|1, lk] (True = masked).
    Fused Q and KV projections; per-head score/PV einsums batched over tb.
    Head-concat + output projection are fused without lane masks/concatenate:
        concat_h(o_h) @ W_o == sum_h o_h @ W_o[h*hd:(h+1)*hd, :].
    """
    d = TF_D_MODEL
    nh = TF_N_HEADS
    hd = d // nh
    scale = 1.0 / math.sqrt(hd)

    q2 = jnp.dot(q_in.astype(jnp.bfloat16), in_w[:, :d],
                 preferred_element_type=jnp.float32) + in_b[:, :d]
    kv2 = jnp.dot(kv_in.astype(jnp.bfloat16), in_w[:, d:],
                  preferred_element_type=jnp.float32) + in_b[:, d:]

    out = out_b                                        # (1, d); broadcasts on first add
    for h in range(nh):                                # static 4-iter unroll
        sl = slice(h * hd, (h + 1) * hd)
        q_h = q2[:, sl].reshape(tb, lq, hd).astype(jnp.bfloat16)
        k_h = kv2[:, sl].reshape(tb, lk, hd).astype(jnp.bfloat16)
        v_h = kv2[:, d + h * hd:d + (h + 1) * hd].reshape(tb, lk, hd).astype(jnp.bfloat16)

        s = jnp.einsum('bqd,bkd->bqk', q_h, k_h,
                       preferred_element_type=jnp.float32)
        s = jnp.where(mask, NEG_INF, s * scale)
        s = s - jnp.max(s, axis=-1, keepdims=True)
        p = jnp.exp(s)
        p = p * recip(jnp.sum(p, axis=-1, keepdims=True))
        o_h = jnp.einsum('bqk,bkd->bqd', p.astype(jnp.bfloat16), v_h,
                         preferred_element_type=jnp.float32)
        out = out + jnp.dot(o_h.reshape(tb * lq, hd).astype(jnp.bfloat16),
                            out_w[sl, :], preferred_element_type=jnp.float32)
    return out


def _decode_tile(x, x_col, mem, lens, pe_flat, w, recip):
    """Full decode for a tile.

    x: [tb, L, ds] bf16, x_col: [tb, Lout, K*ds] bf16, mem: [tb, Lc, D] bf16,
    lens: [tb, 1, 2] int32 (x_len, c_len), pe_flat: [tb*L, D] f32 (pre-tiled).
    Returns the generator output [tb*L, D_STROKE] f32.
    """
    tb, L, ds = x.shape
    lout = x_col.shape[1]
    lc = mem.shape[1]
    d = TF_D_MODEL
    K, S, P = KERNEL_SIZE, STRIDE, PADDING

    xf = x.reshape(tb * L, ds)
    xcf = x_col.reshape(tb * lout, K * ds)
    memf = mem.reshape(tb * lc, d)

    # --- attention masks built in-kernel from the per-batch lengths ----------
    x_len = lens[:, :, 0:1]                                   # [tb,1,1] int32
    c_len = lens[:, :, 1:2]
    qi3 = jax.lax.broadcasted_iota(jnp.int32, (tb, L, lout), 1)
    kj3 = jax.lax.broadcasted_iota(jnp.int32, (tb, L, lout), 2)
    # causal:  k >= floor((q+2P-K)/S)+1   <=>  (q+2P-K) <  S*k       (no int div)
    # padding: k >= ceil((xl+2P-K)/S)+1   <=>  (xl+2P-K) <= S*k - S
    conv_mask = ((qi3 + 2 * P - K) < S * kj3) | \
                ((x_len + 2 * P - K) <= S * kj3 - S)          # [tb, L, Lout] bool
    kc = jax.lax.broadcasted_iota(jnp.int32, (tb, 1, lc), 2)
    mem_mask = kc >= c_len                                    # [tb, 1, Lc] bool

    # --- tgt_embed: Linear(d_stroke, d_model) + positional encoding ----------
    tgt = (jnp.dot(xf, w['te_w'], preferred_element_type=jnp.float32)
           + w['te_b'] + pe_flat)

    # --- conv1d via im2col matmul, then tgt_conv_embed linear ----------------
    conv = jnp.dot(xcf, w['conv_w'], preferred_element_type=jnp.float32) + w['conv_b']
    tce = jnp.dot(conv.astype(jnp.bfloat16), w['tce_w'],
                  preferred_element_type=jnp.float32) + w['tce_b']

    # --- conv cross-attention + residual + norm1 -----------------------------
    a1 = _mha_tile(tgt, tce, conv_mask, w['ca_iw'], w['ca_ib'],
                   w['ca_ow'], w['ca_ob'], tb, L, lout, recip)
    h = _layernorm(tgt + a1, w['n1_w'], w['n1_b'])

    # --- memory cross-attention + residual + norm2 ---------------------------
    a2 = _mha_tile(h, memf, mem_mask, w['mh_iw'], w['mh_ib'],
                   w['mh_ow'], w['mh_ob'], tb, L, lc, recip)
    h = _layernorm(h + a2, w['n2_w'], w['n2_b'])

    # --- generator (narrow [D, d_stroke] weight -> dense, unamplified store) -
    return jnp.dot(h.astype(jnp.bfloat16), w['gen_w'],
                   preferred_element_type=jnp.float32) + w['gen_b']


# ---------------------------------------------------------------------------
# Pallas kernel: one grid step == one batch tile (tile_b elements).
# ---------------------------------------------------------------------------
def _decoder_kernel(x_ref, xcol_ref, mem_ref, lens_ref, pe_ref,
                    w_ref, b_ref, out_ref):
    w = _unpack_weights(w_ref, b_ref)
    y = _decode_tile(x_ref[...], xcol_ref[...], mem_ref[...], lens_ref[...],
                     pe_ref[...], w,
                     recip=lambda t: pl.reciprocal(t, approx=True))
    out_ref[0] = y.astype(out_ref.dtype)


def run_decoder(w_pack, b_pack, prep, tile_b=None):
    x, x_col, mem = prep['x'], prep['x_col'], prep['mem']
    x_len, c_len, pe_x = prep['x_len'], prep['c_len'], prep['pe_x']
    B, L, ds = x.shape
    Lout = x_col.shape[1]
    Lc = mem.shape[1]
    D = TF_D_MODEL

    # Batch tile: the flattened M dim (tile_b*L) is the MXU-utilization knob and
    # fatter tiles amortize the ~0.35us/step pipeline overhead.  Keep >= 2 grid
    # steps for B >= 16 so the "parallel" axis can be sharded over v7x's 2 TCs.
    # Per-step VMEM (double-buffered, incl. tile padding) stays ~2 MiB.
    if tile_b is None:
        tile_b = min(B, 32)
        if B >= 16 and pl.cdiv(B, tile_b) < 2:
            tile_b = pl.cdiv(B, 2)

    pad = (-B) % tile_b
    if pad:
        pad_fn = lambda a: jnp.pad(a, ((0, pad),) + ((0, 0),) * (a.ndim - 1))
        x, x_col, mem, x_len, c_len = map(pad_fn, (x, x_col, mem, x_len, c_len))
    Bp = B + pad
    nt = Bp // tile_b

    # Per-batch lengths packed as [Bp, 1, 2] int32 (x_len, c_len): the batch dim
    # is outside the last two dims, so any tile_b is BlockSpec-legal.
    lens = jnp.stack([x_len, c_len], axis=-1).reshape(Bp, 1, 2).astype(jnp.int32)
    # PE pre-tiled to the flat (tile_b*L, D) layout (added without reshaping the
    # live activation).  Constant index map => fetched from HBM once.
    pe_tiled = jnp.tile(pe_x, (tile_b, 1))

    def tile_spec(*trail):
        nd = len(trail)
        return pl.BlockSpec((tile_b,) + tuple(trail),
                            lambda t, nd=nd: (t,) + (0,) * nd)

    def full_spec(shape):
        nd = len(shape)
        return pl.BlockSpec(tuple(shape), lambda t, nd=nd: (0,) * nd)

    out = pl.pallas_call(
        _decoder_kernel,
        out_shape=jax.ShapeDtypeStruct((nt, tile_b * L, D_STROKE), jnp.float32),
        grid=(nt,),
        in_specs=[
            tile_spec(L, ds),                       # x                 (bf16)
            tile_spec(Lout, KERNEL_SIZE * ds),      # x_col             (bf16)
            tile_spec(Lc, D),                       # mem = emb + PE    (bf16)
            tile_spec(1, 2),                        # lens (x_len,c_len)(int32)
            full_spec((tile_b * L, D)),             # pe tiled          (f32)
            full_spec((W_ROWS, W_COLS)),            # packed weights    (bf16)
            full_spec((B_ROWS, W_COLS)),            # packed biases/LN  (f32)
        ],
        out_specs=pl.BlockSpec((1, tile_b * L, D_STROKE), lambda t: (t, 0, 0)),
        compiler_params=pltpu.CompilerParams(dimension_semantics=("parallel",)),
    )(x, x_col, mem, lens, pe_tiled, w_pack, b_pack)

    return out.reshape(Bp, L, D_STROKE)[:B]


# ---------------------------------------------------------------------------
# Parameter init (deterministic, synthetic), packing and glue.
# ---------------------------------------------------------------------------
def make_positional_encoding(max_len, d_model):
    position = jnp.arange(max_len, dtype=jnp.float32)[:, None]
    div_term = jnp.exp(jnp.arange(0, d_model, 2, dtype=jnp.float32)
                       * (-math.log(10000.0) / d_model))
    pe = jnp.zeros((max_len, d_model), jnp.float32)
    pe = pe.at[:, 0::2].set(jnp.sin(position * div_term))
    pe = pe.at[:, 1::2].set(jnp.cos(position * div_term))
    return pe


def init_params(key):
    D, ds, OC, K, A = TF_D_MODEL, D_STROKE, OUT_CHANNELS, KERNEL_SIZE, ALPHABET_SIZE
    ks = jax.random.split(key, 9)

    def xavier(k, fan_in, fan_out, shape=None):
        shape = (fan_in, fan_out) if shape is None else shape
        lim = math.sqrt(6.0 / (fan_in + fan_out))
        return jax.random.uniform(k, shape, jnp.float32, -lim, lim)

    conv_w = xavier(ks[5], ds * K, OC, shape=(OC, ds, K))        # PyTorch [OC, IC, K]
    conv_w_col = jnp.transpose(conv_w, (2, 1, 0)).reshape(K * ds, OC)

    return dict(
        emb_w=xavier(ks[0], A, D),
        te_w=xavier(ks[1], ds, D), te_b=jnp.zeros((D,), jnp.float32),
        conv_w_col=conv_w_col, conv_b=jnp.zeros((OC,), jnp.float32),
        tce_w=xavier(ks[2], OC, D), tce_b=jnp.zeros((D,), jnp.float32),
        ca_in_w=xavier(ks[3], D, 3 * D), ca_in_b=jnp.zeros((3 * D,), jnp.float32),
        ca_out_w=xavier(ks[4], D, D), ca_out_b=jnp.zeros((D,), jnp.float32),
        mh_in_w=xavier(ks[6], D, 3 * D), mh_in_b=jnp.zeros((3 * D,), jnp.float32),
        mh_out_w=xavier(ks[7], D, D), mh_out_b=jnp.zeros((D,), jnp.float32),
        n1_w=jnp.ones((D,), jnp.float32), n1_b=jnp.zeros((D,), jnp.float32),
        n2_w=jnp.ones((D,), jnp.float32), n2_b=jnp.zeros((D,), jnp.float32),
        gen_w=xavier(ks[8], D, ds), gen_b=jnp.zeros((ds,), jnp.float32),
        pe=make_positional_encoding(max(MAX_CHAR_LEN, MAX_STROKE_LEN), D),
    )


def pack_params(params):
    D, ds, OC, K = TF_D_MODEL, D_STROKE, OUT_CHANNELS, KERNEL_SIZE
    W = jnp.zeros((W_ROWS, W_COLS), jnp.float32)
    W = W.at[ROW_TE:ROW_TE + ds, :D].set(params['te_w'])
    W = W.at[ROW_CONV:ROW_CONV + K * ds, :OC].set(params['conv_w_col'])
    W = W.at[ROW_TCE:ROW_TCE + OC, :D].set(params['tce_w'])
    W = W.at[ROW_CAI:ROW_CAI + D, :3 * D].set(params['ca_in_w'])
    W = W.at[ROW_CAO:ROW_CAO + D, :D].set(params['ca_out_w'])
    W = W.at[ROW_MHI:ROW_MHI + D, :3 * D].set(params['mh_in_w'])
    W = W.at[ROW_MHO:ROW_MHO + D, :D].set(params['mh_out_w'])
    W = W.at[ROW_GEN:ROW_GEN + D, :ds].set(params['gen_w'])

    Bp = jnp.zeros((B_ROWS, W_COLS), jnp.float32)
    bias_layout = [
        (BR_TE_B, 'te_b'), (BR_CONV_B, 'conv_b'), (BR_TCE_B, 'tce_b'),
        (BR_CA_IB, 'ca_in_b'), (BR_CA_OB, 'ca_out_b'),
        (BR_N1W, 'n1_w'), (BR_N1B, 'n1_b'),
        (BR_MH_IB, 'mh_in_b'), (BR_MH_OB, 'mh_out_b'),
        (BR_N2W, 'n2_w'), (BR_N2B, 'n2_b'), (BR_GEN_B, 'gen_b'),
    ]
    for row, name in bias_layout:
        v = params[name].reshape(-1)
        Bp = Bp.at[row, :v.shape[0]].set(v)
    return W.astype(jnp.bfloat16), Bp


def prepare_inputs(params, x, c, x_len, c_len):
    """Glue: im2col, character-embedding gather + PE; lengths stay as scalars
    (the attention masks are built in-kernel from them)."""
    B, L, ds = x.shape
    Lc = c.shape[1]
    K, S, P = KERNEL_SIZE, STRIDE, PADDING
    Lout = (L + 2 * P - K) // S + 1            # l_in_to_l_out(L, K, S, P)
    assert Lout > 0

    x_pad = jnp.pad(x, ((0, 0), (P, P), (0, 0)))
    gather_idx = jnp.arange(Lout)[:, None] * S + jnp.arange(K)[None, :]
    x_col = x_pad[:, gather_idx, :].reshape(B, Lout, K * ds)

    pe_x = params['pe'][:L]
    pe_c = params['pe'][:Lc]
    mem = params['emb_w'][c] + pe_c[None]       # encoder: Embedding + PE (dropout = id)

    return dict(
        x=x.astype(jnp.bfloat16),
        x_col=x_col.astype(jnp.bfloat16),
        mem=mem.astype(jnp.bfloat16),
        pe_x=pe_x,
        x_len=x_len.astype(jnp.int32),
        c_len=c_len.astype(jnp.int32))


def tfhw_forward(params, x, c, x_len, c_len, tile_b=None):
    w_pack, b_pack = pack_params(params)
    prep = prepare_inputs(params, x, c, x_len, c_len)
    out = run_decoder(w_pack, b_pack, prep, tile_b=tile_b)
    return out, (w_pack, b_pack, prep)


def reference_forward(w_pack, b_pack, prep):
    B, L, _ = prep['x'].shape
    w = _unpack_weights(w_pack, b_pack)
    lens = jnp.stack([prep['x_len'], prep['c_len']],
                     axis=-1).reshape(B, 1, 2).astype(jnp.int32)
    pe_flat = jnp.tile(prep['pe_x'], (B, 1))
    y = _decode_tile(prep['x'], prep['x_col'], prep['mem'], lens, pe_flat, w,
                     recip=lambda t: 1.0 / t)
    return y.reshape(B, L, D_STROKE)


if __name__ == "__main__":
    key = jax.random.PRNGKey(0)
    k_x, k_c, k_p = jax.random.split(key, 3)

    B, L, Lc = 2, 16, 8
    x = jax.random.normal(k_x, (B, L, D_STROKE), jnp.float32)     # strokes
    c = jax.random.randint(k_c, (B, Lc), 0, ALPHABET_SIZE)        # char ids
    x_len = jnp.array([L, 10], jnp.int32)
    c_len = jnp.array([Lc, 5], jnp.int32)

    params = init_params(k_p)

    out, (w_pack, b_pack, prep) = tfhw_forward(params, x, c, x_len, c_len)
    out = jax.block_until_ready(out)

    ref = jax.block_until_ready(reference_forward(w_pack, b_pack, prep))

    assert out.shape == (B, L, D_STROKE), out.shape
    assert bool(jnp.all(jnp.isfinite(out)))
    # Kernel and reference share the same bf16 matmul math; the only delta is the
    # EUP approximate reciprocal in the kernel's softmax, hence the 2e-2 bound.
    max_err = float(jnp.max(jnp.abs(out - ref)))
    assert max_err < 2e-2, f"mismatch vs reference: {max_err}"

    print("KERNEL_OK")
</pallas_src>

<mosaic_0001>
module attributes {stable_mosaic.version = 11 : i64} {
  func.func @_decoder_kernel(%arg0: i32, %arg1: memref<2x16x4xbf16, #tpu.memory_space<vmem>>, %arg2: memref<2x10x12xbf16, #tpu.memory_space<vmem>>, %arg3: memref<2x8x32xbf16, #tpu.memory_space<vmem>>, %arg4: memref<2x1x2xi32, #tpu.memory_space<vmem>>, %arg5: memref<32x32xf32, #tpu.memory_space<vmem>>, %arg6: memref<192x128xbf16, #tpu.memory_space<vmem>>, %arg7: memref<16x128xf32, #tpu.memory_space<vmem>>, %arg8: memref<1x32x4xf32, #tpu.memory_space<vmem>>) attributes {dimension_semantics = [#tpu.dimension_semantics<parallel>], iteration_bounds = array<i64: 1>, scalar_prefetch = 0 : i64, scratch_operands = 0 : i64, tpu.core_type = #tpu.core_type<tc>, window_params = [{transform_indices = @transform_0, window_bounds = array<i64: 2, 16, 4>}, {transform_indices = @transform_1, window_bounds = array<i64: 2, 10, 12>}, {transform_indices = @transform_2, window_bounds = array<i64: 2, 8, 32>}, {transform_indices = @transform_3, window_bounds = array<i64: 2, 1, 2>}, {pipeline_mode = #tpu.pipeline_mode<synchronous>, transform_indices = @transform_4, window_bounds = array<i64: 32, 32>}, {pipeline_mode = #tpu.pipeline_mode<synchronous>, transform_indices = @transform_5, window_bounds = array<i64: 192, 128>}, {pipeline_mode = #tpu.pipeline_mode<synchronous>, transform_indices = @transform_6, window_bounds = array<i64: 16, 128>}, {transform_indices = @transform_7, window_bounds = array<i64: 1, 32, 4>}]} {
    %c0 = arith.constant 0 : index
    %c0_0 = arith.constant 0 : index
    %0 = vector.load %arg6[%c0, %c0_0] : memref<192x128xbf16, #tpu.memory_space<vmem>>, vector<4x32xbf16>
    %c8 = arith.constant 8 : index
    %c0_1 = arith.constant 0 : index
    %1 = vector.load %arg6[%c8, %c0_1] : memref<192x128xbf16, #tpu.memory_space<vmem>>, vector<12x8xbf16>
    %c24 = arith.constant 24 : index
    %c0_2 = arith.constant 0 : index
    %2 = vector.load %arg6[%c24, %c0_2] : memref<192x128xbf16, #tpu.memory_space<vmem>>, vector<8x32xbf16>
    %c32 = arith.constant 32 : index
    %c0_3 = arith.constant 0 : index
    %3 = vector.load %arg6[%c32, %c0_3] : memref<192x128xbf16, #tpu.memory_space<vmem>>, vector<32x96xbf16>
    %c64 = arith.constant 64 : index
    %c0_4 = arith.constant 0 : index
    %4 = vector.load %arg6[%c64, %c0_4] : memref<192x128xbf16, #tpu.memory_space<vmem>>, vector<32x32xbf16>
    %c96 = arith.constant 96 : index
    %c0_5 = arith.constant 0 : index
    %5 = vector.load %arg6[%c96, %c0_5] : memref<192x128xbf16, #tpu.memory_space<vmem>>, vector<32x96xbf16>
    %c128 = arith.constant 128 : index
    %c0_6 = arith.constant 0 : index
    %6 = vector.load %arg6[%c128, %c0_6] : memref<192x128xbf16, #tpu.memory_space<vmem>>, vector<32x32xbf16>
    %c160 = arith.constant 160 : index
    %c0_7 = arith.constant 0 : index
    %7 = vector.load %arg6[%c160, %c0_7] : memref<192x128xbf16, #tpu.memory_space<vmem>>, vector<32x4xbf16>
    %c0_8 = arith.constant 0 : index
    %c0_9 = arith.constant 0 : index
    %8 = vector.load %arg7[%c0_8, %c0_9] : memref<16x128xf32, #tpu.memory_space<vmem>>, vector<1x32xf32>
    %c1 = arith.constant 1 : index
    %c0_10 = arith.constant 0 : index
    %9 = vector.load %arg7[%c1, %c0_10] : memref<16x128xf32, #tpu.memory_space<vmem>>, vector<1x8xf32>
    %c2 = arith.constant 2 : index
    %c0_11 = arith.constant 0 : index
    %10 = vector.load %arg7[%c2, %c0_11] : memref<16x128xf32, #tpu.memory_space<vmem>>, vector<1x32xf32>
    %c3 = arith.constant 3 : index
    %c0_12 = arith.constant 0 : index
    %11 = vector.load %arg7[%c3, %c0_12] : memref<16x128xf32, #tpu.memory_space<vmem>>, vector<1x96xf32>
    %c4 = arith.constant 4 : index
    %c0_13 = arith.constant 0 : index
    %12 = vector.load %arg7[%c4, %c0_13] : memref<16x128xf32, #tpu.memory_space<vmem>>, vector<1x32xf32>
    %c5 = arith.constant 5 : index
    %c0_14 = arith.constant 0 : index
    %13 = vector.load %arg7[%c5, %c0_14] : memref<16x128xf32, #tpu.memory_space<vmem>>, vector<1x32xf32>
    %c6 = arith.constant 6 : index
    %c0_15 = arith.constant 0 : index
    %14 = vector.load %arg7[%c6, %c0_15] : memref<16x128xf32, #tpu.memory_space<vmem>>, vector<1x32xf32>
    %c7 = arith.constant 7 : index
    %c0_16 = arith.constant 0 : index
    %15 = vector.load %arg7[%c7, %c0_16] : memref<16x128xf32, #tpu.memory_space<vmem>>, vector<1x96xf32>
    %c8_17 = arith.constant 8 : index
    %c0_18 = arith.constant 0 : index
    %16 = vector.load %arg7[%c8_17, %c0_18] : memref<16x128xf32, #tpu.memory_space<vmem>>, vector<1x32xf32>
    %c9 = arith.constant 9 : index
    %c0_19 = arith.constant 0 : index
    %17 = vector.load %arg7[%c9, %c0_19] : memref<16x128xf32, #tpu.memory_space<vmem>>, vector<1x32xf32>
    %c10 = arith.constant 10 : index
    %c0_20 = arith.constant 0 : index
    %18 = vector.load %arg7[%c10, %c0_20] : memref<16x128xf32, #tpu.memory_space<vmem>>, vector<1x32xf32>
    %c11 = arith.constant 11 : index
    %c0_21 = arith.constant 0 : index
    %19 = vector.load %arg7[%c11, %c0_21] : memref<16x128xf32, #tpu.memory_space<vmem>>, vector<1x4xf32>
    %c0_22 = arith.constant 0 : index
    %c0_23 = arith.constant 0 : index
    %c0_24 = arith.constant 0 : index
    %20 = vector.load %arg1[%c0_22, %c0_23, %c0_24] : memref<2x16x4xbf16, #tpu.memory_space<vmem>>, vector<2x16x4xbf16>
    %c0_25 = arith.constant 0 : index
    %c0_26 = arith.constant 0 : index
    %c0_27 = arith.constant 0 : index
    %21 = vector.load %arg2[%c0_25, %c0_26, %c0_27] : memref<2x10x12xbf16, #tpu.memory_space<vmem>>, vector<2x10x12xbf16>
    %c0_28 = arith.constant 0 : index
    %c0_29 = arith.constant 0 : index
    %c0_30 = arith.constant 0 : index
    %22 = vector.load %arg3[%c0_28, %c0_29, %c0_30] : memref<2x8x32xbf16, #tpu.memory_space<vmem>>, vector<2x8x32xbf16>
    %c0_31 = arith.constant 0 : index
    %c0_32 = arith.constant 0 : index
    %c0_33 = arith.constant 0 : index
    %23 = vector.load %arg4[%c0_31, %c0_32, %c0_33] : memref<2x1x2xi32, #tpu.memory_space<vmem>>, vector<2x1x2xi32>
    %c0_34 = arith.constant 0 : index
    %c0_35 = arith.constant 0 : index
    %24 = vector.load %arg5[%c0_34, %c0_35] : memref<32x32xf32, #tpu.memory_space<vmem>>, vector<32x32xf32>
    %25 = vector.shape_cast %20 : vector<2x16x4xbf16> to vector<32x4xbf16>
    %26 = vector.shape_cast %21 : vector<2x10x12xbf16> to vector<20x12xbf16>
    %27 = vector.shape_cast %22 : vector<2x8x32xbf16> to vector<16x32xbf16>
    %28 = vector.extract_strided_slice %23 {offsets = [0, 0, 0], sizes = [2, 1, 1], strides = [1, 1, 1]} : vector<2x1x2xi32> to vector<2x1x1xi32>
    %29 = vector.extract_strided_slice %23 {offsets = [0, 0, 1], sizes = [2, 1, 1], strides = [1, 1, 1]} : vector<2x1x2xi32> to vector<2x1x1xi32>
    %30 = tpu.iota {dimensions = array<i32: 1>} : vector<2x16x10xi32>
    %31 = tpu.iota {dimensions = array<i32: 2>} : vector<2x16x10xi32>
    %c6_i32 = arith.constant 6 : i32
    %32 = vector.broadcast %c6_i32 : i32 to vector<2x16x10xi32>
    %33 = arith.addi %30, %32 : vector<2x16x10xi32>
    %c3_i32 = arith.constant 3 : i32
    %34 = vector.broadcast %c3_i32 : i32 to vector<2x16x10xi32>
    %35 = arith.subi %33, %34 : vector<2x16x10xi32>
    %c2_i32 = arith.constant 2 : i32
    %36 = vector.broadcast %c2_i32 : i32 to vector<2x16x10xi32>
    %37 = arith.muli %36, %31 : vector<2x16x10xi32>
    %38 = arith.cmpi slt, %35, %37 : vector<2x16x10xi32>
    %c6_i32_36 = arith.constant 6 : i32
    %39 = vector.broadcast %c6_i32_36 : i32 to vector<2x1x1xi32>
    %40 = arith.addi %28, %39 : vector<2x1x1xi32>
    %c3_i32_37 = arith.constant 3 : i32
    %41 = vector.broadcast %c3_i32_37 : i32 to vector<2x1x1xi32>
    %42 = arith.subi %40, %41 : vector<2x1x1xi32>
    %c2_i32_38 = arith.constant 2 : i32
    %43 = vector.broadcast %c2_i32_38 : i32 to vector<2x16x10xi32>
    %44 = arith.muli %43, %31 : vector<2x16x10xi32>
    %c2_i32_39 = arith.constant 2 : i32
    %45 = vector.broadcast %c2_i32_39 : i32 to vector<2x16x10xi32>
    %46 = arith.subi %44, %45 : vector<2x16x10xi32>
    %47 = vector.broadcast %42 : vector<2x1x1xi32> to vector<2x16x10xi32>
    %48 = arith.cmpi sle, %47, %46 : vector<2x16x10xi32>
    %49 = arith.ori %38, %48 : vector<2x16x10xi1>
    %50 = tpu.iota {dimensions = array<i32: 2>} : vector<2x1x8xi32>
    %51 = vector.broadcast %29 : vector<2x1x1xi32> to vector<2x1x8xi32>
    %52 = arith.cmpi sge, %50, %51 : vector<2x1x8xi32>
    %cst = arith.constant dense<0.000000e+00> : vector<32x32xf32>
    %53 = tpu.matmul %25, %0, %cst {dimension_numbers = #tpu.dot_dimension_numbers<[1], [0], [0], [1], [0, 0, 1, 1], [], []>} : vector<32x4xbf16>, vector<4x32xbf16>, vector<32x32xf32> -> vector<32x32xf32>
    %54 = vector.broadcast %8 : vector<1x32xf32> to vector<32x32xf32>
    %55 = arith.addf %53, %54 : vector<32x32xf32>
    %56 = arith.addf %55, %24 : vector<32x32xf32>
    %cst_40 = arith.constant dense<0.000000e+00> : vector<20x8xf32>
    %57 = tpu.matmul %26, %1, %cst_40 {dimension_numbers = #tpu.dot_dimension_numbers<[1], [0], [0], [1], [0, 0, 1, 1], [], []>} : vector<20x12xbf16>, vector<12x8xbf16>, vector<20x8xf32> -> vector<20x8xf32>
    %58 = vector.broadcast %9 : vector<1x8xf32> to vector<20x8xf32>
    %59 = arith.addf %57, %58 : vector<20x8xf32>
    %60 = arith.truncf %59 : vector<20x8xf32> to vector<20x8xbf16>
    %cst_41 = arith.constant dense<0.000000e+00> : vector<20x32xf32>
    %61 = tpu.matmul %60, %2, %cst_41 {dimension_numbers = #tpu.dot_dimension_numbers<[1], [0], [0], [1], [0, 0, 1, 1], [], []>} : vector<20x8xbf16>, vector<8x32xbf16>, vector<20x32xf32> -> vector<20x32xf32>
    %62 = vector.broadcast %10 : vector<1x32xf32> to vector<20x32xf32>
    %63 = arith.addf %61, %62 : vector<20x32xf32>
    %64 = arith.truncf %56 : vector<32x32xf32> to vector<32x32xbf16>
    %65 = vector.extract_strided_slice %3 {offsets = [0, 0], sizes = [32, 32], strides = [1, 1]} : vector<32x96xbf16> to vector<32x32xbf16>
    %cst_42 = arith.constant dense<0.000000e+00> : vector<32x32xf32>
    %66 = tpu.matmul %64, %65, %cst_42 {dimension_numbers = #tpu.dot_dimension_numbers<[1], [0], [0], [1], [0, 0, 1, 1], [], []>} : vector<32x32xbf16>, vector<32x32xbf16>, vector<32x32xf32> -> vector<32x32xf32>
    %67 = vector.extract_strided_slice %11 {offsets = [0, 0], sizes = [1, 32], strides = [1, 1]} : vector<1x96xf32> to vector<1x32xf32>
    %68 = vector.broadcast %67 : vector<1x32xf32> to vector<32x32xf32>
    %69 = arith.addf %66, %68 : vector<32x32xf32>
    %70 = arith.truncf %63 : vector<20x32xf32> to vector<20x32xbf16>
    %71 = vector.extract_strided_slice %3 {offsets = [0, 32], sizes = [32, 64], strides = [1, 1]} : vector<32x96xbf16> to vector<32x64xbf16>
    %cst_43 = arith.constant dense<0.000000e+00> : vector<20x64xf32>
    %72 = tpu.matmul %70, %71, %cst_43 {dimension_numbers = #tpu.dot_dimension_numbers<[1], [0], [0], [1], [0, 0, 1, 1], [], []>} : vector<20x32xbf16>, vector<32x64xbf16>, vector<20x64xf32> -> vector<20x64xf32>
    %73 = vector.extract_strided_slice %11 {offsets = [0, 32], sizes = [1, 64], strides = [1, 1]} : vector<1x96xf32> to vector<1x64xf32>
    %74 = vector.broadcast %73 : vector<1x64xf32> to vector<20x64xf32>
    %75 = arith.addf %72, %74 : vector<20x64xf32>
    %76 = vector.extract_strided_slice %69 {offsets = [0, 0], sizes = [32, 8], strides = [1, 1]} : vector<32x32xf32> to vector<32x8xf32>
    %77 = vector.shape_cast %76 : vector<32x8xf32> to vector<2x16x8xf32>
    %78 = arith.truncf %77 : vector<2x16x8xf32> to vector<2x16x8xbf16>
    %79 = vector.extract_strided_slice %75 {offsets = [0, 0], sizes = [20, 8], strides = [1, 1]} : vector<20x64xf32> to vector<20x8xf32>
    %80 = vector.shape_cast %79 : vector<20x8xf32> to vector<2x10x8xf32>
    %81 = arith.truncf %80 : vector<2x10x8xf32> to vector<2x10x8xbf16>
    %82 = vector.extract_strided_slice %75 {offsets = [0, 32], sizes = [20, 8], strides = [1, 1]} : vector<20x64xf32> to vector<20x8xf32>
    %83 = vector.shape_cast %82 : vector<20x8xf32> to vector<2x10x8xf32>
    %84 = arith.truncf %83 : vector<2x10x8xf32> to vector<2x10x8xbf16>
    "tpu.trace_start"() <{level = 10 : i32, message = "bqd,bkd->bqk"}> : () -> ()
    %cst_44 = arith.constant dense<0.000000e+00> : vector<2x16x10xf32>
    %85 = tpu.matmul %78, %81, %cst_44 {dimension_numbers = #tpu.dot_dimension_numbers<[2], [2], [1], [1], [0, 0, 0, 1, 1, 1], [0], [0]>} : vector<2x16x8xbf16>, vector<2x10x8xbf16>, vector<2x16x10xf32> -> vector<2x16x10xf32>
    "tpu.trace_stop"() : () -> ()
    %cst_45 = arith.constant 0.353553385 : f32
    %86 = vector.broadcast %cst_45 : f32 to vector<2x16x10xf32>
    %87 = arith.mulf %85, %86 : vector<2x16x10xf32>
    %cst_46 = arith.constant -1.000000e+30 : f32
    %88 = vector.broadcast %cst_46 : f32 to vector<2x16x10xf32>
    %89 = arith.select %49, %88, %87 : vector<2x16x10xi1>, vector<2x16x10xf32>
    %cst_47 = arith.constant dense<0xFF800000> : vector<2x16xf32>
    %90 = vector.multi_reduction <maximumf>, %89, %cst_47 [2] : vector<2x16x10xf32> to vector<2x16xf32>
    %91 = vector.shape_cast %90 : vector<2x16xf32> to vector<2x16x1xf32>
    %92 = vector.broadcast %91 : vector<2x16x1xf32> to vector<2x16x10xf32>
    %93 = arith.subf %89, %92 : vector<2x16x10xf32>
    %94 = math.exp %93 : vector<2x16x10xf32>
    %cst_48 = arith.constant dense<0.000000e+00> : vector<2x16xf32>
    %95 = vector.multi_reduction <add>, %94, %cst_48 [2] : vector<2x16x10xf32> to vector<2x16xf32>
    %96 = vector.shape_cast %95 : vector<2x16xf32> to vector<2x16x1xf32>
    %97 = tpu.reciprocal %96 {approx = true} : vector<2x16x1xf32> -> vector<2x16x1xf32>
    %98 = vector.broadcast %97 : vector<2x16x1xf32> to vector<2x16x10xf32>
    %99 = arith.mulf %94, %98 : vector<2x16x10xf32>
    %100 = arith.truncf %99 : vector<2x16x10xf32> to vector<2x16x10xbf16>
    "tpu.trace_start"() <{level = 10 : i32, message = "bqk,bkd->bqd"}> : () -> ()
    %cst_49 = arith.constant dense<0.000000e+00> : vector<2x16x8xf32>
    %101 = tpu.matmul %100, %84, %cst_49 {dimension_numbers = #tpu.dot_dimension_numbers<[2], [1], [1], [2], [0, 0, 0, 1, 1, 2], [0], [0]>} : vector<2x16x10xbf16>, vector<2x10x8xbf16>, vector<2x16x8xf32> -> vector<2x16x8xf32>
    "tpu.trace_stop"() : () -> ()
    %102 = vector.shape_cast %101 : vector<2x16x8xf32> to vector<32x8xf32>
    %103 = arith.truncf %102 : vector<32x8xf32> to vector<32x8xbf16>
    %104 = vector.extract_strided_slice %4 {offsets = [0, 0], sizes = [8, 32], strides = [1, 1]} : vector<32x32xbf16> to vector<8x32xbf16>
    %cst_50 = arith.constant dense<0.000000e+00> : vector<32x32xf32>
    %105 = tpu.matmul %103, %104, %cst_50 {dimension_numbers = #tpu.dot_dimension_numbers<[1], [0], [0], [1], [0, 0, 1, 1], [], []>} : vector<32x8xbf16>, vector<8x32xbf16>, vector<32x32xf32> -> vector<32x32xf32>
    %106 = vector.broadcast %12 : vector<1x32xf32> to vector<32x32xf32>
    %107 = arith.addf %106, %105 : vector<32x32xf32>
    %108 = vector.extract_strided_slice %69 {offsets = [0, 8], sizes = [32, 8], strides = [1, 1]} : vector<32x32xf32> to vector<32x8xf32>
    %109 = vector.shape_cast %108 : vector<32x8xf32> to vector<2x16x8xf32>
    %110 = arith.truncf %109 : vector<2x16x8xf32> to vector<2x16x8xbf16>
    %111 = vector.extract_strided_slice %75 {offsets = [0, 8], sizes = [20, 8], strides = [1, 1]} : vector<20x64xf32> to vector<20x8xf32>
    %112 = vector.shape_cast %111 : vector<20x8xf32> to vector<2x10x8xf32>
    %113 = arith.truncf %112 : vector<2x10x8xf32> to vector<2x10x8xbf16>
    %114 = vector.extract_strided_slice %75 {offsets = [0, 40], sizes = [20, 8], strides = [1, 1]} : vector<20x64xf32> to vector<20x8xf32>
    %115 = vector.shape_cast %114 : vector<20x8xf32> to vector<2x10x8xf32>
    %116 = arith.truncf %115 : vector<2x10x8xf32> to vector<2x10x8xbf16>
    "tpu.trace_start"() <{level = 10 : i32, message = "bqd,bkd->bqk"}> : () -> ()
    %cst_51 = arith.constant dense<0.000000e+00> : vector<2x16x10xf32>
    %117 = tpu.matmul %110, %113, %cst_51 {dimension_numbers = #tpu.dot_dimension_numbers<[2], [2], [1], [1], [0, 0, 0, 1, 1, 1], [0], [0]>} : vector<2x16x8xbf16>, vector<2x10x8xbf16>, vector<2x16x10xf32> -> vector<2x16x10xf32>
    "tpu.trace_stop"() : () -> ()
    %cst_52 = arith.constant 0.353553385 : f32
    %118 = vector.broadcast %cst_52 : f32 to vector<2x16x10xf32>
    %119 = arith.mulf %117, %118 : vector<2x16x10xf32>
    %cst_53 = arith.constant -1.000000e+30 : f32
    %120 = vector.broadcast %cst_53 : f32 to vector<2x16x10xf32>
    %121 = arith.select %49, %120, %119 : vector<2x16x10xi1>, vector<2x16x10xf32>
    %cst_54 = arith.constant dense<0xFF800000> : vector<2x16xf32>
    %122 = vector.multi_reduction <maximumf>, %121, %cst_54 [2] : vector<2x16x10xf32> to vector<2x16xf32>
    %123 = vector.shape_cast %122 : vector<2x16xf32> to vector<2x16x1xf32>
    %124 = vector.broadcast %123 : vector<2x16x1xf32> to vector<2x16x10xf32>
    %125 = arith.subf %121, %124 : vector<2x16x10xf32>
    %126 = math.exp %125 : vector<2x16x10xf32>
    %cst_55 = arith.constant dense<0.000000e+00> : vector<2x16xf32>
    %127 = vector.multi_reduction <add>, %126, %cst_55 [2] : vector<2x16x10xf32> to vector<2x16xf32>
    %128 = vector.shape_cast %127 : vector<2x16xf32> to vector<2x16x1xf32>
    %129 = tpu.reciprocal %128 {approx = true} : vector<2x16x1xf32> -> vector<2x16x1xf32>
    %130 = vector.broadcast %129 : vector<2x16x1xf32> to vector<2x16x10xf32>
    %131 = arith.mulf %126, %130 : vector<2x16x10xf32>
    %132 = arith.truncf %131 : vector<2x16x10xf32> to vector<2x16x10xbf16>
    "tpu.trace_start"() <{level = 10 : i32, message = "bqk,bkd->bqd"}> : () -> ()
    %cst_56 = arith.constant dense<0.000000e+00> : vector<2x16x8xf32>
    %133 = tpu.matmul %132, %116, %cst_56 {dimension_numbers = #tpu.dot_dimension_numbers<[2], [1], [1], [2], [0, 0, 0, 1, 1, 2], [0], [0]>} : vector<2x16x10xbf16>, vector<2x10x8xbf16>, vector<2x16x8xf32> -> vector<2x16x8xf32>
    "tpu.trace_stop"() : () -> ()
    %134 = vector.shape_cast %133 : vector<2x16x8xf32> to vector<32x8xf32>
    %135 = arith.truncf %134 : vector<32x8xf32> to vector<32x8xbf16>
    %136 = vector.extract_strided_slice %4 {offsets = [8, 0], sizes = [8, 32], strides = [1, 1]} : vector<32x32xbf16> to vector<8x32xbf16>
    %cst_57 = arith.constant dense<0.000000e+00> : vector<32x32xf32>
    %137 = tpu.matmul %135, %136, %cst_57 {dimension_numbers = #tpu.dot_dimension_numbers<[1], [0], [0], [1], [0, 0, 1, 1], [], []>} : vector<32x8xbf16>, vector<8x32xbf16>, vector<32x32xf32> -> vector<32x32xf32>
    %138 = arith.addf %107, %137 : vector<32x32xf32>
    %139 = vector.extract_strided_slice %69 {offsets = [0, 16], sizes = [32, 8], strides = [1, 1]} : vector<32x32xf32> to vector<32x8xf32>
    %140 = vector.shape_cast %139 : vector<32x8xf32> to vector<2x16x8xf32>
    %141 = arith.truncf %140 : vector<2x16x8xf32> to vector<2x16x8xbf16>
    %142 = vector.extract_strided_slice %75 {offsets = [0, 16], sizes = [20, 8], strides = [1, 1]} : vector<20x64xf32> to vector<20x8xf32>
    %143 = vector.shape_cast %142 : vector<20x8xf32> to vector<2x10x8xf32>
    %144 = arith.truncf %143 : vector<2x10x8xf32> to vector<2x10x8xbf16>
    %145 = vector.extract_strided_slice %75 {offsets = [0, 48], sizes = [20, 8], strides = [1, 1]} : vector<20x64xf32> to vector<20x8xf32>
    %146 = vector.shape_cast %145 : vector<20x8xf32> to vector<2x10x8xf32>
    %147 = arith.truncf %146 : vector<2x10x8xf32> to vector<2x10x8xbf16>
    "tpu.trace_start"() <{level = 10 : i32, message = "bqd,bkd->bqk"}> : () -> ()
    %cst_58 = arith.constant dense<0.000000e+00> : vector<2x16x10xf32>
    %148 = tpu.matmul %141, %144, %cst_58 {dimension_numbers = #tpu.dot_dimension_numbers<[2], [2], [1], [1], [0, 0, 0, 1, 1, 1], [0], [0]>} : vector<2x16x8xbf16>, vector<2x10x8xbf16>, vector<2x16x10xf32> -> vector<2x16x10xf32>
    "tpu.trace_stop"() : () -> ()
    %cst_59 = arith.constant 0.353553385 : f32
    %149 = vector.broadcast %cst_59 : f32 to vector<2x16x10xf32>
    %150 = arith.mulf %148, %149 : vector<2x16x10xf32>
    %cst_60 = arith.constant -1.000000e+30 : f32
    %151 = vector.broadcast %cst_60 : f32 to vector<2x16x10xf32>
    %152 = arith.select %49, %151, %150 : vector<2x16x10xi1>, vector<2x16x10xf32>
    %cst_61 = arith.constant dense<0xFF800000> : vector<2x16xf32>
    %153 = vector.multi_reduction <maximumf>, %152, %cst_61 [2] : vector<2x16x10xf32> to vector<2x16xf32>
    %154 = vector.shape_cast %153 : vector<2x16xf32> to vector<2x16x1xf32>
    %155 = vector.broadcast %154 : vector<2x16x1xf32> to vector<2x16x10xf32>
    %156 = arith.subf %152, %155 : vector<2x16x10xf32>
    %157 = math.exp %156 : vector<2x16x10xf32>
    %cst_62 = arith.constant dense<0.000000e+00> : vector<2x16xf32>
    %158 = vector.multi_reduction <add>, %157, %cst_62 [2] : vector<2x16x10xf32> to vector<2x16xf32>
    %159 = vector.shape_cast %158 : vector<2x16xf32> to vector<2x16x1xf32>
    %160 = tpu.reciprocal %159 {approx = true} : vector<2x16x1xf32> -> vector<2x16x1xf32>
    %161 = vector.broadcast %160 : vector<2x16x1xf32> to vector<2x16x10xf32>
    %162 = arith.mulf %157, %161 : vector<2x16x10xf32>
    %163 = arith.truncf %162 : vector<2x16x10xf32> to vector<2x16x10xbf16>
    "tpu.trace_start"() <{level = 10 : i32, message = "bqk,bkd->bqd"}> : () -> ()
    %cst_63 = arith.constant dense<0.000000e+00> : vector<2x16x8xf32>
    %164 = tpu.matmul %163, %147, %cst_63 {dimension_numbers = #tpu.dot_dimension_numbers<[2], [1], [1], [2], [0, 0, 0, 1, 1, 2], [0], [0]>} : vector<2x16x10xbf16>, vector<2x10x8xbf16>, vector<2x16x8xf32> -> vector<2x16x8xf32>
    "tpu.trace_stop"() : () -> ()
    %165 = vector.shape_cast %164 : vector<2x16x8xf32> to vector<32x8xf32>
    %166 = arith.truncf %165 : vector<32x8xf32> to vector<32x8xbf16>
    %167 = vector.extract_strided_slice %4 {offsets = [16, 0], sizes = [8, 32], strides = [1, 1]} : vector<32x32xbf16> to vector<8x32xbf16>
    %cst_64 = arith.constant dense<0.000000e+00> : vector<32x32xf32>
    %168 = tpu.matmul %166, %167, %cst_64 {dimension_numbers = #tpu.dot_dimension_numbers<[1], [0], [0], [1], [0, 0, 1, 1], [], []>} : vector<32x8xbf16>, vector<8x32xbf16>, vector<32x32xf32> -> vector<32x32xf32>
    %169 = arith.addf %138, %168 : vector<32x32xf32>
    %170 = vector.extract_strided_slice %69 {offsets = [0, 24], sizes = [32, 8], strides = [1, 1]} : vector<32x32xf32> to vector<32x8xf32>
    %171 = vector.shape_cast %170 : vector<32x8xf32> to vector<2x16x8xf32>
    %172 = arith.truncf %171 : vector<2x16x8xf32> to vector<2x16x8xbf16>
    %173 = vector.extract_strided_slice %75 {offsets = [0, 24], sizes = [20, 8], strides = [1, 1]} : vector<20x64xf32> to vector<20x8xf32>
    %174 = vector.shape_cast %173 : vector<20x8xf32> to vector<2x10x8xf32>
    %175 = arith.truncf %174 : vector<2x10x8xf32> to vector<2x10x8xbf16>
    %176 = vector.extract_strided_slice %75 {offsets = [0, 56], sizes = [20, 8], strides = [1, 1]} : vector<20x64xf32> to vector<20x8xf32>
    %177 = vector.shape_cast %176 : vector<20x8xf32> to vector<2x10x8xf32>
    %178 = arith.truncf %177 : vector<2x10x8xf32> to vector<2x10x8xbf16>
    "tpu.trace_start"() <{level = 10 : i32, message = "bqd,bkd->bqk"}> : () -> ()
    %cst_65 = arith.constant dense<0.000000e+00> : vector<2x16x10xf32>
    %179 = tpu.matmul %172, %175, %cst_65 {dimension_numbers = #tpu.dot_dimension_numbers<[2], [2], [1], [1], [0, 0, 0, 1, 1, 1], [0], [0]>} : vector<2x16x8xbf16>, vector<2x10x8xbf16>, vector<2x16x10xf32> -> vector<2x16x10xf32>
    "tpu.trace_stop"() : () -> ()
    %cst_66 = arith.constant 0.353553385 : f32
    %180 = vector.broadcast %cst_66 : f32 to vector<2x16x10xf32>
    %181 = arith.mulf %179, %180 : vector<2x16x10xf32>
    %cst_67 = arith.constant -1.000000e+30 : f32
    %182 = vector.broadcast %cst_67 : f32 to vector<2x16x10xf32>
    %183 = arith.select %49, %182, %181 : vector<2x16x10xi1>, vector<2x16x10xf32>
    %cst_68 = arith.constant dense<0xFF800000> : vector<2x16xf32>
    %184 = vector.multi_reduction <maximumf>, %183, %cst_68 [2] : vector<2x16x10xf32> to vector<2x16xf32>
    %185 = vector.shape_cast %184 : vector<2x16xf32> to vector<2x16x1xf32>
    %186 = vector.broadcast %185 : vector<2x16x1xf32> to vector<2x16x10xf32>
    %187 = arith.subf %183, %186 : vector<2x16x10xf32>
    %188 = math.exp %187 : vector<2x16x10xf32>
    %cst_69 = arith.constant dense<0.000000e+00> : vector<2x16xf32>
    %189 = vector.multi_reduction <add>, %188, %cst_69 [2] : vector<2x16x10xf32> to vector<2x16xf32>
    %190 = vector.shape_cast %189 : vector<2x16xf32> to vector<2x16x1xf32>
    %191 = tpu.reciprocal %190 {approx = true} : vector<2x16x1xf32> -> vector<2x16x1xf32>
    %192 = vector.broadcast %191 : vector<2x16x1xf32> to vector<2x16x10xf32>
    %193 = arith.mulf %188, %192 : vector<2x16x10xf32>
    %194 = arith.truncf %193 : vector<2x16x10xf32> to vector<2x16x10xbf16>
    "tpu.trace_start"() <{level = 10 : i32, message = "bqk,bkd->bqd"}> : () -> ()
    %cst_70 = arith.constant dense<0.000000e+00> : vector<2x16x8xf32>
    %195 = tpu.matmul %194, %178, %cst_70 {dimension_numbers = #tpu.dot_dimension_numbers<[2], [1], [1], [2], [0, 0, 0, 1, 1, 2], [0], [0]>} : vector<2x16x10xbf16>, vector<2x10x8xbf16>, vector<2x16x8xf32> -> vector<2x16x8xf32>
    "tpu.trace_stop"() : () -> ()
    %196 = vector.shape_cast %195 : vector<2x16x8xf32> to vector<32x8xf32>
    %197 = arith.truncf %196 : vector<32x8xf32> to vector<32x8xbf16>
    %198 = vector.extract_strided_slice %4 {offsets = [24, 0], sizes = [8, 32], strides = [1, 1]} : vector<32x32xbf16> to vector<8x32xbf16>
    %cst_71 = arith.constant dense<0.000000e+00> : vector<32x32xf32>
    %199 = tpu.matmul %197, %198, %cst_71 {dimension_numbers = #tpu.dot_dimension_numbers<[1], [0], [0], [1], [0, 0, 1, 1], [], []>} : vector<32x8xbf16>, vector<8x32xbf16>, vector<32x32xf32> -> vector<32x32xf32>
    %200 = arith.addf %169, %199 : vector<32x32xf32>
    %201 = arith.addf %56, %200 : vector<32x32xf32>
    %cst_72 = arith.constant dense<0.000000e+00> : vector<32xf32>
    %202 = vector.multi_reduction <add>, %201, %cst_72 [1] : vector<32x32xf32> to vector<32xf32>
    %203 = vector.shape_cast %202 : vector<32xf32> to vector<32x1xf32>
    %cst_73 = arith.constant 3.200000e+01 : f32
    %204 = vector.broadcast %cst_73 : f32 to vector<32x1xf32>
    %205 = arith.divf %203, %204 : vector<32x1xf32>
    %206 = vector.broadcast %205 : vector<32x1xf32> to vector<32x32xf32>
    %207 = arith.subf %201, %206 : vector<32x32xf32>
    %208 = arith.mulf %207, %207 : vector<32x32xf32>
    %cst_74 = arith.constant dense<0.000000e+00> : vector<32xf32>
    %209 = vector.multi_reduction <add>, %208, %cst_74 [1] : vector<32x32xf32> to vector<32xf32>
    %210 = vector.shape_cast %209 : vector<32xf32> to vector<32x1xf32>
    %cst_75 = arith.constant 3.200000e+01 : f32
    %211 = vector.broadcast %cst_75 : f32 to vector<32x1xf32>
    %212 = arith.divf %210, %211 : vector<32x1xf32>
    %cst_76 = arith.constant 9.99999974E-6 : f32
    %213 = vector.broadcast %cst_76 : f32 to vector<32x1xf32>
    %214 = arith.addf %212, %213 : vector<32x1xf32>
    %215 = math.rsqrt %214 : vector<32x1xf32>
    %216 = vector.broadcast %215 : vector<32x1xf32> to vector<32x32xf32>
    %217 = arith.mulf %207, %216 : vector<32x32xf32>
    %218 = vector.broadcast %13 : vector<1x32xf32> to vector<32x32xf32>
    %219 = arith.mulf %217, %218 : vector<32x32xf32>
    %220 = vector.broadcast %14 : vector<1x32xf32> to vector<32x32xf32>
    %221 = arith.addf %219, %220 : vector<32x32xf32>
    %222 = arith.truncf %221 : vector<32x32xf32> to vector<32x32xbf16>
    %223 = vector.extract_strided_slice %5 {offsets = [0, 0], sizes = [32, 32], strides = [1, 1]} : vector<32x96xbf16> to vector<32x32xbf16>
    %cst_77 = arith.constant dense<0.000000e+00> : vector<32x32xf32>
    %224 = tpu.matmul %222, %223, %cst_77 {dimension_numbers = #tpu.dot_dimension_numbers<[1], [0], [0], [1], [0, 0, 1, 1], [], []>} : vector<32x32xbf16>, vector<32x32xbf16>, vector<32x32xf32> -> vector<32x32xf32>
    %225 = vector.extract_strided_slice %15 {offsets = [0, 0], sizes = [1, 32], strides = [1, 1]} : vector<1x96xf32> to vector<1x32xf32>
    %226 = vector.broadcast %225 : vector<1x32xf32> to vector<32x32xf32>
    %227 = arith.addf %224, %226 : vector<32x32xf32>
    %228 = vector.extract_strided_slice %5 {offsets = [0, 32], sizes = [32, 64], strides = [1, 1]} : vector<32x96xbf16> to vector<32x64xbf16>
    %cst_78 = arith.constant dense<0.000000e+00> : vector<16x64xf32>
    %229 = tpu.matmul %27, %228, %cst_78 {dimension_numbers = #tpu.dot_dimension_numbers<[1], [0], [0], [1], [0, 0, 1, 1], [], []>} : vector<16x32xbf16>, vector<32x64xbf16>, vector<16x64xf32> -> vector<16x64xf32>
    %230 = vector.extract_strided_slice %15 {offsets = [0, 32], sizes = [1, 64], strides = [1, 1]} : vector<1x96xf32> to vector<1x64xf32>
    %231 = vector.broadcast %230 : vector<1x64xf32> to vector<16x64xf32>
    %232 = arith.addf %229, %231 : vector<16x64xf32>
    %233 = vector.extract_strided_slice %227 {offsets = [0, 0], sizes = [32, 8], strides = [1, 1]} : vector<32x32xf32> to vector<32x8xf32>
    %234 = vector.shape_cast %233 : vector<32x8xf32> to vector<2x16x8xf32>
    %235 = arith.truncf %234 : vector<2x16x8xf32> to vector<2x16x8xbf16>
    %236 = vector.extract_strided_slice %232 {offsets = [0, 0], sizes = [16, 8], strides = [1, 1]} : vector<16x64xf32> to vector<16x8xf32>
    %237 = vector.shape_cast %236 : vector<16x8xf32> to vector<2x8x8xf32>
    %238 = arith.truncf %237 : vector<2x8x8xf32> to vector<2x8x8xbf16>
    %239 = vector.extract_strided_slice %232 {offsets = [0, 32], sizes = [16, 8], strides = [1, 1]} : vector<16x64xf32> to vector<16x8xf32>
    %240 = vector.shape_cast %239 : vector<16x8xf32> to vector<2x8x8xf32>
    %241 = arith.truncf %240 : vector<2x8x8xf32> to vector<2x8x8xbf16>
    "tpu.trace_start"() <{level = 10 : i32, message = "bqd,bkd->bqk"}> : () -> ()
    %cst_79 = arith.constant dense<0.000000e+00> : vector<2x16x8xf32>
    %242 = tpu.matmul %235, %238, %cst_79 {dimension_numbers = #tpu.dot_dimension_numbers<[2], [2], [1], [1], [0, 0, 0, 1, 1, 1], [0], [0]>} : vector<2x16x8xbf16>, vector<2x8x8xbf16>, vector<2x16x8xf32> -> vector<2x16x8xf32>
    "tpu.trace_stop"() : () -> ()
    %cst_80 = arith.constant 0.353553385 : f32
    %243 = vector.broadcast %cst_80 : f32 to vector<2x16x8xf32>
    %244 = arith.mulf %242, %243 : vector<2x16x8xf32>
    %cst_81 = arith.constant -1.000000e+30 : f32
    %245 = vector.shape_cast %52 : vector<2x1x8xi1> to vector<2x1x8xi1>
    %246 = vector.broadcast %245 : vector<2x1x8xi1> to vector<2x16x8xi1>
    %247 = vector.broadcast %cst_81 : f32 to vector<2x16x8xf32>
    %248 = arith.select %246, %247, %244 : vector<2x16x8xi1>, vector<2x16x8xf32>
    %cst_82 = arith.constant dense<0xFF800000> : vector<2x16xf32>
    %249 = vector.multi_reduction <maximumf>, %248, %cst_82 [2] : vector<2x16x8xf32> to vector<2x16xf32>
    %250 = vector.shape_cast %249 : vector<2x16xf32> to vector<2x16x1xf32>
    %251 = vector.broadcast %250 : vector<2x16x1xf32> to vector<2x16x8xf32>
    %252 = arith.subf %248, %251 : vector<2x16x8xf32>
    %253 = math.exp %252 : vector<2x16x8xf32>
    %cst_83 = arith.constant dense<0.000000e+00> : vector<2x16xf32>
    %254 = vector.multi_reduction <add>, %253, %cst_83 [2] : vector<2x16x8xf32> to vector<2x16xf32>
    %255 = vector.shape_cast %254 : vector<2x16xf32> to vector<2x16x1xf32>
    %256 = tpu.reciprocal %255 {approx = true} : vector<2x16x1xf32> -> vector<2x16x1xf32>
    %257 = vector.broadcast %256 : vector<2x16x1xf32> to vector<2x16x8xf32>
    %258 = arith.mulf %253, %257 : vector<2x16x8xf32>
    %259 = arith.truncf %258 : vector<2x16x8xf32> to vector<2x16x8xbf16>
    "tpu.trace_start"() <{level = 10 : i32, message = "bqk,bkd->bqd"}> : () -> ()
    %cst_84 = arith.constant dense<0.000000e+00> : vector<2x16x8xf32>
    %260 = tpu.matmul %259, %241, %cst_84 {dimension_numbers = #tpu.dot_dimension_numbers<[2], [1], [1], [2], [0, 0, 0, 1, 1, 2], [0], [0]>} : vector<2x16x8xbf16>, vector<2x8x8xbf16>, vector<2x16x8xf32> -> vector<2x16x8xf32>
    "tpu.trace_stop"() : () -> ()
    %261 = vector.shape_cast %260 : vector<2x16x8xf32> to vector<32x8xf32>
    %262 = arith.truncf %261 : vector<32x8xf32> to vector<32x8xbf16>
    %263 = vector.extract_strided_slice %6 {offsets = [0, 0], sizes = [8, 32], strides = [1, 1]} : vector<32x32xbf16> to vector<8x32xbf16>
    %cst_85 = arith.constant dense<0.000000e+00> : vector<32x32xf32>
    %264 = tpu.matmul %262, %263, %cst_85 {dimension_numbers = #tpu.dot_dimension_numbers<[1], [0], [0], [1], [0, 0, 1, 1], [], []>} : vector<32x8xbf16>, vector<8x32xbf16>, vector<32x32xf32> -> vector<32x32xf32>
    %265 = vector.broadcast %16 : vector<1x32xf32> to vector<32x32xf32>
    %266 = arith.addf %265, %264 : vector<32x32xf32>
    %267 = vector.extract_strided_slice %227 {offsets = [0, 8], sizes = [32, 8], strides = [1, 1]} : vector<32x32xf32> to vector<32x8xf32>
    %268 = vector.shape_cast %267 : vector<32x8xf32> to vector<2x16x8xf32>
    %269 = arith.truncf %268 : vector<2x16x8xf32> to vector<2x16x8xbf16>
    %270 = vector.extract_strided_slice %232 {offsets = [0, 8], sizes = [16, 8], strides = [1, 1]} : vector<16x64xf32> to vector<16x8xf32>
    %271 = vector.shape_cast %270 : vector<16x8xf32> to vector<2x8x8xf32>
    %272 = arith.truncf %271 : vector<2x8x8xf32> to vector<2x8x8xbf16>
    %273 = vector.extract_strided_slice %232 {offsets = [0, 40], sizes = [16, 8], strides = [1, 1]} : vector<16x64xf32> to vector<16x8xf32>
    %274 = vector.shape_cast %273 : vector<16x8xf32> to vector<2x8x8xf32>
    %275 = arith.truncf %274 : vector<2x8x8xf32> to vector<2x8x8xbf16>
    "tpu.trace_start"() <{level = 10 : i32, message = "bqd,bkd->bqk"}> : () -> ()
    %cst_86 = arith.constant dense<0.000000e+00> : vector<2x16x8xf32>
    %276 = tpu.matmul %269, %272, %cst_86 {dimension_numbers = #tpu.dot_dimension_numbers<[2], [2], [1], [1], [0, 0, 0, 1, 1, 1], [0], [0]>} : vector<2x16x8xbf16>, vector<2x8x8xbf16>, vector<2x16x8xf32> -> vector<2x16x8xf32>
    "tpu.trace_stop"() : () -> ()
    %cst_87 = arith.constant 0.353553385 : f32
    %277 = vector.broadcast %cst_87 : f32 to vector<2x16x8xf32>
    %278 = arith.mulf %276, %277 : vector<2x16x8xf32>
    %cst_88 = arith.constant -1.000000e+30 : f32
    %279 = vector.shape_cast %52 : vector<2x1x8xi1> to vector<2x1x8xi1>
    %280 = vector.broadcast %279 : vector<2x1x8xi1> to vector<2x16x8xi1>
    %281 = vector.broadcast %cst_88 : f32 to vector<2x16x8xf32>
    %282 = arith.select %280, %281, %278 : vector<2x16x8xi1>, vector<2x16x8xf32>
    %cst_89 = arith.constant dense<0xFF800000> : vector<2x16xf32>
    %283 = vector.multi_reduction <maximumf>, %282, %cst_89 [2] : vector<2x16x8xf32> to vector<2x16xf32>
    %284 = vector.shape_cast %283 : vector<2x16xf32> to vector<2x16x1xf32>
    %285 = vector.broadcast %284 : vector<2x16x1xf32> to vector<2x16x8xf32>
    %286 = arith.subf %282, %285 : vector<2x16x8xf32>
    %287 = math.exp %286 : vector<2x16x8xf32>
    %cst_90 = arith.constant dense<0.000000e+00> : vector<2x16xf32>
    %288 = vector.multi_reduction <add>, %287, %cst_90 [2] : vector<2x16x8xf32> to vector<2x16xf32>
    %289 = vector.shape_cast %288 : vector<2x16xf32> to vector<2x16x1xf32>
    %290 = tpu.reciprocal %289 {approx = true} : vector<2x16x1xf32> -> vector<2x16x1xf32>
    %291 = vector.broadcast %290 : vector<2x16x1xf32> to vector<2x16x8xf32>
    %292 = arith.mulf %287, %291 : vector<2x16x8xf32>
    %293 = arith.truncf %292 : vector<2x16x8xf32> to vector<2x16x8xbf16>
    "tpu.trace_start"() <{level = 10 : i32, message = "bqk,bkd->bqd"}> : () -> ()
    %cst_91 = arith.constant dense<0.000000e+00> : vector<2x16x8xf32>
    %294 = tpu.matmul %293, %275, %cst_91 {dimension_numbers = #tpu.dot_dimension_numbers<[2], [1], [1], [2], [0, 0, 0, 1, 1, 2], [0], [0]>} : vector<2x16x8xbf16>, vector<2x8x8xbf16>, vector<2x16x8xf32> -> vector<2x16x8xf32>
    "tpu.trace_stop"() : () -> ()
    %295 = vector.shape_cast %294 : vector<2x16x8xf32> to vector<32x8xf32>
    %296 = arith.truncf %295 : vector<32x8xf32> to vector<32x8xbf16>
    %297 = vector.extract_strided_slice %6 {offsets = [8, 0], sizes = [8, 32], strides = [1, 1]} : vector<32x32xbf16> to vector<8x32xbf16>
    %cst_92 = arith.constant dense<0.000000e+00> : vector<32x32xf32>
    %298 = tpu.matmul %296, %297, %cst_92 {dimension_numbers = #tpu.dot_dimension_numbers<[1], [0], [0], [1], [0, 0, 1, 1], [], []>} : vector<32x8xbf16>, vector<8x32xbf16>, vector<32x32xf32> -> vector<32x32xf32>
    %299 = arith.addf %266, %298 : vector<32x32xf32>
    %300 = vector.extract_strided_slice %227 {offsets = [0, 16], sizes = [32, 8], strides = [1, 1]} : vector<32x32xf32> to vector<32x8xf32>
    %301 = vector.shape_cast %300 : vector<32x8xf32> to vector<2x16x8xf32>
    %302 = arith.truncf %301 : vector<2x16x8xf32> to vector<2x16x8xbf16>
    %303 = vector.extract_strided_slice %232 {offsets = [0, 16], sizes = [16, 8], strides = [1, 1]} : vector<16x64xf32> to vector<16x8xf32>
    %304 = vector.shape_cast %303 : vector<16x8xf32> to vector<2x8x8xf32>
    %305 = arith.truncf %304 : vector<2x8x8xf32> to vector<2x8x8xbf16>
    %306 = vector.extract_strided_slice %232 {offsets = [0, 48], sizes = [16, 8], strides = [1, 1]} : vector<16x64xf32> to vector<16x8xf32>
    %307 = vector.shape_cast %306 : vector<16x8xf32> to vector<2x8x8xf32>
    %308 = arith.truncf %307 : vector<2x8x8xf32> to vector<2x8x8xbf16>
    "tpu.trace_start"() <{level = 10 : i32, message = "bqd,bkd->bqk"}> : () -> ()
    %cst_93 = arith.constant dense<0.000000e+00> : vector<2x16x8xf32>
    %309 = tpu.matmul %302, %305, %cst_93 {dimension_numbers = #tpu.dot_dimension_numbers<[2], [2], [1], [1], [0, 0, 0, 1, 1, 1], [0], [0]>} : vector<2x16x8xbf16>, vector<2x8x8xbf16>, vector<2x16x8xf32> -> vector<2x16x8xf32>
    "tpu.trace_stop"() : () -> ()
    %cst_94 = arith.constant 0.353553385 : f32
    %310 = vector.broadcast %cst_94 : f32 to vector<2x16x8xf32>
    %311 = arith.mulf %309, %310 : vector<2x16x8xf32>
    %cst_95 = arith.constant -1.000000e+30 : f32
    %312 = vector.shape_cast %52 : vector<2x1x8xi1> to vector<2x1x8xi1>
    %313 = vector.broadcast %312 : vector<2x1x8xi1> to vector<2x16x8xi1>
    %314 = vector.broadcast %cst_95 : f32 to vector<2x16x8xf32>
    %315 = arith.select %313, %314, %311 : vector<2x16x8xi1>, vector<2x16x8xf32>
    %cst_96 = arith.constant dense<0xFF800000> : vector<2x16xf32>
    %316 = vector.multi_reduction <maximumf>, %315, %cst_96 [2] : vector<2x16x8xf32> to vector<2x16xf32>
    %317 = vector.shape_cast %316 : vector<2x16xf32> to vector<2x16x1xf32>
    %318 = vector.broadcast %317 : vector<2x16x1xf32> to vector<2x16x8xf32>
    %319 = arith.subf %315, %318 : vector<2x16x8xf32>
    %320 = math.exp %319 : vector<2x16x8xf32>
    %cst_97 = arith.constant dense<0.000000e+00> : vector<2x16xf32>
    %321 = vector.multi_reduction <add>, %320, %cst_97 [2] : vector<2x16x8xf32> to vector<2x16xf32>
    %322 = vector.shape_cast %321 : vector<2x16xf32> to vector<2x16x1xf32>
    %323 = tpu.reciprocal %322 {approx = true} : vector<2x16x1xf32> -> vector<2x16x1xf32>
    %324 = vector.broadcast %323 : vector<2x16x1xf32> to vector<2x16x8xf32>
    %325 = arith.mulf %320, %324 : vector<2x16x8xf32>
    %326 = arith.truncf %325 : vector<2x16x8xf32> to vector<2x16x8xbf16>
    "tpu.trace_start"() <{level = 10 : i32, message = "bqk,bkd->bqd"}> : () -> ()
    %cst_98 = arith.constant dense<0.000000e+00> : vector<2x16x8xf32>
    %327 = tpu.matmul %326, %308, %cst_98 {dimension_numbers = #tpu.dot_dimension_numbers<[2], [1], [1], [2], [0, 0, 0, 1, 1, 2], [0], [0]>} : vector<2x16x8xbf16>, vector<2x8x8xbf16>, vector<2x16x8xf32> -> vector<2x16x8xf32>
    "tpu.trace_stop"() : () -> ()
    %328 = vector.shape_cast %327 : vector<2x16x8xf32> to vector<32x8xf32>
    %329 = arith.truncf %328 : vector<32x8xf32> to vector<32x8xbf16>
    %330 = vector.extract_strided_slice %6 {offsets = [16, 0], sizes = [8, 32], strides = [1, 1]} : vector<32x32xbf16> to vector<8x32xbf16>
    %cst_99 = arith.constant dense<0.000000e+00> : vector<32x32xf32>
    %331 = tpu.matmul %329, %330, %cst_99 {dimension_numbers = #tpu.dot_dimension_numbers<[1], [0], [0], [1], [0, 0, 1, 1], [], []>} : vector<32x8xbf16>, vector<8x32xbf16>, vector<32x32xf32> -> vector<32x32xf32>
    %332 = arith.addf %299, %331 : vector<32x32xf32>
    %333 = vector.extract_strided_slice %227 {offsets = [0, 24], sizes = [32, 8], strides = [1, 1]} : vector<32x32xf32> to vector<32x8xf32>
    %334 = vector.shape_cast %333 : vector<32x8xf32> to vector<2x16x8xf32>
    %335 = arith.truncf %334 : vector<2x16x8xf32> to vector<2x16x8xbf16>
    %336 = vector.extract_strided_slice %232 {offsets = [0, 24], sizes = [16, 8], strides = [1, 1]} : vector<16x64xf32> to vector<16x8xf32>
    %337 = vector.shape_cast %336 : vector<16x8xf32> to vector<2x8x8xf32>
    %338 = arith.truncf %337 : vector<2x8x8xf32> to vector<2x8x8xbf16>
    %339 = vector.extract_strided_slice %232 {offsets = [0, 56], sizes = [16, 8], strides = [1, 1]} : vector<16x64xf32> to vector<16x8xf32>
    %340 = vector.shape_cast %339 : vector<16x8xf32> to vector<2x8x8xf32>
    %341 = arith.truncf %340 : vector<2x8x8xf32> to vector<2x8x8xbf16>
    "tpu.trace_start"() <{level = 10 : i32, message = "bqd,bkd->bqk"}> : () -> ()
    %cst_100 = arith.constant dense<0.000000e+00> : vector<2x16x8xf32>
    %342 = tpu.matmul %335, %338, %cst_100 {dimension_numbers = #tpu.dot_dimension_numbers<[2], [2], [1], [1], [0, 0, 0, 1, 1, 1], [0], [0]>} : vector<2x16x8xbf16>, vector<2x8x8xbf16>, vector<2x16x8xf32> -> vector<2x16x8xf32>
    "tpu.trace_stop"() : () -> ()
    %cst_101 = arith.constant 0.353553385 : f32
    %343 = vector.broadcast %cst_101 : f32 to vector<2x16x8xf32>
    %344 = arith.mulf %342, %343 : vector<2x16x8xf32>
    %cst_102 = arith.constant -1.000000e+30 : f32
    %345 = vector.shape_cast %52 : vector<2x1x8xi1> to vector<2x1x8xi1>
    %346 = vector.broadcast %345 : vector<2x1x8xi1> to vector<2x16x8xi1>
    %347 = vector.broadcast %cst_102 : f32 to vector<2x16x8xf32>
    %348 = arith.select %346, %347, %344 : vector<2x16x8xi1>, vector<2x16x8xf32>
    %cst_103 = arith.constant dense<0xFF800000> : vector<2x16xf32>
    %349 = vector.multi_reduction <maximumf>, %348, %cst_103 [2] : vector<2x16x8xf32> to vector<2x16xf32>
    %350 = vector.shape_cast %349 : vector<2x16xf32> to vector<2x16x1xf32>
    %351 = vector.broadcast %350 : vector<2x16x1xf32> to vector<2x16x8xf32>
    %352 = arith.subf %348, %351 : vector<2x16x8xf32>
    %353 = math.exp %352 : vector<2x16x8xf32>
    %cst_104 = arith.constant dense<0.000000e+00> : vector<2x16xf32>
    %354 = vector.multi_reduction <add>, %353, %cst_104 [2] : vector<2x16x8xf32> to vector<2x16xf32>
    %355 = vector.shape_cast %354 : vector<2x16xf32> to vector<2x16x1xf32>
    %356 = tpu.reciprocal %355 {approx = true} : vector<2x16x1xf32> -> vector<2x16x1xf32>
    %357 = vector.broadcast %356 : vector<2x16x1xf32> to vector<2x16x8xf32>
    %358 = arith.mulf %353, %357 : vector<2x16x8xf32>
    %359 = arith.truncf %358 : vector<2x16x8xf32> to vector<2x16x8xbf16>
    "tpu.trace_start"() <{level = 10 : i32, message = "bqk,bkd->bqd"}> : () -> ()
    %cst_105 = arith.constant dense<0.000000e+00> : vector<2x16x8xf32>
    %360 = tpu.matmul %359, %341, %cst_105 {dimension_numbers = #tpu.dot_dimension_numbers<[2], [1], [1], [2], [0, 0, 0, 1, 1, 2], [0], [0]>} : vector<2x16x8xbf16>, vector<2x8x8xbf16>, vector<2x16x8xf32> -> vector<2x16x8xf32>
    "tpu.trace_stop"() : () -> ()
    %361 = vector.shape_cast %360 : vector<2x16x8xf32> to vector<32x8xf32>
    %362 = arith.truncf %361 : vector<32x8xf32> to vector<32x8xbf16>
    %363 = vector.extract_strided_slice %6 {offsets = [24, 0], sizes = [8, 32], strides = [1, 1]} : vector<32x32xbf16> to vector<8x32xbf16>
    %cst_106 = arith.constant dense<0.000000e+00> : vector<32x32xf32>
    %364 = tpu.matmul %362, %363, %cst_106 {dimension_numbers = #tpu.dot_dimension_numbers<[1], [0], [0], [1], [0, 0, 1, 1], [], []>} : vector<32x8xbf16>, vector<8x32xbf16>, vector<32x32xf32> -> vector<32x32xf32>
    %365 = arith.addf %332, %364 : vector<32x32xf32>
    %366 = arith.addf %221, %365 : vector<32x32xf32>
    %cst_107 = arith.constant dense<0.000000e+00> : vector<32xf32>
    %367 = vector.multi_reduction <add>, %366, %cst_107 [1] : vector<32x32xf32> to vector<32xf32>
    %368 = vector.shape_cast %367 : vector<32xf32> to vector<32x1xf32>
    %cst_108 = arith.constant 3.200000e+01 : f32
    %369 = vector.broadcast %cst_108 : f32 to vector<32x1xf32>
    %370 = arith.divf %368, %369 : vector<32x1xf32>
    %371 = vector.broadcast %370 : vector<32x1xf32> to vector<32x32xf32>
    %372 = arith.subf %366, %371 : vector<32x32xf32>
    %373 = arith.mulf %372, %372 : vector<32x32xf32>
    %cst_109 = arith.constant dense<0.000000e+00> : vector<32xf32>
    %374 = vector.multi_reduction <add>, %373, %cst_109 [1] : vector<32x32xf32> to vector<32xf32>
    %375 = vector.shape_cast %374 : vector<32xf32> to vector<32x1xf32>
    %cst_110 = arith.constant 3.200000e+01 : f32
    %376 = vector.broadcast %cst_110 : f32 to vector<32x1xf32>
    %377 = arith.divf %375, %376 : vector<32x1xf32>
    %cst_111 = arith.constant 9.99999974E-6 : f32
    %378 = vector.broadcast %cst_111 : f32 to vector<32x1xf32>
    %379 = arith.addf %377, %378 : vector<32x1xf32>
    %380 = math.rsqrt %379 : vector<32x1xf32>
    %381 = vector.broadcast %380 : vector<32x1xf32> to vector<32x32xf32>
    %382 = arith.mulf %372, %381 : vector<32x32xf32>
    %383 = vector.broadcast %17 : vector<1x32xf32> to vector<32x32xf32>
    %384 = arith.mulf %382, %383 : vector<32x32xf32>
    %385 = vector.broadcast %18 : vector<1x32xf32> to vector<32x32xf32>
    %386 = arith.addf %384, %385 : vector<32x32xf32>
    %387 = arith.truncf %386 : vector<32x32xf32> to vector<32x32xbf16>
    %cst_112 = arith.constant dense<0.000000e+00> : vector<32x4xf32>
    %388 = tpu.matmul %387, %7, %cst_112 {dimension_numbers = #tpu.dot_dimension_numbers<[1], [0], [0], [1], [0, 0, 1, 1], [], []>} : vector<32x32xbf16>, vector<32x4xbf16>, vector<32x4xf32> -> vector<32x4xf32>
    %389 = vector.broadcast %19 : vector<1x4xf32> to vector<32x4xf32>
    %390 = arith.addf %388, %389 : vector<32x4xf32>
    %c0_113 = arith.constant 0 : index
    %c0_114 = arith.constant 0 : index
    %c0_115 = arith.constant 0 : index
    %391 = vector.load %arg8[%c0_113, %c0_114, %c0_115] : memref<1x32x4xf32, #tpu.memory_space<vmem>>, vector<1x32x4xf32>
    %392 = vector.shape_cast %391 : vector<1x32x4xf32> to vector<32x4xf32>
    %393 = vector.shape_cast %390 : vector<32x4xf32> to vector<1x32x4xf32>
    tpu.vector_store %arg8[%c0_113, %c0_114, %c0_115], %393 {strides = array<i32>} : memref<1x32x4xf32, #tpu.memory_space<vmem>>, vector<1x32x4xf32>,
    return
  }
  func.func @transform_0(%arg0: i32) -> (i32, i32, i32) {
    %c0_i32 = arith.constant 0 : i32
    %c0_i32_0 = arith.constant 0 : i32
    %c0_i32_1 = arith.constant 0 : i32
    return %arg0, %c0_i32, %c0_i32_0 : i32, i32, i32
  }
  func.func @transform_1(%arg0: i32) -> (i32, i32, i32) {
    %c0_i32 = arith.constant 0 : i32
    %c0_i32_0 = arith.constant 0 : i32
    %c0_i32_1 = arith.constant 0 : i32
    return %arg0, %c0_i32, %c0_i32_0 : i32, i32, i32
  }
  func.func @transform_2(%arg0: i32) -> (i32, i32, i32) {
    %c0_i32 = arith.constant 0 : i32
    %c0_i32_0 = arith.constant 0 : i32
    %c0_i32_1 = arith.constant 0 : i32
    return %arg0, %c0_i32, %c0_i32_0 : i32, i32, i32
  }
  func.func @transform_3(%arg0: i32) -> (i32, i32, i32) {
    %c0_i32 = arith.constant 0 : i32
    %c0_i32_0 = arith.constant 0 : i32
    %c0_i32_1 = arith.constant 0 : i32
    return %arg0, %c0_i32, %c0_i32_0 : i32, i32, i32
  }
  func.func @transform_4(%arg0: i32) -> (i32, i32) {
    %c0_i32 = arith.constant 0 : i32
    %c0_i32_0 = arith.constant 0 : i32
    %c0_i32_1 = arith.constant 0 : i32
    return %c0_i32, %c0_i32_0 : i32, i32
  }
  func.func @transform_5(%arg0: i32) -> (i32, i32) {
    %c0_i32 = arith.constant 0 : i32
    %c0_i32_0 = arith.constant 0 : i32
    %c0_i32_1 = arith.constant 0 : i32
    return %c0_i32, %c0_i32_0 : i32, i32
  }
  func.func @transform_6(%arg0: i32) -> (i32, i32) {
    %c0_i32 = arith.constant 0 : i32
    %c0_i32_0 = arith.constant 0 : i32
    %c0_i32_1 = arith.constant 0 : i32
    return %c0_i32, %c0_i32_0 : i32, i32
  }
  func.func @transform_7(%arg0: i32) -> (i32, i32, i32) {
    %c0_i32 = arith.constant 0 : i32
    %c0_i32_0 = arith.constant 0 : i32
    %c0_i32_1 = arith.constant 0 : i32
    return %arg0, %c0_i32, %c0_i32_0 : i32, i32, i32
  }
}

</mosaic_0001>

<bundles_post_ra>
// kernel: tpu_custom_call.1
= control target key start
LH: loop header
LB: loop body
LE: loop exit
PB: predicated region body
PF: predicated region fallthrough
CT: control target
= control target key end

     0   :  { %12 = vsyncpa [#allocation3], 0  ;;  %s3888_s0 = inlined_call_operand.vmem [shape: bf16[2,16,4], index: 0, kind: input, shape index: {}]   ;;  %s3889_s1 = inlined_call_operand.vmem [shape: bf16[2,10,12], index: 1, kind: input, shape index: {}]   ;;  %s3890_s2 = inlined_call_operand.hbm [shape: bf16[2,8,32], index: 2, kind: input, shape index: {}]   ;;  %s3891_s3 = inlined_call_operand.vmem [shape: s32[2,1,2], index: 3, kind: input, shape index: {}]   ;;  %s3892_s4 = inlined_call_operand.vmem [shape: f32[32,32], index: 4, kind: input, shape index: {}]   ;;  %s3893_s5 = inlined_call_operand.hbm [shape: bf16[192,128], index: 5, kind: input, shape index: {}]   ;;  %s3894_s6 = inlined_call_operand.hbm [shape: f32[16,128], index: 6, kind: input, shape index: {}]   ;;  %s3895_s7 = inlined_call_operand.vmem [shape: f32[1,32,4], index: 7, kind: output, shape index: {}]  }
   0x1   :  { %13 = vsyncpa [#allocation5], 0  ;;  %s39_s26 = sshll.u32 %s3893_s5, 4  ;;  %s2994_s27 = smov [#allocation4]   ;;  %s40_s26 = int_to_ptr.hbm [resolvable:$true] %s39_s26 }
   0x2   :  { %s41_s28 = sshll.u32 %s2994_s27, 4  ;;  %s22_s8 = sshll.u32 %s3890_s2, 4  ;;  %s42_s28 = int_to_ptr.vmem [resolvable:$true] %s41_s28  ;;  %s23_s8 = int_to_ptr.hbm [resolvable:$true] %s22_s8 }
   0x3   :  { %s2995_s9 = smov 64   ;;  %s2996_s10 = smov 4  }
   0x4   :  { %47 = dma.hbm_to_vmem [thread:$0]  %s40_s26, 1536, %s42_s28, [#allocation5], %s2995_s9, %s2995_s9, %s2996_s10  }
   0x5   :  { %s2997_s11 = smov [#allocation2]   ;;  %s52_s15 = sshll.u32 %s3894_s6, 4  ;;  %s53_s15 = int_to_ptr.hbm [resolvable:$true] %s52_s15 }
   0x6   :  { %s24_s12 = sshll.u32 %s2997_s11, 4  ;;  %s2998_s5 = smov [#allocation6]   ;;  %s25_s12 = int_to_ptr.vmem [resolvable:$true] %s24_s12 }
   0x7   :  { %30 = dma.hbm_to_vmem [thread:$0]  %s23_s8, 128, %s25_s12, [#allocation3], %s2995_s9, %s2995_s9, %s2996_s10  }
   0x8   :  { %s54_s16 = sshll.u32 %s2998_s5, 4  ;;  %s2999_s17 = smov 128   ;;  %s55_s16 = int_to_ptr.vmem [resolvable:$true] %s54_s16 }
   0x9   :  { %s3000_s18 = smov 8  }
   0xa   :  { %60 = dma.hbm_to_vmem [thread:$0]  %s53_s15, 256, %s55_s16, [#allocation5], %s2999_s17, %s2999_s17, %s3000_s18  }
   0xb   :  { %2990 = dma.done.wait [#allocation3], 128  }
   0xc   :  { %2991 = vsyncadd [#allocation3], 4294967168 }
   0xd   :  { %2992 = dma.done.wait [#allocation5], 1792  }
   0xe   :  { %2993 = vsyncadd [#allocation5], 4294965504  ;;  %vm227_vm0 = vcmask 1041408   ;;  %vm220_vm1 = vcmask 31744   ;;  %vm290_vm2 = vcmask 1045504   ;;  %vm134_vm3 = vcmask 1040384  }
   0xf   :  { %v74_v0 = vld [vmem:[#allocation4] sm:$0x3]  ;;  %v2633_v1 = vld [vmem:[#allocation4 + $0x4] sm:$0xf]  ;;  %vm138_vm4 = vcmask 1041409   ;;  %vm142_vm5 = vcmask 1042434  }
  0x10   :  { %v229_v2 = vsel %vm227_vm0, %v74_v0, 0  ;;  %v2732_v3 = vld [vmem:[%s3888_s0 + $0x8] sm:$0xff]  ;;  %v2724_v4 = vld [vmem:[#allocation4 + $0x4] sm:$0x30]  ;;  %v114_v5 = vld [vmem:[%s3889_s1] sm:$0xf] }
  0x11   :  { %2734 = vmatpush.bf16.msra.mxu1 %v229_v2  ;;  %v2634_v6 = vor.u32 %v2724_v4, %v2633_v1  ;;  %v115_v7 = vld [vmem:[%s3889_s1 + $0x4] sm:$0x1]  ;;  %v116_v8 = vld [vmem:[%s3889_s1 + $0x8] sm:$0xf]  ;;  %v130_v9 = vrot.slane %v114_v5, 3  ;;  %vm146_vm6 = vcmask 1043459   ;;  %238 = vmatpush.bf16.msra.mxu0 %v229_v2 }
  0x12   :  { %v131_v10 = vrot.slane %v115_v7, 3  ;;  %v132_v11 = vrot.slane %v116_v8, 3  ;;  %v117_v26 = vld [vmem:[%s3889_s1 + $0xc] sm:$0x1]  ;;  %vm285_vm7 = vcmask 97280   ;;  %s3001_s27 = smov 96  }
  0x13   :  { %v292_v12 = vsel %vm290_vm2, %v2634_v6, 0  ;;  %v137_v13 = vsel %vm134_vm3, %v114_v5, %v130_v9  ;;  %v139_v14 = vsel %vm138_vm4, %v114_v5, %v130_v9  ;;  %v143_v15 = vsel %vm142_vm5, %v114_v5, %v130_v9  ;;  %v2726_v33 = vld [vmem:[#allocation4 + $0x18] sm:$0xff]  ;;  %v2725_v34 = vld [vmem:[#allocation4 + $0x10] sm:$0xff]  ;;  %v77_v35 = vld [vmem:[#allocation4 + $0xc] sm:$0xf]  ;;  %s3003_s14 = smov 120  }
  0x14   :  { %2630 = vmatmul.msk.bf16.vlgmr.msra.gmra.mxu1 %vm220_vm1, %v2732_v3  ;;  %v141_v16 = vrot.slane %v139_v14, 1  ;;  %v145_v17 = vrot.slane %v143_v15, 2  ;;  %v147_v18 = vsel %vm146_vm6, %v114_v5, %v130_v9  ;;  %v152_v19 = vsel %vm134_vm3, %v115_v7, %v131_v10  ;;  %255 = vst [vmem:[#allocation1] ss:$9 sm:$0xff] %v137_v13  ;;  %2735 = vmatpush.bf16.msra.mxu3 %v2726_v33  ;;  %v2731_v37 = vld [vmem:[%s3888_s0] sm:$0xff]  ;;  %v124_v41 = vld [vmem:[%s3892_s4 + $0x10] sm:$0xff] }
  0x15   :  { %301 = vmatpush.bf16.msrb.mxu1 %v292_v12  ;;  %v149_v20 = vrot.slane %v147_v18, 3  ;;  %v156_v21 = vsel %vm138_vm4, %v116_v8, %v132_v11  ;;  %v159_v22 = vsel %vm142_vm5, %v116_v8, %v132_v11  ;;  %266 = vst [vmem:[#allocation1 + $0x4] ss:$9 sm:$0xff] %v152_v19  ;;  %v155_v23 = vsel %vm134_vm3, %v116_v8, %v132_v11  ;;  %v2758_v39 = vld [vmem:[#allocation6] ss:$0 sm:$0xff]  ;;  %v125_v42 = vld [vmem:[%s3892_s4 + $0x18] sm:$0xff] }
  0x16   :  { %v158_v24 = vrot.slane %v156_v21, 1  ;;  %258 = vst [vmem:[#allocation1 + $0x1] ss:$9 sm:$0xff] %v141_v16  ;;  %v161_v25 = vrot.slane %v159_v22, 2  ;;  %v162_v27 = vsel %vm146_vm6, %v116_v8, %v132_v11  ;;  %v133_v28 = vrot.slane %v117_v26, 3  ;;  %389 = vrot.lane.b32.xlu0 %v2726_v33, %s3001_s27  ;;  %2629 = vmatmul.msk.bf16.vlgmr.msra.gmra.mxu0 %vm220_vm1, %v2731_v37  ;;  %v122_v61 = vld [vmem:[%s3892_s4] sm:$0xff] }
  0x17   :  { %261 = vst [vmem:[#allocation1 + $0x2] ss:$9 sm:$0xff] %v145_v17  ;;  %v164_v29 = vrot.slane %v162_v27, 3  ;;  %vm322_vm8 = vcmask 1043456   ;;  %vm359_vm9 = vcmask 261120   ;;  %vm315_vm10 = vcmask 64512  }
  0x18   :  { %264 = vst [vmem:[#allocation1 + $0x3] ss:$9 sm:$0xff] %v149_v20  ;;  %v167_v30 = vsel %vm134_vm3, %v117_v26, %v133_v28  ;;  %2736 = vmatpush.bf16.msra.mxu3 %v2725_v34  ;;  %v324_v36 = vsel %vm322_vm8, %v77_v35, 0  ;;  %v3106_v48 = vld [vmem:[#allocation6 + $0x3] ss:$0 sm:$0xff]  ;;  %v123_v0 = vld [vmem:[%s3892_s4 + $0x8] sm:$0xff] }
  0x19   :  { %268 = vst [vmem:[#allocation1 + $0x5] ss:$9 sm:$0xff] %v155_v23  ;;  %333 = vmatpush.bf16.msra.mxu2 %v324_v36  ;;  %394 = vrot.lane.b32.xlu1 %v3106_v48, %s3001_s27  ;;  %v2759_v50 = vld [vmem:[#allocation6 + $0x1] ss:$0 sm:$0xff]  ;;  %v2761_v7 = vld [vmem:[#allocation6 + $0x2] ss:$0 sm:$0xff] }
  0x1a   :  { %271 = vst [vmem:[#allocation1 + $0x6] ss:$9 sm:$0xff] %v158_v24  ;;  %vm555_vm14 = vcmask 80896   ;;  %vm619_vm2 = vcmask 1044480   ;;  %s3004_s16 = smov 112   ;;  %s3005_s17 = smov 88  }
  0x1b   :  { %274 = vst [vmem:[#allocation1 + $0x7] ss:$9 sm:$0xff] %v161_v25  ;;  %s3006_s18 = smov 104   ;;  %s3007_s2 = smov 80  }
  0x1c   :  { %s3008_s6 = smov 72  }
  0x1d   :  { %372 = vmatpush.bf16.msrb.mxu2 %v2726_v33 }
  0x1e   :  { %387 = vrot.lane.b32.xlu0 %v2725_v34, %s3001_s27 }
  0x21   :  { %373 = vmatpush.bf16.msrb.mxu2 %v2725_v34 }
  0x22   :  { %v275_v31 = vld [vmem:[#allocation1] sm:$0xff] }
  0x23   :  { %277 = vst [vmem:[#allocation1] ss:$9 sm:$0xff] %v164_v29 }
  0x24   :  { %2635 = vmatmul.msk.bf16.vlgmr.msrb.gmra.mxu1 %vm285_vm7, %v275_v31  ;;  %278 = vst [vmem:[#allocation1 + $0x1] ss:$9 sm:$0xff] %v167_v30 }
  0x2b   :  { %v279_v32 = vld [vmem:[#allocation1] sm:$0xff] }
  0x34   :  { %2636 = vmatmul.msk.bf16.gmra.mxu1 %vm285_vm7, %v279_v32 }
  0x88   :  { %v390_v2 = vpop.permute.xlu0 %389 }
  0x89   :  { %409 = vmatpush.bf16.msrb.mxu0 %v390_v2  ;;  %v120_v2 = vld [vmem:[%s3891_s3] sm:$0x1] }
  0x8b   :  { %v395_v16 = vpop.permute.xlu1 %394 }
  0x90   :  { %v388_v5 = vpop.permute.xlu0 %387 }
  0x91   :  { %v245_v38 = vpop.f32.mrf.mxu1  ;;  %410 = vmatpush.bf16.msrb.mxu0 %v388_v5 }
  0x92   :  { %v246_v40 = vadd.f32 %v2758_v39, %v245_v38 }
  0x93   :  { %v240_v59 = vpop.f32.mrf.mxu0 }
  0x94   :  { %v3100_v45 = vadd.f32 %v246_v40, %v124_v41  ;;  %v241_v60 = vadd.f32 %v2758_v39, %v240_v59 }
  0x96   :  { %v3116_v63 = vadd.f32 %v241_v60, %v122_v61 }
  0x99   :  { %v247_v43 = vpop.f32.mrf.mxu1 }
  0x9a   :  { %v248_v44 = vadd.f32 %v2758_v39, %v247_v43 }
  0x9b   :  { %v242_v62 = vpop.f32.mrf.mxu0 }
  0x9c   :  { %v3102_v46 = vadd.f32 %v248_v44, %v125_v42  ;;  %v243_v1 = vadd.f32 %v2758_v39, %v242_v62 }
  0x9e   :  { %v345_v47 = vpack.c.bf16 %v3102_v46, %v3100_v45  ;;  %v3121_v3 = vadd.f32 %v243_v1, %v123_v0 }
  0xa0   :  { %2648 = vmatmul.msk.bf16.vlgmr.msra.gmra.mxu3 %vm359_vm9, %v345_v47  ;;  %v344_v4 = vpack.c.bf16 %v3121_v3, %v3116_v63 }
  0xa1   :  { %v303_v49 = vpop.f32.mrf.mxu1 }
  0xa2   :  { %v304_v52 = vadd.f32 %v2759_v50, %v303_v49 }
  0xa9   :  { %v305_v51 = vpop.f32.mrf.mxu1 }
  0xaa   :  { %v306_v53 = vadd.f32 %v2759_v50, %v305_v51 }
  0xac   :  { %v312_v54 = vpack.c.bf16 %v306_v53, %v304_v52 }
  0xae   :  { %2637 = vmatmul.msk.bf16.vlgmr.msra.gmra.mxu2 %vm315_vm10, %v312_v54 }
  0xb1   :  { %v308_v55 = vpop.f32.mrf.mxu1 }
  0xb2   :  { %v309_v56 = vadd.f32 %v2759_v50, %v308_v55 }
  0xb4   :  { %v313_v58 = vpack.c.bf16 %v309_v56, %v309_v56 }
  0xb9   :  { %v310_v57 = vpop.f32.mrf.mxu1 }
  0xbe   :  { %2638 = vmatmul.msk.bf16.gmra.mxu2 %vm315_vm10, %v313_v58 }
  0xce   :  { %2647 = vmatmul.msk.bf16.vlgmr.msrb.gmra.mxu2 %vm359_vm9, %v344_v4 }
 0x123   :  { %v380_v29 = vpop.f32.mrf.mxu3 }
 0x124   :  { %v381_v57 = vadd.f32 %v3106_v48, %v380_v29 }
 0x126   :  { %v423_v0 = vpack.c.bf16 %v381_v57, %v381_v57  ;;  %v168_v57 = vlaneseq }
 0x12b   :  { %v382_v49 = vpop.f32.mrf.mxu3 }
 0x12c   :  { %v383_v55 = vadd.f32 %v3106_v48, %v382_v49 }
 0x12e   :  { %v424_v61 = vpack.c.bf16 %v383_v55, %v383_v55 }
 0x130   :  { %v520_v4 = vunpack.c.l.b16 %v424_v61  ;;  %v3283_v61 = vand.u32 127, %v168_v57 }
 0x131   :  { %v335_v6 = vpop.f32.mrf.mxu2 }
 0x132   :  { %v336_v9 = vadd.f32 %v2761_v7, %v335_v6 }
 0x139   :  { %v337_v8 = vpop.f32.mrf.mxu2 }
 0x13a   :  { %v338_v10 = vadd.f32 %v2761_v7, %v337_v8 }
 0x13c   :  { %v385_v11 = vpack.c.bf16 %v338_v10, %v336_v9 }
 0x13e   :  { %2649 = vmatmul.msk.bf16.vlgmr.msrb.gmra.mxu0 %vm359_vm9, %v385_v11  ;;  %v3002_v11 = vmov 0  }
 0x13f   :  { %2754 = vset.pattern.permute.xlu1 %v3002_v11  ;;  %2755 = vset.pattern.permute.xlu2 %v3002_v11 }
 0x141   :  { %v340_v12 = vpop.f32.mrf.mxu2 }
 0x142   :  { %v341_v13 = vadd.f32 %v2761_v7, %v340_v12  ;;  %v519_v7 = vunpack.c.l.b16 %v423_v0 }
 0x144   :  { %v386_v15 = vpack.c.bf16 %v341_v13, %v341_v13  ;;  %v3190_v10 = vpack.c.b16 %v520_v4, %v519_v7 }
 0x149   :  { %v342_v14 = vpop.f32.mrf.mxu2 }
 0x14e   :  { %2650 = vmatmul.msk.bf16.gmra.mxu0 %vm359_vm9, %v386_v15 }
 0x151   :  { %v375_v22 = vpop.f32.mrf.mxu2 }
 0x152   :  { %v376_v35 = vadd.f32 %v3106_v48, %v375_v22 }
 0x154   :  { %v421_v41 = vpack.c.bf16 %v376_v35, %v376_v35 }
 0x156   :  { %v489_v51 = vunpack.c.l.b16 %v421_v41 }
 0x159   :  { %v377_v30 = vpop.f32.mrf.mxu2 }
 0x15a   :  { %v378_v36 = vadd.f32 %v3106_v48, %v377_v30  ;;  %v180_v48 = vadd.s32 6, %v120_v2 }
 0x15c   :  { %v422_v42 = vpack.c.bf16 %v378_v36, %v378_v36  ;;  %v2618_v6 = vadd.s32 4294967293, %v180_v48  ;;  %v3287_v48 = vmul.u32 2, %v3283_v61 }
 0x15e   :  { %v490_v52 = vunpack.c.l.b16 %v422_v42  ;;  %v185_v9 = vperm.slane %v2618_v6, 0 }
 0x160   :  { %v3174_v58 = vpack.c.b16 %v490_v52, %v489_v51  ;;  %188 = vperm.xlu1 %2754, %v185_v9  }
 0x1bb   :  { %v412_v17 = vpop.f32.mrf.mxu0 }
 0x1bc   :  { %v3128_v18 = vadd.f32 %v412_v17, %v395_v16 }
 0x1be   :  { %v3131_v19 = vrot.slane %v3128_v18, 2  ;;  %v3134_v20 = vrot.slane %v3128_v18, 4  ;;  %v3137_v21 = vrot.slane %v3128_v18, 6  ;;  %435 = vst [vmem:[#allocation1] ss:$4 sm:$0xff] %v3128_v18 }
 0x1c0   :  { %437 = vst [vmem:[#allocation1 + $0x1] ss:$4 sm:$0xff] %v3131_v19 }
 0x1c1   :  { %439 = vst [vmem:[#allocation1 + $0x2] ss:$4 sm:$0xff] %v3134_v20 }
 0x1c2   :  { %441 = vst [vmem:[#allocation1 + $0x3] ss:$4 sm:$0xff] %v3137_v21 }
 0x1c3   :  { %v414_v23 = vpop.f32.mrf.mxu0 }
 0x1c4   :  { %v3143_v24 = vadd.f32 %v414_v23, %v395_v16 }
 0x1c6   :  { %v3146_v25 = vrot.slane %v3143_v24, 2  ;;  %443 = vst [vmem:[#allocation1 + $0x20] ss:$4 sm:$0xff] %v3143_v24  ;;  %v3150_v26 = vrot.slane %v3143_v24, 4  ;;  %v3153_v27 = vrot.slane %v3143_v24, 6 }
 0x1c9   :  { %v444_v28 = vld.sshfl [vmem:[#allocation1] sm:$0xff pattern:$0x73625140] }
 0x1ca   :  { %446 = vst [vmem:[#allocation1] ss:$4 sm:$0xff] %v3146_v25  ;;  %v457_v33 = vpack.c.bf16 %v444_v28, %v444_v28 }
 0x1cb   :  { %447 = vst [vmem:[#allocation1 + $0x1] ss:$4 sm:$0xff] %v3150_v26  ;;  %v417_v31 = vpop.f32.mrf.mxu0 }
 0x1cc   :  { %448 = vst [vmem:[#allocation1 + $0x2] ss:$4 sm:$0xff] %v3153_v27  ;;  %v3158_v32 = vadd.f32 %v417_v31, %v395_v16  ;;  %v494_v39 = vunpack.c.l.b16 %v457_v33 }
 0x1cd   :  { %v445_v34 = vld.sshfl [vmem:[#allocation1 + $0x20] sm:$0xff pattern:$0x73625140] }
 0x1ce   :  { %v3163_v37 = vrot.slane %v3158_v32, 2  ;;  %449 = vst [vmem:[#allocation1 + $0x3] ss:$4 sm:$0xff] %v3158_v32  ;;  %v458_v38 = vpack.c.bf16 %v445_v34, %v445_v34 }
 0x1d0   :  { %v495_v40 = vunpack.c.l.b16 %v458_v38  ;;  %450 = vst [vmem:[#allocation1 + $0x20] ss:$4 sm:$0xff] %v3163_v37 }
 0x1d2   :  { %v496_v43 = vpack.c.b16 %v495_v40, %v494_v39 }
 0x1d3   :  { %v419_v44 = vpop.f32.mrf.mxu0 }
 0x1d4   :  { %v501_v47 = vsel %vm315_vm10, %v496_v43, 0 }
 0x1d5   :  { %v451_v50 = vld.sshfl [vmem:[#allocation1] sm:$0xff pattern:$0x73625140]  ;;  %510 = vmatpush.bf16.xpose.msra.mxu1 %v501_v47 }
 0x1d6   :  { %461 = vst [vmem:[#allocation1] ss:$4 sm:$0xff] %v3128_v18  ;;  %v459_v53 = vpack.c.bf16 %v451_v50, %v451_v50 }
 0x1d7   :  { %463 = vst [vmem:[#allocation1 + $0x1] ss:$4 sm:$0xff] %v3131_v19  ;;  %v452_v54 = vld.sshfl [vmem:[#allocation1 + $0x20] sm:$0xff pattern:$0x73625140] }
 0x1d8   :  { %465 = vst [vmem:[#allocation1 + $0x2] ss:$4 sm:$0xff] %v3134_v20  ;;  %v460_v56 = vpack.c.bf16 %v452_v54, %v452_v54  ;;  %v524_v59 = vunpack.c.l.b16 %v459_v53 }
 0x1d9   :  { %467 = vst [vmem:[#allocation1 + $0x3] ss:$4 sm:$0xff] %v3137_v21 }
 0x1da   :  { %v525_v60 = vunpack.c.l.b16 %v460_v56  ;;  %469 = vst [vmem:[#allocation1 + $0x20] ss:$4 sm:$0xff] %v3143_v24 }
 0x1dc   :  { %2651 = vmatmul.msk.bf16.vlgmr.msra.gmra.mxu1 %vm315_vm10, %v3174_v58  ;;  %v526_v62 = vpack.c.b16 %v525_v60, %v524_v59  ;;  %v169_v60 = vshrl.u32 %v168_v57, 7 }
 0x1de   :  { %v531_v1 = vsel %vm315_vm10, %v526_v62, 0  ;;  %v173_v62 = vadd.s32 6, %v169_v60  ;;  %v170_v11 = vadd.s32 8, %v169_v60 }
 0x1df   :  { %540 = vmatpush.bf16.xpose.msra.mxu2 %v531_v1 }
 0x1e0   :  { %v3183_v5 = vld.sshfl [vmem:[#allocation1] sm:$0xff pattern:$0x73625140]  ;;  %v3291_v6 = vadd.s32 4294967293, %v173_v62 }
 0x1e1   :  { %472 = vst [vmem:[#allocation1] ss:$4 sm:$0xff] %v3146_v25  ;;  %v3187_v8 = vld.sshfl [vmem:[#allocation1 + $0x20] sm:$0xff pattern:$0x73625140] }
 0x1e2   :  { %473 = vst [vmem:[#allocation1 + $0x1] ss:$4 sm:$0xff] %v3150_v26  ;;  %vm178_vm11 = vcmp.lt.s32.totalorder %v3291_v6, %v3287_v48 }
 0x1e3   :  { %474 = vst [vmem:[#allocation1 + $0x2] ss:$4 sm:$0xff] %v3153_v27 }
 0x1e4   :  { %475 = vst [vmem:[#allocation1 + $0x3] ss:$4 sm:$0xff] %v3158_v32 }
 0x1e5   :  { %476 = vst [vmem:[#allocation1 + $0x20] ss:$4 sm:$0xff] %v3163_v37 }
 0x1e6   :  { %2652 = vmatmul.msk.bf16.vlgmr.msra.gmra.mxu2 %vm315_vm10, %v3190_v10 }
 0x1eb   :  { %v3196_v12 = vld.sshfl [vmem:[#allocation1] sm:$0xff pattern:$0x73625140] }
 0x1ec   :  { %704 = vst [vmem:[#allocation1] ss:$4 sm:$0xff] %v3128_v18  ;;  %v3200_v13 = vld.sshfl [vmem:[#allocation1 + $0x20] sm:$0xff pattern:$0x73625140] }
 0x1ed   :  { %706 = vst [vmem:[#allocation1 + $0x1] ss:$4 sm:$0xff] %v3131_v19 }
 0x1ee   :  { %708 = vst [vmem:[#allocation1 + $0x2] ss:$4 sm:$0xff] %v3134_v20 }
 0x1ef   :  { %710 = vst [vmem:[#allocation1 + $0x3] ss:$4 sm:$0xff] %v3137_v21 }
 0x1f0   :  { %712 = vst [vmem:[#allocation1 + $0x20] ss:$4 sm:$0xff] %v3143_v24 }
 0x1f6   :  { %v3205_v14 = vld.sshfl [vmem:[#allocation1] sm:$0xff pattern:$0x73625140] }
 0x1f7   :  { %715 = vst [vmem:[#allocation1] ss:$4 sm:$0xff] %v3146_v25  ;;  %v3209_v15 = vld.sshfl [vmem:[#allocation1 + $0x20] sm:$0xff pattern:$0x73625140] }
 0x1f8   :  { %716 = vst [vmem:[#allocation1 + $0x1] ss:$4 sm:$0xff] %v3150_v26 }
 0x1f9   :  { %717 = vst [vmem:[#allocation1 + $0x2] ss:$4 sm:$0xff] %v3153_v27 }
 0x1fa   :  { %718 = vst [vmem:[#allocation1 + $0x3] ss:$4 sm:$0xff] %v3158_v32 }
 0x1fb   :  { %719 = vst [vmem:[#allocation1 + $0x20] ss:$4 sm:$0xff] %v3163_v37 }
 0x201   :  { %v3214_v16 = vld.sshfl [vmem:[#allocation1] sm:$0xff pattern:$0x73625140] }
 0x202   :  { %730 = vst [vmem:[#allocation1] ss:$4 sm:$0xff] %v3128_v18  ;;  %v3218_v17 = vld.sshfl [vmem:[#allocation1 + $0x20] sm:$0xff pattern:$0x73625140] }
 0x203   :  { %732 = vst [vmem:[#allocation1 + $0x1] ss:$4 sm:$0xff] %v3131_v19 }
 0x204   :  { %734 = vst [vmem:[#allocation1 + $0x2] ss:$4 sm:$0xff] %v3134_v20 }
 0x205   :  { %736 = vst [vmem:[#allocation1 + $0x3] ss:$4 sm:$0xff] %v3137_v21 }
 0x206   :  { %738 = vst [vmem:[#allocation1 + $0x20] ss:$4 sm:$0xff] %v3143_v24 }
 0x20c   :  { %v3223_v22 = vld.sshfl [vmem:[#allocation1] sm:$0xff pattern:$0x73625140] }
 0x20d   :  { %741 = vst [vmem:[#allocation1] ss:$4 sm:$0xff] %v3146_v25  ;;  %v3227_v23 = vld.sshfl [vmem:[#allocation1 + $0x20] sm:$0xff pattern:$0x73625140] }
 0x20e   :  { %742 = vst [vmem:[#allocation1 + $0x1] ss:$4 sm:$0xff] %v3150_v26 }
 0x20f   :  { %743 = vst [vmem:[#allocation1 + $0x2] ss:$4 sm:$0xff] %v3153_v27 }
 0x210   :  { %744 = vst [vmem:[#allocation1 + $0x3] ss:$4 sm:$0xff] %v3158_v32 }
 0x211   :  { %745 = vst [vmem:[#allocation1 + $0x20] ss:$4 sm:$0xff] %v3163_v37 }
 0x217   :  { %v3232_v28 = vld.sshfl [vmem:[#allocation1] sm:$0xff pattern:$0x73625140] }
 0x218   :  { %968 = vst [vmem:[#allocation1] ss:$4 sm:$0xff] %v3128_v18  ;;  %v3236_v29 = vld.sshfl [vmem:[#allocation1 + $0x20] sm:$0xff pattern:$0x73625140] }
 0x219   :  { %970 = vst [vmem:[#allocation1 + $0x1] ss:$4 sm:$0xff] %v3131_v19 }
 0x21a   :  { %972 = vst [vmem:[#allocation1 + $0x2] ss:$4 sm:$0xff] %v3134_v20 }
 0x21b   :  { %974 = vst [vmem:[#allocation1 + $0x3] ss:$4 sm:$0xff] %v3137_v21 }
 0x21c   :  { %976 = vst [vmem:[#allocation1 + $0x20] ss:$4 sm:$0xff] %v3143_v24 }
 0x222   :  { %v3241_v30 = vld.sshfl [vmem:[#allocation1] sm:$0xff pattern:$0x73625140] }
 0x223   :  { %979 = vst [vmem:[#allocation1] ss:$4 sm:$0xff] %v3146_v25  ;;  %v3245_v31 = vld.sshfl [vmem:[#allocation1 + $0x20] sm:$0xff pattern:$0x73625140] }
 0x224   :  { %980 = vst [vmem:[#allocation1 + $0x1] ss:$4 sm:$0xff] %v3150_v26 }
 0x225   :  { %981 = vst [vmem:[#allocation1 + $0x2] ss:$4 sm:$0xff] %v3153_v27 }
 0x226   :  { %982 = vst [vmem:[#allocation1 + $0x3] ss:$4 sm:$0xff] %v3158_v32 }
 0x227   :  { %983 = vst [vmem:[#allocation1 + $0x20] ss:$4 sm:$0xff] %v3163_v37 }
 0x22d   :  { %v984_v33 = vld.sshfl [vmem:[#allocation1] sm:$0xff pattern:$0x73625140] }
 0x22e   :  { %994 = vst [vmem:[#allocation1] ss:$4 sm:$0xff] %v3128_v18  ;;  %v985_v34 = vld.sshfl [vmem:[#allocation1 + $0x20] sm:$0xff pattern:$0x73625140]  ;;  %v992_v35 = vpack.c.bf16 %v984_v33, %v984_v33  ;;  %v3300_v33 = vadd.s32 4294967294, %v3287_v48 }
 0x22f   :  { %996 = vst [vmem:[#allocation1 + $0x1] ss:$4 sm:$0xff] %v3131_v19  ;;  %v993_v36 = vpack.c.bf16 %v985_v34, %v985_v34 }
 0x230   :  { %998 = vst [vmem:[#allocation1 + $0x2] ss:$4 sm:$0xff] %v3134_v20  ;;  %v3254_v38 = vunpack.c.l.b16 %v992_v35  ;;  %v189_v35 = vpop.permute.xlu1 %188 }
 0x231   :  { %1000 = vst [vmem:[#allocation1 + $0x3] ss:$4 sm:$0xff] %v3137_v21  ;;  %v3256_v39 = vunpack.c.l.b16 %v993_v36  ;;  %v174_v36 = vadd.s32 6, %v170_v11  ;;  %vm193_vm12 = vcmp.le.s32.totalorder %v189_v35, %v3300_v33 }
 0x232   :  { %1002 = vst [vmem:[#allocation1 + $0x20] ss:$4 sm:$0xff] %v3143_v24  ;;  %vm3312_vm13 = vmor %vm178_vm11, %vm193_vm12 }
 0x233   :  { %v1055_v40 = vpack.c.b16 %v3256_v39, %v3254_v38 }
 0x238   :  { %v1003_v41 = vld.sshfl [vmem:[#allocation1] sm:$0xff pattern:$0x73625140] }
 0x239   :  { %1008 = vst [vmem:[#allocation1 + $0x3] ss:$4 sm:$0xff] %v3158_v32  ;;  %v1004_v42 = vld.sshfl [vmem:[#allocation1 + $0x20] sm:$0xff pattern:$0x73625140]  ;;  %v1016_v43 = vpack.c.bf16 %v1003_v41, %v1003_v41 }
 0x23a   :  { %1005 = vst [vmem:[#allocation1] ss:$4 sm:$0xff] %v3146_v25  ;;  %v1017_v44 = vpack.c.bf16 %v1004_v42, %v1004_v42 }
 0x23b   :  { %1006 = vst [vmem:[#allocation1 + $0x1] ss:$4 sm:$0xff] %v3150_v26  ;;  %v3265_v47 = vunpack.c.l.b16 %v1016_v43 }
 0x23c   :  { %1007 = vst [vmem:[#allocation1 + $0x2] ss:$4 sm:$0xff] %v3153_v27  ;;  %v3267_v49 = vunpack.c.l.b16 %v1017_v44 }
 0x23d   :  { %1009 = vst [vmem:[#allocation1 + $0x20] ss:$4 sm:$0xff] %v3163_v37 }
 0x23e   :  { %v1143_v50 = vpack.c.b16 %v3267_v49, %v3265_v47 }
 0x243   :  { %v1010_v51 = vld.sshfl [vmem:[#allocation1] sm:$0xff pattern:$0x73625140] }
 0x244   :  { %v1011_v52 = vld.sshfl [vmem:[#allocation1 + $0x20] sm:$0xff pattern:$0x73625140]  ;;  %1232 = vst [vmem:[#allocation1] ss:$4 sm:$0xff] %v3128_v18  ;;  %v1018_v53 = vpack.c.bf16 %v1010_v51, %v1010_v51 }
 0x245   :  { %1234 = vst [vmem:[#allocation1 + $0x1] ss:$4 sm:$0xff] %v3131_v19  ;;  %v1019_v54 = vpack.c.bf16 %v1011_v52, %v1011_v52 }
 0x246   :  { %1236 = vst [vmem:[#allocation1 + $0x2] ss:$4 sm:$0xff] %v3134_v20  ;;  %v3276_v55 = vunpack.c.l.b16 %v1018_v53 }
 0x247   :  { %1238 = vst [vmem:[#allocation1 + $0x3] ss:$4 sm:$0xff] %v3137_v21  ;;  %v3278_v56 = vunpack.c.l.b16 %v1019_v54  ;;  %v3317_v54 = vadd.s32 4294967293, %v174_v36 }
 0x248   :  { %1240 = vst [vmem:[#allocation1 + $0x20] ss:$4 sm:$0xff] %v3143_v24 }
 0x249   :  { %v1175_v59 = vpack.c.b16 %v3278_v56, %v3276_v55  ;;  %vm179_vm15 = vcmp.lt.s32.totalorder %v3317_v54, %v3287_v48 }
 0x24a   :  { %vm3339_vm0 = vmor %vm179_vm15, %vm193_vm12 }
 0x24e   :  { %v1241_v0 = vld.sshfl [vmem:[#allocation1] sm:$0xff pattern:$0x73625140] }
 0x24f   :  { %v1242_v1 = vld.sshfl [vmem:[#allocation1 + $0x20] sm:$0xff pattern:$0x73625140]  ;;  %v1254_v2 = vpack.c.bf16 %v1241_v0, %v1241_v0  ;;  %1243 = vst [vmem:[#allocation1] ss:$4 sm:$0xff] %v3146_v25 }
 0x250   :  { %v1255_v4 = vpack.c.bf16 %v1242_v1, %v1242_v1  ;;  %1244 = vst [vmem:[#allocation1 + $0x1] ss:$4 sm:$0xff] %v3150_v26 }
 0x251   :  { %1245 = vst [vmem:[#allocation1 + $0x2] ss:$4 sm:$0xff] %v3153_v27  ;;  %v3293_v7 = vunpack.c.l.b16 %v1254_v2 }
 0x252   :  { %v3295_v9 = vunpack.c.l.b16 %v1255_v4  ;;  %1246 = vst [vmem:[#allocation1 + $0x3] ss:$4 sm:$0xff] %v3158_v32 }
 0x253   :  { %1247 = vst [vmem:[#allocation1 + $0x20] ss:$4 sm:$0xff] %v3163_v37 }
 0x254   :  { %v1290_v34 = vpack.c.b16 %v3295_v9, %v3293_v7 }
 0x259   :  { %v512_v42 = vpop.f32.mrf.mxu1  ;;  %v1248_v43 = vld.sshfl [vmem:[#allocation1] sm:$0xff pattern:$0x73625140] }
 0x25a   :  { %v547_v44 = vmul.f32 0.35355338, %v512_v42  ;;  %v1249_v51 = vld.sshfl [vmem:[#allocation1 + $0x20] sm:$0xff pattern:$0x73625140]  ;;  %v1256_v52 = vpack.c.bf16 %v1248_v43, %v1248_v43 }
 0x25b   :  { %v1257_v53 = vpack.c.bf16 %v1249_v51, %v1249_v51  ;;  %1258 = vst [vmem:[#allocation1] ss:$4 sm:$0xff] %v3128_v18 }
 0x25c   :  { %v551_v57 = vsel %vm3312_vm13, -1e+30, %v547_v44  ;;  %1260 = vst [vmem:[#allocation1 + $0x1] ss:$4 sm:$0xff] %v3131_v19  ;;  %v3323_v62 = vunpack.c.l.b16 %v1256_v52  ;;  %v484_v44 = vpack.c.bf16 %v3187_v8, %v3187_v8  ;;  %v727_v52 = vpack.c.bf16 %v3209_v15, %v3209_v15 }
 0x25d   :  { %v556_v60 = vsel %vm555_vm14, %v551_v57, -inf  ;;  %v3325_v0 = vunpack.c.l.b16 %v1257_v53  ;;  %1262 = vst [vmem:[#allocation1 + $0x2] ss:$4 sm:$0xff] %v3134_v20 }
 0x25e   :  { %557 = vmax.xlane.f32.xlu2 %v556_v60  ;;  %1264 = vst [vmem:[#allocation1 + $0x3] ss:$4 sm:$0xff] %v3137_v21 }
 0x25f   :  { %v1319_v18 = vpack.c.b16 %v3325_v0, %v3323_v62  ;;  %1266 = vst [vmem:[#allocation1 + $0x20] ss:$4 sm:$0xff] %v3143_v24 }
 0x261   :  { %v514_v19 = vpop.f32.mrf.mxu1 }
 0x262   :  { %v548_v1 = vmul.f32 0.35355338, %v514_v19 }
 0x264   :  { %v552_v21 = vsel %vm3339_vm0, -1e+30, %v548_v1 }
 0x265   :  { %v559_v2 = vsel %vm555_vm14, %v552_v21, -inf  ;;  %v1267_v24 = vld.sshfl [vmem:[#allocation1] sm:$0xff pattern:$0x73625140] }
 0x266   :  { %560 = vmax.xlane.f32.xlu2 %v559_v2  ;;  %v1268_v4 = vld.sshfl [vmem:[#allocation1 + $0x20] sm:$0xff pattern:$0x73625140]  ;;  %v1280_v11 = vpack.c.bf16 %v1267_v24, %v1267_v24  ;;  %1269 = vst [vmem:[#allocation1] ss:$4 sm:$0xff] %v3146_v25  ;;  %v483_v25 = vpack.c.bf16 %v3183_v5, %v3183_v5 }
 0x267   :  { %v1281_v36 = vpack.c.bf16 %v1268_v4, %v1268_v4  ;;  %1270 = vst [vmem:[#allocation1 + $0x1] ss:$4 sm:$0xff] %v3150_v26  ;;  %v612_v26 = vunpack.c.l.b16 %v484_v44  ;;  %v121_v5 = vld [vmem:[%s3891_s3 + $0x1] sm:$0x1] }
 0x268   :  { %1271 = vst [vmem:[#allocation1 + $0x2] ss:$4 sm:$0xff] %v3153_v27  ;;  %v3349_v35 = vunpack.c.l.b16 %v1280_v11  ;;  %v611_v51 = vunpack.c.l.b16 %v483_v25  ;;  %v181_v8 = vadd.s32 6, %v121_v5 }
 0x269   :  { %v3351_v42 = vunpack.c.l.b16 %v1281_v36  ;;  %1272 = vst [vmem:[#allocation1 + $0x3] ss:$4 sm:$0xff] %v3158_v32  ;;  %v726_v32 = vpack.c.bf16 %v3205_v14, %v3205_v14 }
 0x26a   :  { %1273 = vst [vmem:[#allocation1 + $0x20] ss:$4 sm:$0xff] %v3163_v37  ;;  %v613_v27 = vpack.c.b16 %v612_v26, %v611_v51  ;;  %v761_v37 = vunpack.c.l.b16 %v727_v52  ;;  %v2619_v15 = vadd.s32 4294967293, %v181_v8 }
 0x26b   :  { %v1407_v43 = vpack.c.b16 %v3351_v42, %v3349_v35  ;;  %v760_v53 = vunpack.c.l.b16 %v726_v32 }
 0x26c   :  { %v186_v19 = vperm.slane %v2619_v15, 0 }
 0x26d   :  { %v762_v60 = vpack.c.b16 %v761_v37, %v760_v53 }
 0x27e   :  { %614 = vrot.lane.b32.xlu2 %v613_v27, %s3001_s27 }
 0x286   :  { %763 = vrot.lane.b32.xlu2 %v762_v60, %s3003_s14 }
 0x28e   :  { %756 = vrot.lane.b32.xlu2 %v3174_v58, %s3003_s14 }
 0x296   :  { %191 = vperm.xlu2 %2755, %v186_v19  }
 0x2d1   :  { %v558_v1 = vpop.xlane.xlu2 %557 }
 0x2d2   :  { %v568_v2 = vsub.f32 %v551_v57, %v558_v1 }
 0x2d4   :  { %v572_v14 = vmul.f32 1.442695, %v568_v2 }
 0x2d6   :  { %2770 = vpow2.f32 %v572_v14 }
 0x2d9   :  { %v561_v24 = vpop.xlane.xlu2 %560 }
 0x2da   :  { %v569_v4 = vsub.f32 %v552_v21, %v561_v24  ;;  %v542_v21 = vpop.f32.mrf.mxu2 }
 0x2db   :  { %v549_v60 = vmul.f32 0.35355338, %v542_v21 }
 0x2dc   :  { %v2771_v11 = vpop.eup %2770  ;;  %v574_v36 = vmul.f32 1.442695, %v569_v4 }
 0x2dd   :  { %v580_v44 = vsel %vm555_vm14, %v2771_v11, 0.0 }
 0x2de   :  { %2772 = vpow2.f32 %v574_v36  ;;  %581 = vadd.xlane.f32.xlu0 %v580_v44 }
 0x2e1   :  { %v615_v25 = vpop.permute.xlu2 %614 }
 0x2e2   :  { %v621_v26 = vsel %vm619_vm2, %v615_v25, 0  ;;  %v544_v37 = vpop.f32.mrf.mxu2 }
 0x2e3   :  { %630 = vmatpush.bf16.msrb.mxu3 %v621_v26  ;;  %v550_v5 = vmul.f32 0.35355338, %v544_v37 }
 0x2e4   :  { %v2773_v51 = vpop.eup %2772 }
 0x2e5   :  { %v583_v27 = vsel %vm555_vm14, %v2773_v51, 0.0 }
 0x2e6   :  { %584 = vadd.xlane.f32.xlu1 %v583_v27 }
 0x2e9   :  { %v764_v57 = vpop.permute.xlu2 %763 }
 0x2ea   :  { %v769_v52 = vsel %vm315_vm10, %v764_v57, 0 }
 0x2eb   :  { %778 = vmatpush.bf16.xpose.msra.mxu3 %v769_v52 }
 0x2f1   :  { %v757_v32 = vpop.permute.xlu2 %756 }
 0x2f9   :  { %v192_v53 = vpop.permute.xlu2 %191 }
 0x2fa   :  { %vm194_vm3 = vcmp.le.s32.totalorder %v192_v53, %v3300_v33 }
 0x2fb   :  { %vm3380_vm4 = vmor %vm178_vm11, %vm194_vm3 }
 0x2fc   :  { %vm3387_vm5 = vmor %vm179_vm15, %vm194_vm3  ;;  %v553_v19 = vsel %vm3380_vm4, -1e+30, %v549_v60 }
 0x2fd   :  { %v554_v33 = vsel %vm3387_vm5, -1e+30, %v550_v5  ;;  %v562_v1 = vsel %vm555_vm14, %v553_v19, -inf }
 0x2fe   :  { %v565_v6 = vsel %vm555_vm14, %v554_v33, -inf  ;;  %563 = vmax.xlane.f32.xlu0 %v562_v1 }
 0x2ff   :  { %566 = vmax.xlane.f32.xlu1 %v565_v6  ;;  %v486_v6 = vpack.c.bf16 %v3200_v13, %v3200_v13 }
 0x351   :  { %v582_v2 = vpop.xlane.xlu0 %581 }
 0x352   :  { %2774 = vrcp.f32 %v582_v2 }
 0x358   :  { %v2775_v48 = vpop.eup %2774 }
 0x359   :  { %v585_v14 = vpop.xlane.xlu1 %584  ;;  %v596_v54 = vmul.f32 %v2775_v48, %v2771_v11  ;;  %v990_v48 = vpack.c.bf16 %v3241_v30, %v3241_v30 }
 0x35a   :  { %2776 = vrcp.f32 %v585_v14 }
 0x35b   :  { %v600_v4 = vpack.c.bf16 %v596_v54, %v596_v54 }
 0x35d   :  { %v606_v25 = vunpack.c.l.b16 %v600_v4 }
 0x360   :  { %v2777_v24 = vpop.eup %2776 }
 0x361   :  { %v597_v36 = vmul.f32 %v2777_v24, %v2773_v51  ;;  %v1024_v24 = vunpack.c.l.b16 %v990_v48 }
 0x363   :  { %v601_v44 = vpack.c.bf16 %v597_v36, %v597_v36 }
 0x365   :  { %v607_v26 = vunpack.c.l.b16 %v601_v44 }
 0x367   :  { %v608_v27 = vpack.c.b16 %v607_v26, %v606_v25 }
 0x369   :  { %2653 = vmatmul.msk.bf16.vlgmr.msrb.gmra.mxu3 %vm555_vm14, %v608_v27 }
 0x371   :  { %v564_v57 = vpop.xlane.xlu0 %563 }
 0x372   :  { %v567_v52 = vpop.xlane.xlu1 %566  ;;  %v570_v21 = vsub.f32 %v553_v19, %v564_v57  ;;  %v485_v19 = vpack.c.bf16 %v3196_v12, %v3196_v12  ;;  %v82_v12 = vld [vmem:[#allocation4 + $0x20] sm:$0xf] }
 0x373   :  { %v571_v37 = vsub.f32 %v554_v33, %v567_v52  ;;  %v645_v33 = vunpack.c.l.b16 %v486_v6  ;;  %v678_v4 = vsel %vm322_vm8, %v82_v12, 0 }
 0x374   :  { %v576_v53 = vmul.f32 1.442695, %v570_v21  ;;  %v644_v2 = vunpack.c.l.b16 %v485_v19  ;;  %687 = vmatpush.bf16.msrb.mxu2 %v678_v4 }
 0x375   :  { %v578_v60 = vmul.f32 1.442695, %v571_v37 }
 0x376   :  { %2778 = vpow2.f32 %v576_v53  ;;  %v646_v14 = vpack.c.b16 %v645_v33, %v644_v2 }
 0x377   :  { %2780 = vpow2.f32 %v578_v60 }
 0x379   :  { %2657 = vmatmul.msk.bf16.vlgmr.msra.gmra.mxu3 %vm315_vm10, %v757_v32  ;;  %v991_v32 = vpack.c.bf16 %v3245_v31, %v3245_v31 }
 0x37b   :  { %v1025_v54 = vunpack.c.l.b16 %v991_v32 }
 0x37c   :  { %v2779_v11 = vpop.eup %2778 }
 0x37d   :  { %v2781_v5 = vpop.eup %2780  ;;  %v586_v51 = vsel %vm555_vm14, %v2779_v11, 0.0  ;;  %v1026_v13 = vpack.c.b16 %v1025_v54, %v1024_v24  ;;  %v752_v24 = vpack.c.bf16 %v3223_v22, %v3223_v22 }
 0x37e   :  { %v589_v1 = vsel %vm555_vm14, %v2781_v5, 0.0  ;;  %587 = vadd.xlane.f32.xlu1 %v586_v51 }
 0x37f   :  { %590 = vadd.xlane.f32.xlu0 %v589_v1  ;;  %v877_v12 = vunpack.c.l.b16 %v752_v24 }
 0x397   :  { %647 = vrot.lane.b32.xlu1 %v646_v14, %s3001_s27 }
 0x39f   :  { %785 = vrot.lane.b32.xlu1 %v3190_v10, %s3003_s14 }
 0x3a7   :  { %1027 = vrot.lane.b32.xlu1 %v1026_v13, %s3004_s16 }
 0x3af   :  { %1020 = vrot.lane.b32.xlu1 %v3174_v58, %s3004_s16 }
 0x3ec   :  { %v632_v31 = vpop.f32.mrf.mxu3 }
 0x3f1   :  { %v588_v36 = vpop.xlane.xlu1 %587 }
 0x3f2   :  { %v591_v44 = vpop.xlane.xlu0 %590  ;;  %2782 = vrcp.f32 %v588_v36 }
 0x3f3   :  { %2784 = vrcp.f32 %v591_v44 }
 0x3f4   :  { %v634_v25 = vpop.f32.mrf.mxu3 }
 0x3f5   :  { %v669_v26 = vpack.c.bf16 %v634_v25, %v632_v31 }
 0x3f7   :  { %2655 = vmatmul.msk.bf16.vlgmr.msrb.gmra.mxu2 %vm315_vm10, %v669_v26 }
 0x3f8   :  { %v2783_v30 = vpop.eup %2782 }
 0x3f9   :  { %v2785_v57 = vpop.eup %2784  ;;  %v598_v37 = vmul.f32 %v2783_v30, %v2779_v11 }
 0x3fa   :  { %v599_v53 = vmul.f32 %v2785_v57, %v2781_v5  ;;  %v753_v5 = vpack.c.bf16 %v3227_v23, %v3227_v23 }
 0x3fb   :  { %v602_v51 = vpack.c.bf16 %v598_v37, %v598_v37 }
 0x3fc   :  { %v780_v27 = vpop.f32.mrf.mxu3  ;;  %v603_v1 = vpack.c.bf16 %v599_v53, %v599_v53  ;;  %v878_v13 = vunpack.c.l.b16 %v753_v5 }
 0x3fd   :  { %v814_v52 = vmul.f32 0.35355338, %v780_v27  ;;  %v639_v2 = vunpack.c.l.b16 %v602_v51 }
 0x3fe   :  { %v640_v14 = vunpack.c.l.b16 %v603_v1  ;;  %v879_v4 = vpack.c.b16 %v878_v13, %v877_v12 }
 0x3ff   :  { %v818_v21 = vsel %vm3312_vm13, -1e+30, %v814_v52 }
 0x400   :  { %v822_v60 = vsel %vm555_vm14, %v818_v21, -inf  ;;  %v641_v11 = vpack.c.b16 %v640_v14, %v639_v2 }
 0x401   :  { %823 = vmax.xlane.f32.xlu2 %v822_v60 }
 0x404   :  { %v782_v6 = vpop.f32.mrf.mxu3 }
 0x405   :  { %v815_v19 = vmul.f32 0.35355338, %v782_v6  ;;  %v729_v6 = vpack.c.bf16 %v3218_v17, %v3218_v17 }
 0x407   :  { %v819_v33 = vsel %vm3339_vm0, -1e+30, %v815_v19  ;;  %v790_v2 = vunpack.c.l.b16 %v729_v6 }
 0x408   :  { %v825_v32 = vsel %vm555_vm14, %v819_v33, -inf }
 0x409   :  { %826 = vmax.xlane.f32.xlu0 %v825_v32  ;;  %v648_v48 = vpop.permute.xlu1 %647 }
 0x40a   :  { %v653_v54 = vsel %vm619_vm2, %v648_v48, 0 }
 0x40b   :  { %662 = vmatpush.bf16.msrb.mxu1 %v653_v54 }
 0x40e   :  { %2654 = vmatmul.msk.bf16.vlgmr.msrb.gmra.mxu1 %vm555_vm14, %v641_v11 }
 0x411   :  { %v786_v31 = vpop.permute.xlu1 %785 }
 0x419   :  { %880 = vrot.lane.b32.xlu2 %v879_v4, %s3005_s17  ;;  %v1028_v26 = vpop.permute.xlu1 %1027 }
 0x41a   :  { %v1033_v52 = vsel %vm315_vm10, %v1028_v26, 0 }
 0x421   :  { %v1021_v26 = vpop.permute.xlu1 %1020 }
 0x474   :  { %v824_v36 = vpop.xlane.xlu2 %823 }
 0x475   :  { %v834_v44 = vsub.f32 %v818_v21, %v824_v36 }
 0x477   :  { %v838_v25 = vmul.f32 1.442695, %v834_v44 }
 0x479   :  { %2786 = vpow2.f32 %v838_v25 }
 0x47c   :  { %v827_v30 = vpop.xlane.xlu0 %826  ;;  %v881_v27 = vpop.permute.xlu2 %880 }
 0x47d   :  { %v835_v57 = vsub.f32 %v819_v33, %v827_v30  ;;  %v886_v23 = vsel %vm619_vm2, %v881_v27, 0  ;;  %v728_v33 = vpack.c.bf16 %v3214_v16, %v3214_v16  ;;  %v83_v30 = vld [vmem:[#allocation4 + $0x24] sm:$0xf] }
 0x47e   :  { %895 = vmatpush.bf16.msra.mxu1 %v886_v23  ;;  %v943_v27 = vsel %vm322_vm8, %v83_v30, 0 }
 0x47f   :  { %v2787_v22 = vpop.eup %2786  ;;  %v840_v37 = vmul.f32 1.442695, %v835_v57  ;;  %v789_v14 = vunpack.c.l.b16 %v728_v33 }
 0x480   :  { %v846_v53 = vsel %vm555_vm14, %v2787_v22, 0.0 }
 0x481   :  { %2788 = vpow2.f32 %v840_v37  ;;  %847 = vadd.xlane.f32.xlu0 %v846_v53  ;;  %v791_v32 = vpack.c.b16 %v790_v2, %v789_v14  ;;  %v755_v14 = vpack.c.bf16 %v3236_v29, %v3236_v29  ;;  %v3468_v29 = vld [vmem:[#allocation6 + $0x4] ss:$0 sm:$0xff] }
 0x482   :  { %1042 = vmatpush.bf16.xpose.msrb.mxu1 %v1033_v52 }
 0x487   :  { %v2789_v60 = vpop.eup %2788 }
 0x488   :  { %v849_v21 = vsel %vm555_vm14, %v2789_v60, 0.0 }
 0x489   :  { %850 = vadd.xlane.f32.xlu0 %v849_v21 }
 0x48b   :  { %v664_v51 = vpop.f32.mrf.mxu1 }
 0x493   :  { %v666_v1 = vpop.f32.mrf.mxu1 }
 0x494   :  { %v670_v19 = vpack.c.bf16 %v666_v1, %v664_v51 }
 0x496   :  { %2656 = vmatmul.msk.bf16.gmra.mxu2 %vm315_vm10, %v670_v19 }
 0x49d   :  { %792 = vrot.lane.b32.xlu0 %v791_v32, %s3003_s14  ;;  %v754_v32 = vpack.c.bf16 %v3232_v28, %v3232_v28  ;;  %v689_v28 = vpop.f32.mrf.mxu2 }
 0x4f4   :  { %v848_v48 = vpop.xlane.xlu0 %847 }
 0x4f5   :  { %2790 = vrcp.f32 %v848_v48  ;;  %v910_v48 = vunpack.c.l.b16 %v755_v14 }
 0x4fb   :  { %v2791_v11 = vpop.eup %2790 }
 0x4fc   :  { %v851_v54 = vpop.xlane.xlu0 %850  ;;  %v862_v5 = vmul.f32 %v2791_v11, %v2787_v22 }
 0x4fd   :  { %2792 = vrcp.f32 %v851_v54  ;;  %v909_v54 = vunpack.c.l.b16 %v754_v32 }
 0x4fe   :  { %v866_v13 = vpack.c.bf16 %v862_v5, %v862_v5 }
 0x4ff   :  { %v911_v11 = vpack.c.b16 %v910_v48, %v909_v54 }
 0x500   :  { %v872_v4 = vunpack.c.l.b16 %v866_v13  ;;  %v700_v13 = vadd.f32 %v3468_v29, %v689_v28 }
 0x503   :  { %v2793_v24 = vpop.eup %2792 }
 0x504   :  { %v863_v17 = vmul.f32 %v2793_v24, %v2789_v60 }
 0x506   :  { %v867_v12 = vpack.c.bf16 %v863_v17, %v863_v17 }
 0x508   :  { %v873_v36 = vunpack.c.l.b16 %v867_v12 }
 0x50a   :  { %v874_v16 = vpack.c.b16 %v873_v36, %v872_v4 }
 0x50c   :  { %2659 = vmatmul.msk.bf16.vlgmr.msra.gmra.mxu1 %vm555_vm14, %v874_v16 }
 0x50f   :  { %v793_v44 = vpop.permute.xlu0 %792 }
 0x510   :  { %v798_v25 = vsel %vm315_vm10, %v793_v44, 0 }
 0x511   :  { %807 = vmatpush.bf16.xpose.msra.mxu0 %v798_v25 }
 0x518   :  { %2658 = vmatmul.msk.bf16.vlgmr.msra.gmra.mxu0 %vm315_vm10, %v786_v31 }
 0x519   :  { %952 = vmatpush.bf16.msrb.mxu0 %v943_v27 }
 0x51c   :  { %2663 = vmatmul.msk.bf16.vlgmr.msrb.gmra.mxu1 %vm315_vm10, %v1021_v26 }
 0x589   :  { %v897_v57 = vpop.f32.mrf.mxu1 }
 0x591   :  { %v899_v23 = vpop.f32.mrf.mxu1 }
 0x592   :  { %v934_v52 = vpack.c.bf16 %v899_v23, %v897_v57 }
 0x594   :  { %2661 = vmatmul.msk.bf16.vlgmr.msrb.gmra.mxu0 %vm315_vm10, %v934_v52 }
 0x595   :  { %v809_v22 = vpop.f32.mrf.mxu0 }
 0x596   :  { %v816_v37 = vmul.f32 0.35355338, %v809_v22 }
 0x598   :  { %v820_v53 = vsel %vm3380_vm4, -1e+30, %v816_v37 }
 0x599   :  { %v1044_v60 = vpop.f32.mrf.mxu1  ;;  %v828_v31 = vsel %vm555_vm14, %v820_v53, -inf }
 0x59a   :  { %v1078_v21 = vmul.f32 0.35355338, %v1044_v60  ;;  %829 = vmax.xlane.f32.xlu0 %v828_v31 }
 0x59c   :  { %v1082_v51 = vsel %vm3312_vm13, -1e+30, %v1078_v21 }
 0x59d   :  { %v811_v1 = vpop.f32.mrf.mxu0  ;;  %v1086_v6 = vsel %vm555_vm14, %v1082_v51, -inf }
 0x59e   :  { %v817_v19 = vmul.f32 0.35355338, %v811_v1  ;;  %1087 = vmax.xlane.f32.xlu2 %v1086_v6 }
 0x5a0   :  { %v821_v33 = vsel %vm3387_vm5, -1e+30, %v817_v19 }
 0x5a1   :  { %v831_v2 = vsel %vm555_vm14, %v821_v33, -inf  ;;  %v1046_v57 = vpop.f32.mrf.mxu1 }
 0x5a2   :  { %832 = vmax.xlane.f32.xlu1 %v831_v2  ;;  %v1079_v37 = vmul.f32 0.35355338, %v1046_v57 }
 0x5b6   :  { %912 = vrot.lane.b32.xlu2 %v911_v11, %s3005_s17 }
 0x5be   :  { %1049 = vrot.lane.b32.xlu2 %v3190_v10, %s3004_s16 }
 0x5c6   :  { %1291 = vrot.lane.b32.xlu2 %v1290_v34, %s3006_s18 }
 0x5ce   :  { %1313 = vrot.lane.b32.xlu2 %v3190_v10, %s3006_s18 }
 0x60d   :  { %v830_v5 = vpop.xlane.xlu0 %829 }
 0x60e   :  { %v836_v24 = vsub.f32 %v820_v53, %v830_v5  ;;  %v1083_v53 = vsel %vm3339_vm0, -1e+30, %v1079_v37 }
 0x60f   :  { %v1089_v60 = vsel %vm555_vm14, %v1083_v53, -inf }
 0x610   :  { %v842_v17 = vmul.f32 1.442695, %v836_v24 }
 0x611   :  { %v1088_v12 = vpop.xlane.xlu2 %1087  ;;  %v954_v4 = vpop.f32.mrf.mxu0 }
 0x612   :  { %2794 = vpow2.f32 %v842_v17  ;;  %v1098_v36 = vsub.f32 %v1082_v51, %v1088_v12  ;;  %v3471_v16 = vadd.f32 %v954_v4, %v700_v13  ;;  %v3501_v4 = vpop.f32.mrf.mxu2 }
 0x614   :  { %v1102_v44 = vmul.f32 1.442695, %v1098_v36 }
 0x615   :  { %v833_v7 = vpop.xlane.xlu1 %832 }
 0x616   :  { %v837_v9 = vsub.f32 %v821_v33, %v833_v7  ;;  %2796 = vpow2.f32 %v1102_v44 }
 0x618   :  { %v2795_v34 = vpop.eup %2794  ;;  %v844_v10 = vmul.f32 1.442695, %v837_v9 }
 0x619   :  { %v913_v25 = vpop.permute.xlu2 %912  ;;  %v852_v26 = vsel %vm555_vm14, %v2795_v34, 0.0 }
 0x61a   :  { %2798 = vpow2.f32 %v844_v10  ;;  %v918_v30 = vsel %vm619_vm2, %v913_v25, 0  ;;  %853 = vadd.xlane.f32.xlu1 %v852_v26 }
 0x61b   :  { %927 = vmatpush.bf16.msrb.mxu3 %v918_v30 }
 0x61c   :  { %v2797_v27 = vpop.eup %2796 }
 0x61d   :  { %v1110_v22 = vsel %vm555_vm14, %v2797_v27, 0.0 }
 0x620   :  { %v2799_v23 = vpop.eup %2798 }
 0x621   :  { %v855_v52 = vsel %vm555_vm14, %v2799_v23, 0.0  ;;  %v1050_v14 = vpop.permute.xlu2 %1049 }
 0x622   :  { %856 = vadd.xlane.f32.xlu0 %v855_v52  ;;  %1111 = vadd.xlane.f32.xlu1 %v1110_v22 }
 0x629   :  { %v1292_v54 = vpop.permute.xlu2 %1291 }
 0x62a   :  { %1090 = vmax.xlane.f32.xlu0 %v1089_v60  ;;  %v1297_v5 = vsel %vm315_vm10, %v1292_v54, 0 }
 0x63b   :  { %1056 = vrot.lane.b32.xlu1 %v1055_v40, %s3004_s16 }
 0x63e   :  { %1144 = vrot.lane.b32.xlu0 %v1143_v50, %s3007_s2 }
 0x643   :  { %1320 = vrot.lane.b32.xlu1 %v1319_v18, %s3006_s18 }
 0x68d   :  { %v854_v31 = vpop.xlane.xlu1 %853 }
 0x68e   :  { %2800 = vrcp.f32 %v854_v31 }
 0x694   :  { %v2801_v51 = vpop.eup %2800 }
 0x695   :  { %v857_v21 = vpop.xlane.xlu0 %856  ;;  %v864_v1 = vmul.f32 %v2801_v51, %v2795_v34  ;;  %v1112_v62 = vpop.xlane.xlu1 %1111 }
 0x696   :  { %2802 = vrcp.f32 %v857_v21  ;;  %v694_v34 = vpop.f32.mrf.mxu2  ;;  %v1314_v21 = vpop.permute.xlu2 %1313 }
 0x697   :  { %v868_v38 = vpack.c.bf16 %v864_v1, %v864_v1 }
 0x699   :  { %v904_v47 = vunpack.c.l.b16 %v868_v38  ;;  %v84_v38 = vld [vmem:[#allocation4 + $0x28] sm:$0xf] }
 0x69c   :  { %v2803_v6 = vpop.eup %2802 }
 0x69d   :  { %v865_v39 = vmul.f32 %v2803_v6, %v2799_v23  ;;  %v1091_v40 = vpop.xlane.xlu0 %1090 }
 0x69e   :  { %v1099_v19 = vsub.f32 %v1083_v53, %v1091_v40  ;;  %v3516_v40 = vpop.f32.mrf.mxu0 }
 0x69f   :  { %v869_v33 = vpack.c.bf16 %v865_v39, %v865_v39  ;;  %v1207_v39 = vsel %vm322_vm8, %v84_v38, 0 }
 0x6a0   :  { %v1104_v2 = vmul.f32 1.442695, %v1099_v19  ;;  %v702_v19 = vadd.f32 %v3468_v29, %v694_v34 }
 0x6a1   :  { %v905_v49 = vunpack.c.l.b16 %v869_v33 }
 0x6a2   :  { %2804 = vpow2.f32 %v1104_v2 }
 0x6a3   :  { %v906_v50 = vpack.c.b16 %v905_v49, %v904_v47  ;;  %2806 = vrcp.f32 %v1112_v62 }
 0x6a5   :  { %2660 = vmatmul.msk.bf16.vlgmr.msrb.gmra.mxu3 %vm555_vm14, %v906_v50 }
 0x6a8   :  { %v2805_v0 = vpop.eup %2804 }
 0x6a9   :  { %v1113_v18 = vsel %vm555_vm14, %v2805_v0, 0.0  ;;  %v2807_v12 = vpop.eup %2806 }
 0x6aa   :  { %1114 = vadd.xlane.f32.xlu0 %v1113_v18  ;;  %v1126_v36 = vmul.f32 %v2807_v12, %v2797_v27 }
 0x6ac   :  { %v1130_v7 = vpack.c.bf16 %v1126_v36, %v1126_v36 }
 0x6ad   :  { %v1057_v32 = vpop.permute.xlu1 %1056 }
 0x6ae   :  { %v1062_v48 = vsel %vm315_vm10, %v1057_v32, 0  ;;  %v1136_v26 = vunpack.c.l.b16 %v1130_v7 }
 0x6af   :  { %1071 = vmatpush.bf16.xpose.msra.mxu2 %v1062_v48 }
 0x6b0   :  { %v1145_v11 = vpop.permute.xlu0 %1144 }
 0x6b1   :  { %v1150_v28 = vsel %vm619_vm2, %v1145_v11, 0 }
 0x6b2   :  { %1159 = vmatpush.bf16.msra.mxu3 %v1150_v28 }
 0x6b5   :  { %v1321_v24 = vpop.permute.xlu1 %1320 }
 0x6b6   :  { %1306 = vmatpush.bf16.xpose.msrb.mxu3 %v1297_v5  ;;  %v1326_v13 = vsel %vm315_vm10, %v1321_v24, 0  ;;  %2664 = vmatmul.msk.bf16.vlgmr.msra.gmra.mxu2 %vm315_vm10, %v1050_v14 }
 0x6b7   :  { %1335 = vmatpush.bf16.xpose.msra.mxu0 %v1326_v13  ;;  %1216 = vmatpush.bf16.msrb.mxu2 %v1207_v39 }
 0x6be   :  { %1284 = vrot.lane.b32.xlu0 %v3174_v58, %s3006_s18  ;;  %v3504_v58 = vpop.f32.mrf.mxu2 }
 0x71d   :  { %v1115_v17 = vpop.xlane.xlu0 %1114 }
 0x71e   :  { %2808 = vrcp.f32 %v1115_v17 }
 0x724   :  { %v2809_v44 = vpop.eup %2808 }
 0x725   :  { %v1127_v9 = vmul.f32 %v2809_v44, %v2805_v0 }
 0x727   :  { %v1131_v10 = vpack.c.bf16 %v1127_v9, %v1127_v9 }
 0x728   :  { %v929_v25 = vpop.f32.mrf.mxu3 }
 0x729   :  { %v1137_v30 = vunpack.c.l.b16 %v1131_v10 }
 0x72b   :  { %v1138_v57 = vpack.c.b16 %v1137_v30, %v1136_v26 }
 0x72d   :  { %2665 = vmatmul.msk.bf16.vlgmr.msra.gmra.mxu3 %vm555_vm14, %v1138_v57 }
 0x730   :  { %v931_v23 = vpop.f32.mrf.mxu3  ;;  %v1285_v27 = vpop.permute.xlu0 %1284 }
 0x731   :  { %v935_v52 = vpack.c.bf16 %v931_v23, %v929_v25 }
 0x733   :  { %2662 = vmatmul.msk.bf16.gmra.mxu0 %vm315_vm10, %v935_v52 }
 0x739   :  { %v1073_v22 = vpop.f32.mrf.mxu2 }
 0x73a   :  { %v1080_v37 = vmul.f32 0.35355338, %v1073_v22 }
 0x73c   :  { %v1084_v53 = vsel %vm3380_vm4, -1e+30, %v1080_v37 }
 0x73d   :  { %2669 = vmatmul.msk.bf16.vlgmr.msrb.gmra.mxu3 %vm315_vm10, %v1285_v27  ;;  %v1092_v60 = vsel %vm555_vm14, %v1084_v53, -inf }
 0x73e   :  { %1093 = vmax.xlane.f32.xlu0 %v1092_v60 }
 0x741   :  { %v1075_v31 = vpop.f32.mrf.mxu2 }
 0x742   :  { %v1081_v51 = vmul.f32 0.35355338, %v1075_v31 }
 0x743   :  { %2670 = vmatmul.msk.bf16.vlgmr.msra.gmra.mxu0 %vm315_vm10, %v1314_v21 }
 0x744   :  { %v1085_v1 = vsel %vm3387_vm5, -1e+30, %v1081_v51 }
 0x745   :  { %v1095_v6 = vsel %vm555_vm14, %v1085_v1, -inf }
 0x746   :  { %1096 = vmax.xlane.f32.xlu1 %v1095_v6 }
 0x7b0   :  { %v959_v33 = vpop.f32.mrf.mxu0  ;;  %v1161_v2 = vpop.f32.mrf.mxu3 }
 0x7b1   :  { %v3519_v47 = vadd.f32 %v959_v33, %v702_v19  ;;  %v1094_v49 = vpop.xlane.xlu0 %1093 }
 0x7b2   :  { %v1100_v50 = vsub.f32 %v1084_v53, %v1094_v49 }
 0x7b4   :  { %v1106_v14 = vmul.f32 1.442695, %v1100_v50 }
 0x7b6   :  { %2810 = vpow2.f32 %v1106_v14 }
 0x7b8   :  { %v1163_v62 = vpop.f32.mrf.mxu3  ;;  %v3534_v41 = vpop.f32.mrf.mxu0 }
 0x7b9   :  { %v1198_v0 = vpack.c.bf16 %v1163_v62, %v1161_v2  ;;  %v1097_v18 = vpop.xlane.xlu1 %1096  ;;  %v1275_v62 = vld.sshfl [vmem:[#allocation1 + $0x20] sm:$0xff pattern:$0x73625140] }
 0x7ba   :  { %v1101_v32 = vsub.f32 %v1085_v1, %v1097_v18  ;;  %v1283_v18 = vpack.c.bf16 %v1275_v62, %v1275_v62 }
 0x7bb   :  { %2667 = vmatmul.msk.bf16.vlgmr.msrb.gmra.mxu2 %vm315_vm10, %v1198_v0  ;;  %v1274_v0 = vld.sshfl [vmem:[#allocation1] sm:$0xff pattern:$0x73625140] }
 0x7bc   :  { %v2811_v48 = vpop.eup %2810  ;;  %v1108_v11 = vmul.f32 1.442695, %v1101_v32  ;;  %v1282_v8 = vpack.c.bf16 %v1274_v0, %v1274_v0  ;;  %v1438_v32 = vunpack.c.l.b16 %v1283_v18 }
 0x7bd   :  { %v1116_v54 = vsel %vm555_vm14, %v2811_v48, 0.0 }
 0x7be   :  { %1117 = vadd.xlane.f32.xlu1 %v1116_v54  ;;  %2812 = vpow2.f32 %v1108_v11 }
 0x7c0   :  { %v1308_v28 = vpop.f32.mrf.mxu3  ;;  %v1337_v34 = vpop.f32.mrf.mxu0 }
 0x7c1   :  { %v1342_v5 = vmul.f32 0.35355338, %v1308_v28  ;;  %v1344_v1 = vmul.f32 0.35355338, %v1337_v34 }
 0x7c3   :  { %v1346_v24 = vsel %vm3312_vm13, -1e+30, %v1342_v5  ;;  %v1348_v39 = vsel %vm3380_vm4, -1e+30, %v1344_v1 }
 0x7c4   :  { %v1350_v13 = vsel %vm555_vm14, %v1346_v24, -inf  ;;  %v2813_v12 = vpop.eup %2812  ;;  %v1356_v50 = vsel %vm555_vm14, %v1348_v39, -inf }
 0x7c5   :  { %1351 = vmax.xlane.f32.xlu2 %v1350_v13  ;;  %v1119_v7 = vsel %vm555_vm14, %v2813_v12, 0.0 }
 0x7c8   :  { %v1310_v17 = vpop.f32.mrf.mxu3  ;;  %v1339_v10 = vpop.f32.mrf.mxu0 }
 0x7c9   :  { %v1343_v36 = vmul.f32 0.35355338, %v1310_v17  ;;  %v1345_v25 = vmul.f32 0.35355338, %v1339_v10 }
 0x7cb   :  { %v1347_v44 = vsel %vm3339_vm0, -1e+30, %v1343_v36  ;;  %v3538_v20 = vsel %vm3387_vm5, -1e+30, %v1345_v25 }
 0x7cc   :  { %v1353_v9 = vsel %vm555_vm14, %v1347_v44, -inf  ;;  %v1359_v26 = vsel %vm555_vm14, %v3538_v20, -inf }
 0x7cd   :  { %1120 = vadd.xlane.f32.xlu2 %v1119_v7  ;;  %1354 = vmax.xlane.f32.xlu0 %v1353_v9 }
 0x7e1   :  { %1176 = vrot.lane.b32.xlu0 %v1175_v59, %s3007_s2 }
 0x80b   :  { %1360 = vmax.xlane.f32.xlu0 %v1359_v26 }
 0x831   :  { %v1118_v52 = vpop.xlane.xlu1 %1117 }
 0x838   :  { %v1352_v30 = vpop.xlane.xlu2 %1351 }
 0x839   :  { %v1362_v57 = vsub.f32 %v1346_v24, %v1352_v30 }
 0x83b   :  { %v1366_v23 = vmul.f32 1.442695, %v1362_v57 }
 0x83d   :  { %2814 = vpow2.f32 %v1366_v23 }
 0x83e   :  { %v1218_v62 = vpop.f32.mrf.mxu2 }
 0x83f   :  { %v1228_v0 = vadd.f32 %v1218_v62, %v3471_v16 }
 0x840   :  { %v1121_v55 = vpop.xlane.xlu2 %1120  ;;  %v1355_v56 = vpop.xlane.xlu0 %1354 }
 0x841   :  { %2816 = vrcp.f32 %v1121_v55  ;;  %v1363_v59 = vsub.f32 %v1347_v44, %v1355_v56 }
 0x842   :  { %2818 = vrcp.f32 %v1118_v52 }
 0x843   :  { %v2815_v22 = vpop.eup %2814  ;;  %v1368_v37 = vmul.f32 1.442695, %v1363_v59 }
 0x844   :  { %v1374_v15 = vsel %vm555_vm14, %v2815_v22, 0.0 }
 0x845   :  { %2820 = vpow2.f32 %v1368_v37  ;;  %1375 = vadd.xlane.f32.xlu1 %v1374_v15  ;;  %v85_v15 = vld [vmem:[#allocation4 + $0x2c] sm:$0xf] }
 0x847   :  { %v2817_v27 = vpop.eup %2816 }
 0x848   :  { %v2819_v53 = vpop.eup %2818  ;;  %v1129_v60 = vmul.f32 %v2817_v27, %v2813_v12  ;;  %v1471_v27 = vsel %vm322_vm8, %v85_v15, 0 }
 0x849   :  { %v1128_v21 = vmul.f32 %v2819_v53, %v2811_v48  ;;  %v1437_v48 = vunpack.c.l.b16 %v1282_v8  ;;  %1480 = vmatpush.bf16.msrb.mxu0 %v1471_v27 }
 0x84a   :  { %v1133_v6 = vpack.c.bf16 %v1129_v60, %v1129_v60 }
 0x84b   :  { %v2821_v31 = vpop.eup %2820  ;;  %v1132_v38 = vpack.c.bf16 %v1128_v21, %v1128_v21  ;;  %v1439_v54 = vpack.c.b16 %v1438_v32, %v1437_v48  ;;  %v701_v32 = vadd.f32 %v3468_v29, %v3501_v4 }
 0x84c   :  { %v1377_v51 = vsel %vm555_vm14, %v2821_v31, 0.0  ;;  %v1169_v19 = vunpack.c.l.b16 %v1133_v6 }
 0x84d   :  { %1378 = vadd.xlane.f32.xlu2 %v1377_v51  ;;  %v1168_v2 = vunpack.c.l.b16 %v1132_v38 }
 0x84f   :  { %v1170_v14 = vpack.c.b16 %v1169_v19, %v1168_v2 }
 0x853   :  { %v1177_v33 = vpop.permute.xlu0 %1176 }
 0x854   :  { %v1182_v49 = vsel %vm619_vm2, %v1177_v33, 0 }
 0x855   :  { %1191 = vmatpush.bf16.msra.mxu1 %v1182_v49  ;;  %1357 = vmax.xlane.f32.xlu2 %v1356_v50 }
 0x858   :  { %2666 = vmatmul.msk.bf16.vlgmr.msra.gmra.mxu1 %vm555_vm14, %v1170_v14  ;;  %v2727_v14 = vld [vmem:[#allocation4 + $0x30] sm:$0xff] }
 0x859   :  { %1650 = vrot.lane.b32.xlu0 %v2727_v14, %s3001_s27 }
 0x85e   :  { %1408 = vrot.lane.b32.xlu1 %v1407_v43, %s3008_s6 }
 0x866   :  { %1440 = vrot.lane.b32.xlu1 %v1439_v54, %s3008_s6  ;;  %v1220_v54 = vpop.f32.mrf.mxu2 }
 0x87e   :  { %v1361_v13 = vpop.xlane.xlu0 %1360 }
 0x87f   :  { %v1365_v35 = vsub.f32 %v3538_v20, %v1361_v13 }
 0x881   :  { %v1372_v9 = vmul.f32 1.442695, %v1365_v35 }
 0x8b8   :  { %v1376_v11 = vpop.xlane.xlu1 %1375 }
 0x8b9   :  { %2822 = vrcp.f32 %v1376_v11  ;;  %v965_v11 = vadd.f32 %v3516_v40, %v701_v32 }
 0x8bf   :  { %v2823_v5 = vpop.eup %2822 }
 0x8c0   :  { %v1379_v28 = vpop.xlane.xlu2 %1378  ;;  %v1390_v36 = vmul.f32 %v2823_v5, %v2815_v22  ;;  %v1229_v5 = vadd.f32 %v1220_v54, %v965_v11 }
 0x8c1   :  { %2824 = vrcp.f32 %v1379_v28 }
 0x8c2   :  { %v1394_v7 = vpack.c.bf16 %v1390_v36, %v1390_v36 }
 0x8c4   :  { %v1400_v25 = vunpack.c.l.b16 %v1394_v7 }
 0x8c7   :  { %v2825_v24 = vpop.eup %2824 }
 0x8c8   :  { %v1391_v17 = vmul.f32 %v2825_v24, %v2821_v31  ;;  %v1358_v12 = vpop.xlane.xlu2 %1357 }
 0x8c9   :  { %v1364_v44 = vsub.f32 %v1348_v39, %v1358_v12 }
 0x8ca   :  { %v1395_v42 = vpack.c.bf16 %v1391_v17, %v1391_v17 }
 0x8cb   :  { %v1370_v43 = vmul.f32 1.442695, %v1364_v44 }
 0x8cc   :  { %v1401_v34 = vunpack.c.l.b16 %v1395_v42 }
 0x8cd   :  { %2826 = vpow2.f32 %v1370_v43 }
 0x8ce   :  { %2828 = vpow2.f32 %v1372_v9  ;;  %v1402_v57 = vpack.c.b16 %v1401_v34, %v1400_v25  ;;  %v2728_v25 = vld [vmem:[#allocation4 + $0x38] sm:$0xff] }
 0x8d0   :  { %v1409_v10 = vpop.permute.xlu1 %1408 }
 0x8d1   :  { %v1414_v26 = vsel %vm619_vm2, %v1409_v10, 0 }
 0x8d2   :  { %1423 = vmatpush.bf16.msrb.mxu1 %v1414_v26 }
 0x8d3   :  { %v2827_v30 = vpop.eup %2826 }
 0x8d4   :  { %v1380_v23 = vsel %vm555_vm14, %v2827_v30, 0.0  ;;  %v2829_v55 = vpop.eup %2828 }
 0x8d5   :  { %v1193_v52 = vpop.f32.mrf.mxu1  ;;  %2671 = vmatmul.msk.bf16.vlgmr.msrb.gmra.mxu1 %vm555_vm14, %v1402_v57  ;;  %1381 = vadd.xlane.f32.xlu2 %v1380_v23  ;;  %v1383_v59 = vsel %vm555_vm14, %v2829_v55, 0.0 }
 0x8d6   :  { %1632 = vmatpush.bf16.msra.mxu1 %v2728_v25 }
 0x8d8   :  { %v1441_v20 = vpop.permute.xlu1 %1440 }
 0x8d9   :  { %v1446_v56 = vsel %vm619_vm2, %v1441_v20, 0 }
 0x8da   :  { %1455 = vmatpush.bf16.msra.mxu3 %v1446_v56  ;;  %1633 = vmatpush.bf16.msra.mxu1 %v2727_v14 }
 0x8dd   :  { %v1195_v22 = vpop.f32.mrf.mxu1  ;;  %1384 = vadd.xlane.f32.xlu2 %v1383_v59 }
 0x8de   :  { %v1199_v37 = vpack.c.bf16 %v1195_v22, %v1193_v52 }
 0x8e0   :  { %2668 = vmatmul.msk.bf16.gmra.mxu2 %vm315_vm10, %v1199_v37  ;;  %v703_v37 = vadd.f32 %v3468_v29, %v3504_v58 }
 0x948   :  { %v1382_v53 = vpop.xlane.xlu2 %1381 }
 0x949   :  { %2830 = vrcp.f32 %v1382_v53  ;;  %v967_v53 = vadd.f32 %v3534_v41, %v703_v37  ;;  %v3010_v37 = vmov 1  }
 0x94a   :  { %2756 = vset.pattern.permute.xlu2 %v3010_v37  ;;  %2757 = vset.pattern.permute.xlu0 %v3010_v37 }
 0x94f   :  { %v2831_v31 = vpop.eup %2830 }
 0x950   :  { %v1385_v60 = vpop.xlane.xlu2 %1384  ;;  %v1392_v51 = vmul.f32 %v2831_v31, %v2827_v30 }
 0x951   :  { %2832 = vrcp.f32 %v1385_v60 }
 0x952   :  { %v1425_v21 = vpop.f32.mrf.mxu1  ;;  %v1396_v6 = vpack.c.bf16 %v1392_v51, %v1392_v51 }
 0x954   :  { %v1432_v2 = vunpack.c.l.b16 %v1396_v6 }
 0x957   :  { %v2833_v1 = vpop.eup %2832 }
 0x958   :  { %v1393_v38 = vmul.f32 %v2833_v1, %v2829_v55 }
 0x95a   :  { %v1397_v39 = vpack.c.bf16 %v1393_v38, %v1393_v38  ;;  %v1427_v19 = vpop.f32.mrf.mxu1 }
 0x95b   :  { %v1462_v33 = vpack.c.bf16 %v1427_v19, %v1425_v21 }
 0x95c   :  { %v1433_v49 = vunpack.c.l.b16 %v1397_v39 }
 0x95d   :  { %2673 = vmatmul.msk.bf16.vlgmr.msrb.gmra.mxu0 %vm315_vm10, %v1462_v33  ;;  %v1651_v33 = vpop.permute.xlu0 %1650 }
 0x95e   :  { %v1434_v50 = vpack.c.b16 %v1433_v49, %v1432_v2 }
 0x960   :  { %2672 = vmatmul.msk.bf16.vlgmr.msra.gmra.mxu3 %vm555_vm14, %v1434_v50 }
 0x963   :  { %v1223_v55 = vpop.f32.mrf.mxu2 }
 0x964   :  { %v1230_v56 = vadd.f32 %v1223_v55, %v3519_v47 }
 0x96b   :  { %v1225_v27 = vpop.f32.mrf.mxu2 }
 0x96c   :  { %v1231_v31 = vadd.f32 %v1225_v27, %v967_v53 }
 0x9da   :  { %v1482_v18 = vpop.f32.mrf.mxu0 }
 0x9db   :  { %v1492_v8 = vadd.f32 %v1482_v18, %v1228_v0  ;;  %v2733_v18 = vld [vmem:[#allocation2] sm:$0xff] }
 0x9dd   :  { %v1496_v48 = vadd.f32 %v1492_v8, %v3116_v63  ;;  %v3009_v63 = vmov 32.0  }
 0x9de   :  { %2834 = vrcp.f32 %v3009_v63  ;;  %v3605_v63 = vld [vmem:[#allocation6 + $0x6] ss:$0 sm:$0xff] }
 0x9df   :  { %v1500_v28 = vsel %vm359_vm9, %v1496_v48, 0.0 }
 0x9e0   :  { %1501 = vadd.xlane.f32.xlu2 %v1500_v28 }
 0x9e2   :  { %v1484_v24 = vpop.f32.mrf.mxu0 }
 0x9e3   :  { %v1493_v13 = vadd.f32 %v1484_v24, %v1229_v5  ;;  %v1457_v17 = vpop.f32.mrf.mxu3  ;;  %v3601_v24 = vld [vmem:[#allocation6 + $0x5] ss:$0 sm:$0xff] }
 0x9e4   :  { %v2835_v4 = vpop.eup %2834 }
 0x9e5   :  { %v1497_v12 = vadd.f32 %v1493_v13, %v3121_v3  ;;  %v1513_v40 = vmul.f32 32.0, %v2835_v4  ;;  %vm1517_vm6 = vweird.f32 %v2835_v4 }
 0x9e7   :  { %v1503_v16 = vsel %vm359_vm9, %v1497_v12, 0.0  ;;  %v1514_v35 = vsub.f32 1.0, %v1513_v40 }
 0x9e8   :  { %1504 = vadd.xlane.f32.xlu1 %v1503_v16 }
 0x9e9   :  { %v1515_v42 = vmul.f32 %v2835_v4, %v1514_v35 }
 0x9eb   :  { %v1459_v36 = vpop.f32.mrf.mxu3  ;;  %v1516_v43 = vadd.f32 %v2835_v4, %v1515_v42 }
 0x9ec   :  { %v1463_v44 = vpack.c.bf16 %v1459_v36, %v1457_v17 }
 0x9ed   :  { %v3574_v7 = vsel %vm1517_vm6, %v2835_v4, %v1516_v43 }
 0x9ee   :  { %2674 = vmatmul.msk.bf16.gmra.mxu0 %vm315_vm10, %v1463_v44 }
 0xa53   :  { %v1502_v9 = vpop.xlane.xlu2 %1501 }
 0xa54   :  { %v1519_v3 = vmul.f32 %v3574_v7, %v1502_v9 }
 0xa56   :  { %v3577_v34 = vsub.f32 %v1496_v48, %v1519_v3 }
 0xa58   :  { %v1527_v10 = vmul.f32 %v3577_v34, %v3577_v34 }
 0xa5a   :  { %v1531_v26 = vsel %vm359_vm9, %v1527_v10, 0.0 }
 0xa5b   :  { %v1505_v30 = vpop.xlane.xlu1 %1504  ;;  %1532 = vadd.xlane.f32.xlu2 %v1531_v26  ;;  %v3621_v26 = vld [vmem:[#allocation6 + $0x7] ss:$0 sm:$0xff] }
 0xa5c   :  { %v1520_v57 = vmul.f32 %v3574_v7, %v1505_v30 }
 0xa5e   :  { %v3583_v23 = vsub.f32 %v1497_v12, %v1520_v57 }
 0xa60   :  { %v1528_v52 = vmul.f32 %v3583_v23, %v3583_v23 }
 0xa62   :  { %v1534_v20 = vsel %vm359_vm9, %v1528_v52, 0.0 }
 0xa63   :  { %1535 = vadd.xlane.f32.xlu2 %v1534_v20 }
 0xa6b   :  { %v1487_v59 = vpop.f32.mrf.mxu0 }
 0xa6c   :  { %v1494_v22 = vadd.f32 %v1487_v59, %v1230_v56 }
 0xa6e   :  { %v1498_v15 = vadd.f32 %v1494_v22, %v3100_v45 }
 0xa70   :  { %v1506_v60 = vsel %vm359_vm9, %v1498_v15, 0.0 }
 0xa71   :  { %1507 = vadd.xlane.f32.xlu0 %v1506_v60 }
 0xa73   :  { %v1489_v21 = vpop.f32.mrf.mxu0 }
 0xa74   :  { %v1495_v51 = vadd.f32 %v1489_v21, %v1231_v31 }
 0xa76   :  { %v1499_v1 = vadd.f32 %v1495_v51, %v3102_v46 }
 0xa78   :  { %v1509_v47 = vsel %vm359_vm9, %v1499_v1, 0.0 }
 0xa79   :  { %1510 = vadd.xlane.f32.xlu1 %v1509_v47 }
 0xa7b   :  { %1652 = vrot.lane.b32.xlu2 %v2728_v25, %s3001_s27 }
 0xace   :  { %v1533_v6 = vpop.xlane.xlu2 %1532 }
 0xacf   :  { %v1543_v29 = vmul.f32 %v1533_v6, %v3574_v7 }
 0xad1   :  { %v1547_v45 = vadd.f32 1e-05, %v1543_v29 }
 0xad3   :  { %2836 = vrsqrt.f32 %v1547_v45  ;;  %vm1557_vm11 = vweird.f32 %v1547_v45 }
 0xad6   :  { %v1536_v58 = vpop.xlane.xlu2 %1535 }
 0xad7   :  { %v1544_v41 = vmul.f32 %v1536_v58, %v3574_v7 }
 0xad9   :  { %v2837_v38 = vpop.eup %2836  ;;  %v1548_v39 = vadd.f32 1e-05, %v1544_v41 }
 0xada   :  { %v1552_v19 = vmul.f32 %v2837_v38, %v1547_v45  ;;  %vm1558_vm7 = vweird.f32 %v2837_v38 }
 0xadb   :  { %2838 = vrsqrt.f32 %v1548_v39  ;;  %vm1559_vm12 = vmor %vm1557_vm11, %vm1558_vm7  ;;  %vm1567_vm14 = vweird.f32 %v1548_v39 }
 0xadc   :  { %v1553_v2 = vmul.f32 %v2837_v38, %v1552_v19 }
 0xade   :  { %v1554_v46 = vmul.f32 0.5, %v1553_v2  ;;  %v1653_v49 = vpop.permute.xlu2 %1652 }
 0xadf   :  { %1669 = vmatpush.bf16.msra.mxu2 %v1653_v49 }
 0xae0   :  { %v1555_v50 = vsub.f32 1.5, %v1554_v46 }
 0xae1   :  { %v2839_v14 = vpop.eup %2838 }
 0xae2   :  { %v1556_v62 = vmul.f32 %v2837_v38, %v1555_v50  ;;  %v1562_v0 = vmul.f32 %v2839_v14, %v1548_v39  ;;  %vm1568_vm13 = vweird.f32 %v2839_v14 }
 0xae3   :  { %1670 = vmatpush.bf16.msra.mxu2 %v1651_v33  ;;  %vm1569_vm15 = vmor %vm1567_vm14, %vm1568_vm13 }
 0xae4   :  { %v1563_v8 = vmul.f32 %v2839_v14, %v1562_v0  ;;  %v1508_v32 = vpop.xlane.xlu0 %1507  ;;  %v1560_v54 = vsel %vm1559_vm12, %v2837_v38, %v1556_v62 }
 0xae5   :  { %v1521_v48 = vmul.f32 %v3574_v7, %v1508_v32  ;;  %v1591_v13 = vmul.f32 %v1560_v54, %v3577_v34 }
 0xae6   :  { %v1564_v11 = vmul.f32 0.5, %v1563_v8  ;;  %2689 = vmatmul.msk.bf16.vlgmr.msra.gmra.mxu2 %vm359_vm9, %v2733_v18 }
 0xae7   :  { %v1525_v28 = vsub.f32 %v1498_v15, %v1521_v48  ;;  %v1596_v4 = vmul.f32 %v3601_v24, %v1591_v13  ;;  %v2916_v15 = vld [vmem:[%s3891_s3] sm:$0x1] }
 0xae8   :  { %v1565_v5 = vsub.f32 1.5, %v1564_v11 }
 0xae9   :  { %v1529_v17 = vmul.f32 %v1525_v28, %v1525_v28  ;;  %v3612_v9 = vadd.f32 %v3605_v63, %v1596_v4 }
 0xaea   :  { %v1566_v12 = vmul.f32 %v2839_v14, %v1565_v5 }
 0xaeb   :  { %v1537_v16 = vsel %vm359_vm9, %v1529_v17, 0.0 }
 0xaec   :  { %v1570_v36 = vsel %vm1569_vm15, %v2839_v14, %v1566_v12  ;;  %1538 = vadd.xlane.f32.xlu2 %v1537_v16  ;;  %v1511_v44 = vpop.xlane.xlu1 %1510 }
 0xaed   :  { %v1592_v40 = vmul.f32 %v1570_v36, %v3583_v23  ;;  %v1522_v35 = vmul.f32 %v3574_v7, %v1511_v44 }
 0xaef   :  { %v1597_v42 = vmul.f32 %v3601_v24, %v1592_v40  ;;  %v1526_v43 = vsub.f32 %v1499_v1, %v1522_v35 }
 0xaf1   :  { %v3615_v3 = vadd.f32 %v3605_v63, %v1597_v42  ;;  %v1530_v34 = vmul.f32 %v1526_v43, %v1526_v43 }
 0xaf3   :  { %v1540_v10 = vsel %vm359_vm9, %v1530_v34, 0.0  ;;  %v1605_v25 = vpack.c.bf16 %v3615_v3, %v3612_v9 }
 0xaf4   :  { %1541 = vadd.xlane.f32.xlu1 %v1540_v10 }
 0xaf5   :  { %2683 = vmatmul.msk.bf16.vlgmr.msra.gmra.mxu1 %vm359_vm9, %v1605_v25 }
 0xb04   :  { %200 = vperm.xlu2 %2756, %v2916_v15  }
 0xb0d   :  { %1657 = vrot.lane.b32.xlu1 %v3621_v26, %s3001_s27 }
 0xb5f   :  { %v1539_v30 = vpop.xlane.xlu2 %1538 }
 0xb60   :  { %v1545_v57 = vmul.f32 %v1539_v30, %v3574_v7 }
 0xb62   :  { %v1549_v23 = vadd.f32 1e-05, %v1545_v57 }
 0xb64   :  { %2840 = vrsqrt.f32 %v1549_v23  ;;  %vm1577_vm2 = vweird.f32 %v1549_v23 }
 0xb67   :  { %v1542_v52 = vpop.xlane.xlu1 %1541  ;;  %v201_v35 = vpop.permute.xlu2 %200 }
 0xb68   :  { %v1546_v20 = vmul.f32 %v1542_v52, %v3574_v7 }
 0xb69   :  { %v1672_v1 = vpop.f32.mrf.mxu2 }
 0xb6a   :  { %v2841_v55 = vpop.eup %2840  ;;  %v1550_v56 = vadd.f32 1e-05, %v1546_v20 }
 0xb6b   :  { %v1572_v59 = vmul.f32 %v2841_v55, %v1549_v23  ;;  %vm1578_vm0 = vweird.f32 %v2841_v55 }
 0xb6c   :  { %2842 = vrsqrt.f32 %v1550_v56  ;;  %vm1579_vm3 = vmor %vm1577_vm2, %vm1578_vm0  ;;  %vm1587_vm5 = vweird.f32 %v1550_v56 }
 0xb6d   :  { %v1573_v22 = vmul.f32 %v2841_v55, %v1572_v59 }
 0xb6f   :  { %v1574_v27 = vmul.f32 0.5, %v1573_v22 }
 0xb71   :  { %v1575_v53 = vsub.f32 1.5, %v1574_v27  ;;  %v1674_v49 = vpop.f32.mrf.mxu2 }
 0xb72   :  { %v2843_v60 = vpop.eup %2842  ;;  %v1635_v31 = vpop.f32.mrf.mxu1 }
 0xb73   :  { %v1576_v21 = vmul.f32 %v2841_v55, %v1575_v53  ;;  %v1582_v51 = vmul.f32 %v2843_v60, %v1550_v56  ;;  %v1636_v45 = vadd.f32 %v3621_v26, %v1635_v31  ;;  %vm1588_vm4 = vweird.f32 %v2843_v60 }
 0xb74   :  { %vm1589_vm6 = vmor %vm1587_vm5, %vm1588_vm4 }
 0xb75   :  { %v1583_v47 = vmul.f32 %v2843_v60, %v1582_v51  ;;  %v1580_v6 = vsel %vm1579_vm3, %v2841_v55, %v1576_v21  ;;  %v1677_v19 = vpack.c.bf16 %v1636_v45, %v1636_v45 }
 0xb76   :  { %v1593_v41 = vmul.f32 %v1580_v6, %v1525_v28 }
 0xb77   :  { %v1584_v29 = vmul.f32 0.5, %v1583_v47  ;;  %v1685_v62 = vunpack.c.l.b16 %v1677_v19 }
 0xb78   :  { %v1598_v14 = vmul.f32 %v3601_v24, %v1593_v41 }
 0xb79   :  { %v1585_v58 = vsub.f32 1.5, %v1584_v29 }
 0xb7a   :  { %v1637_v38 = vpop.f32.mrf.mxu1  ;;  %v3637_v28 = vadd.f32 %v3605_v63, %v1598_v14 }
 0xb7b   :  { %v1586_v39 = vmul.f32 %v2843_v60, %v1585_v58  ;;  %v1638_v33 = vadd.f32 %v3621_v26, %v1637_v38  ;;  %v2917_v38 = vld [vmem:[%s3891_s3 + $0x1] sm:$0x1] }
 0xb7d   :  { %v1590_v2 = vsel %vm1589_vm6, %v2843_v60, %v1586_v39  ;;  %v1678_v46 = vpack.c.bf16 %v1638_v33, %v1638_v33 }
 0xb7e   :  { %v1594_v50 = vmul.f32 %v1590_v2, %v1526_v43  ;;  %v202_v43 = vperm.slane %v201_v35, 0 }
 0xb7f   :  { %v1686_v0 = vunpack.c.l.b16 %v1678_v46  ;;  %v1658_v18 = vpop.permute.xlu1 %1657 }
 0xb80   :  { %v1673_v8 = vadd.f32 %v1672_v1, %v1658_v18  ;;  %v1599_v32 = vmul.f32 %v3601_v24, %v1594_v50  ;;  %v1675_v48 = vadd.f32 %v1674_v49, %v1658_v18  ;;  %vm3659_vm7 = vcmp.ge.s32.totalorder %v3283_v61, %v202_v43 }
 0xb81   :  { %v3634_v54 = vpack.c.b16 %v1686_v0, %v1685_v62 }
 0xb82   :  { %v1681_v11 = vpack.c.bf16 %v1673_v8, %v1673_v8  ;;  %v3640_v5 = vadd.f32 %v3605_v63, %v1599_v32  ;;  %v1682_v13 = vpack.c.bf16 %v1675_v48, %v1675_v48 }
 0xb83   :  { %1888 = vrot.lane.b32.xlu1 %v3634_v54, %s3003_s14 }
 0xb84   :  { %v1799_v17 = vunpack.c.l.b16 %v1681_v11  ;;  %v1692_v12 = vsel %vm315_vm10, %v1681_v11, 0  ;;  %v1606_v24 = vpack.c.bf16 %v3640_v5, %v3637_v28  ;;  %v1717_v16 = vsel %vm315_vm10, %v1682_v13, 0 }
 0xb85   :  { %1701 = vmatpush.bf16.xpose.msrb.mxu3 %v1692_v12  ;;  %1726 = vmatpush.bf16.xpose.msrb.mxu2 %v1717_v16  ;;  %v1829_v53 = vunpack.c.l.b16 %v1682_v13 }
 0xb86   :  { %v3648_v36 = vpack.c.b16 %v1799_v17, %v1799_v17  ;;  %2684 = vmatmul.msk.bf16.gmra.mxu1 %vm359_vm9, %v1606_v24 }
 0xb87   :  { %v3674_v60 = vpack.c.b16 %v1829_v53, %v1829_v53 }
 0xb88   :  { %1890 = vrot.lane.b32.xlu0 %v3648_v36, %s3003_s14 }
 0xb8c   :  { %2690 = vmatmul.msk.bf16.vlgmr.msrb.gmra.mxu3 %vm315_vm10, %v3634_v54 }
 0xbf5   :  { %v1889_v27 = vpop.permute.xlu1 %1888 }
 0xbfa   :  { %v1891_v44 = vpop.permute.xlu0 %1890 }
 0xbfb   :  { %v1896_v63 = vsel %vm315_vm10, %v1891_v44, 0 }
 0xbfc   :  { %1905 = vmatpush.bf16.xpose.msra.mxu2 %v1896_v63 }
 0xc03   :  { %v1640_v4 = vpop.f32.mrf.mxu1 }
 0xc04   :  { %v1641_v40 = vadd.f32 %v3621_v26, %v1640_v4 }
 0xc06   :  { %v1679_v34 = vpack.c.bf16 %v1641_v40, %v1641_v40 }
 0xc08   :  { %v1710_v23 = vunpack.c.l.b16 %v1679_v34 }
 0xc0b   :  { %v1642_v42 = vpop.f32.mrf.mxu1 }
 0xc0c   :  { %v1643_v10 = vadd.f32 %v3621_v26, %v1642_v42 }
 0xc0e   :  { %v1680_v25 = vpack.c.bf16 %v1643_v10, %v1643_v10 }
 0xc0f   :  { %v1703_v57 = vpop.f32.mrf.mxu3 }
 0xc10   :  { %v1711_v52 = vunpack.c.l.b16 %v1680_v25  ;;  %v1733_v20 = vmul.f32 0.35355338, %v1703_v57 }
 0xc12   :  { %v3663_v55 = vpack.c.b16 %v1711_v52, %v1710_v23  ;;  %v1741_v56 = vsel %vm3659_vm7, -1e+30, %v1733_v20 }
 0xc13   :  { %v1745_v59 = vsel %vm315_vm10, %v1741_v56, -inf }
 0xc14   :  { %2691 = vmatmul.msk.bf16.vlgmr.msrb.gmra.mxu2 %vm315_vm10, %v3663_v55  ;;  %1746 = vmax.xlane.f32.xlu1 %v1745_v59 }
 0xc17   :  { %v1705_v26 = vpop.f32.mrf.mxu3 }
 0xc18   :  { %v1734_v22 = vmul.f32 0.35355338, %v1705_v26 }
 0xc1a   :  { %v1742_v37 = vsel %vm3659_vm7, -1e+30, %v1734_v22 }
 0xc1b   :  { %v1748_v15 = vsel %vm315_vm10, %v1742_v37, -inf }
 0xc1c   :  { %1749 = vmax.xlane.f32.xlu0 %v1748_v15 }
 0xc24   :  { %2696 = vmatmul.msk.bf16.vlgmr.msra.gmra.mxu2 %vm315_vm10, %v1889_v27 }
 0xc30   :  { %1914 = vrot.lane.b32.xlu0 %v3674_v60, %s3003_s14 }
 0xc38   :  { %1912 = vrot.lane.b32.xlu0 %v3663_v55, %s3003_s14 }
 0xc87   :  { %v1747_v31 = vpop.xlane.xlu1 %1746 }
 0xc88   :  { %v1757_v21 = vsub.f32 %v1741_v56, %v1747_v31 }
 0xc8a   :  { %v1761_v51 = vmul.f32 1.442695, %v1757_v21 }
 0xc8c   :  { %2844 = vpow2.f32 %v1761_v51 }
 0xc8f   :  { %v1750_v1 = vpop.xlane.xlu0 %1749 }
 0xc90   :  { %v1758_v47 = vsub.f32 %v1742_v37, %v1750_v1 }
 0xc92   :  { %v2845_v6 = vpop.eup %2844  ;;  %v1763_v29 = vmul.f32 1.442695, %v1758_v47 }
 0xc93   :  { %v1769_v45 = vsel %vm315_vm10, %v2845_v6, 0.0 }
 0xc94   :  { %2846 = vpow2.f32 %v1763_v29  ;;  %1770 = vadd.xlane.f32.xlu2 %v1769_v45 }
 0xc97   :  { %v1728_v39 = vpop.f32.mrf.mxu2 }
 0xc98   :  { %v1735_v0 = vmul.f32 0.35355338, %v1728_v39 }
 0xc9a   :  { %v2847_v58 = vpop.eup %2846 }
 0xc9b   :  { %v1772_v41 = vsel %vm315_vm10, %v2847_v58, 0.0 }
 0xc9c   :  { %1773 = vadd.xlane.f32.xlu1 %v1772_v41 }
 0xc9f   :  { %v1730_v19 = vpop.f32.mrf.mxu2 }
 0xca0   :  { %v1736_v18 = vmul.f32 0.35355338, %v1730_v19 }
 0xca2   :  { %v1915_v43 = vpop.permute.xlu0 %1914 }
 0xca3   :  { %v1920_v23 = vsel %vm315_vm10, %v1915_v43, 0 }
 0xca7   :  { %v1907_v33 = vpop.f32.mrf.mxu2 }
 0xca8   :  { %v1936_v2 = vmul.f32 0.35355338, %v1907_v33 }
 0xcaa   :  { %v1940_v46 = vsel %vm3659_vm7, -1e+30, %v1936_v2  ;;  %v1913_v20 = vpop.permute.xlu0 %1912 }
 0xcab   :  { %v1944_v49 = vsel %vm315_vm10, %v1940_v46, -inf }
 0xcac   :  { %204 = vperm.xlu2 %2756, %v2917_v38  }
 0xcaf   :  { %v1909_v8 = vpop.f32.mrf.mxu2 }
 0xcb0   :  { %v1937_v24 = vmul.f32 0.35355338, %v1909_v8 }
 0xcb5   :  { %1801 = vrot.lane.b32.xlu1 %v3648_v36, %s3001_s27 }
 0xcd5   :  { %1945 = vmax.xlane.f32.xlu2 %v1944_v49 }
 0xd07   :  { %v1771_v50 = vpop.xlane.xlu2 %1770 }
 0xd0f   :  { %v205_v14 = vpop.permute.xlu2 %204  ;;  %v1774_v48 = vpop.xlane.xlu1 %1773 }
 0xd10   :  { %v206_v62 = vperm.slane %v205_v14, 0  ;;  %2848 = vrcp.f32 %v1774_v48 }
 0xd11   :  { %2850 = vrcp.f32 %v1771_v50 }
 0xd12   :  { %vm3691_vm11 = vcmp.ge.s32.totalorder %v3283_v61, %v206_v62  ;;  %v1941_v61 = vsel %vm3659_vm7, -1e+30, %v1937_v24 }
 0xd13   :  { %v1744_v11 = vsel %vm3691_vm11, -1e+30, %v1736_v18  ;;  %v1743_v13 = vsel %vm3691_vm11, -1e+30, %v1735_v0  ;;  %v1947_v44 = vsel %vm315_vm10, %v1941_v61, -inf }
 0xd14   :  { %v1754_v17 = vsel %vm315_vm10, %v1744_v11, -inf  ;;  %v1751_v12 = vsel %vm315_vm10, %v1743_v13, -inf }
 0xd15   :  { %1755 = vmax.xlane.f32.xlu0 %v1754_v17  ;;  %1752 = vmax.xlane.f32.xlu1 %v1751_v12 }
 0xd16   :  { %v2849_v16 = vpop.eup %2848 }
 0xd17   :  { %v2851_v63 = vpop.eup %2850  ;;  %v1786_v4 = vmul.f32 %v2849_v16, %v2847_v58  ;;  %v90_v58 = vld [vmem:[#allocation4 + $0x40] sm:$0xf] }
 0xd18   :  { %v1785_v40 = vmul.f32 %v2851_v63, %v2845_v6  ;;  %v1862_v41 = vsel %vm322_vm8, %v90_v58, 0 }
 0xd19   :  { %v1790_v35 = vpack.c.bf16 %v1786_v4, %v1786_v4  ;;  %1871 = vmatpush.bf16.msrb.mxu1 %v1862_v41 }
 0xd1a   :  { %v1789_v42 = vpack.c.bf16 %v1785_v40, %v1785_v40 }
 0xd1b   :  { %v1796_v34 = vunpack.c.l.b16 %v1790_v35 }
 0xd1c   :  { %v1795_v25 = vunpack.c.l.b16 %v1789_v42 }
 0xd1d   :  { %1948 = vmax.xlane.f32.xlu1 %v1947_v44 }
 0xd1e   :  { %v1797_v52 = vpack.c.b16 %v1796_v34, %v1795_v25 }
 0xd27   :  { %v1802_v10 = vpop.permute.xlu1 %1801 }
 0xd28   :  { %v1807_v57 = vsel %vm322_vm8, %v1802_v10, 0 }
 0xd29   :  { %1816 = vmatpush.bf16.msra.mxu3 %v1807_v57 }
 0xd2c   :  { %2692 = vmatmul.msk.bf16.vlgmr.msra.gmra.mxu3 %vm315_vm10, %v1797_v52 }
 0xd2d   :  { %1929 = vmatpush.bf16.xpose.msrb.mxu3 %v1920_v23 }
 0xd36   :  { %1831 = vrot.lane.b32.xlu1 %v3674_v60, %s3001_s27 }
 0xd3c   :  { %2697 = vmatmul.msk.bf16.vlgmr.msrb.gmra.mxu3 %vm315_vm10, %v1913_v20 }
 0xd3e   :  { %2080 = vrot.lane.b32.xlu1 %v3634_v54, %s3004_s16 }
 0xd48   :  { %v1946_v26 = vpop.xlane.xlu2 %1945 }
 0xd49   :  { %v1956_v53 = vsub.f32 %v1940_v46, %v1946_v26 }
 0xd4b   :  { %v1960_v31 = vmul.f32 1.442695, %v1956_v53 }
 0xd88   :  { %v1756_v56 = vpop.xlane.xlu0 %1755  ;;  %v1753_v59 = vpop.xlane.xlu1 %1752 }
 0xd89   :  { %v1760_v22 = vsub.f32 %v1744_v11, %v1756_v56  ;;  %v1759_v37 = vsub.f32 %v1743_v13, %v1753_v59 }
 0xd8b   :  { %v1767_v15 = vmul.f32 1.442695, %v1760_v22  ;;  %v1765_v27 = vmul.f32 1.442695, %v1759_v37 }
 0xd8d   :  { %2852 = vpow2.f32 %v1767_v15 }
 0xd8e   :  { %2854 = vpow2.f32 %v1765_v27 }
 0xd8f   :  { %2856 = vpow2.f32 %v1960_v31 }
 0xd90   :  { %v1949_v21 = vpop.xlane.xlu1 %1948 }
 0xd91   :  { %v1957_v51 = vsub.f32 %v1941_v61, %v1949_v21 }
 0xd93   :  { %v2853_v1 = vpop.eup %2852  ;;  %v1962_v47 = vmul.f32 1.442695, %v1957_v51 }
 0xd94   :  { %v2855_v6 = vpop.eup %2854  ;;  %v1778_v29 = vsel %vm315_vm10, %v2853_v1, 0.0 }
 0xd95   :  { %2858 = vpow2.f32 %v1962_v47  ;;  %1779 = vadd.xlane.f32.xlu2 %v1778_v29  ;;  %v1775_v45 = vsel %vm315_vm10, %v2855_v6, 0.0  ;;  %v2857_v38 = vpop.eup %2856 }
 0xd96   :  { %1776 = vadd.xlane.f32.xlu0 %v1775_v45  ;;  %v1968_v33 = vsel %vm315_vm10, %v2857_v38, 0.0 }
 0xd9b   :  { %v2859_v39 = vpop.eup %2858 }
 0xd9c   :  { %v1971_v19 = vsel %vm315_vm10, %v2859_v39, 0.0 }
 0xd9d   :  { %1972 = vadd.xlane.f32.xlu2 %v1971_v19  ;;  %v91_v19 = vld [vmem:[#allocation4 + $0x44] sm:$0xf] }
 0xd9e   :  { %1969 = vadd.xlane.f32.xlu0 %v1968_v33  ;;  %v2055_v33 = vsel %vm322_vm8, %v91_v19, 0 }
 0xd9f   :  { %2064 = vmatpush.bf16.msra.mxu3 %v2055_v33 }
 0xda8   :  { %v1832_v2 = vpop.permute.xlu1 %1831 }
 0xda9   :  { %v1837_v46 = vsel %vm322_vm8, %v1832_v2, 0 }
 0xdaa   :  { %1846 = vmatpush.bf16.msra.mxu0 %v1837_v46 }
 0xdaf   :  { %v1818_v49 = vpop.f32.mrf.mxu3 }
 0xdb0   :  { %v2081_v53 = vpop.permute.xlu1 %2080 }
 0xdb2   :  { %1997 = vrot.lane.b32.xlu0 %v3648_v36, %s3005_s17 }
 0xdb5   :  { %2082 = vrot.lane.b32.xlu2 %v3648_v36, %s3004_s16 }
 0xdb7   :  { %v1820_v50 = vpop.f32.mrf.mxu3 }
 0xdb8   :  { %v1853_v14 = vpack.c.bf16 %v1820_v50, %v1818_v49 }
 0xdba   :  { %2694 = vmatmul.msk.bf16.vlgmr.msrb.gmra.mxu1 %vm315_vm10, %v1853_v14 }
 0xdbf   :  { %v1931_v62 = vpop.f32.mrf.mxu3 }
 0xdc0   :  { %v1938_v11 = vmul.f32 0.35355338, %v1931_v62 }
 0xdc2   :  { %v1942_v13 = vsel %vm3691_vm11, -1e+30, %v1938_v11 }
 0xdc3   :  { %v1950_v17 = vsel %vm315_vm10, %v1942_v13, -inf }
 0xdc7   :  { %v1933_v0 = vpop.f32.mrf.mxu3 }
 0xdc8   :  { %v1939_v18 = vmul.f32 0.35355338, %v1933_v0 }
 0xdca   :  { %v1943_v8 = vsel %vm3691_vm11, -1e+30, %v1939_v18 }
 0xdcb   :  { %v1953_v48 = vsel %vm315_vm10, %v1943_v8, -inf }
 0xdcc   :  { %1954 = vmax.xlane.f32.xlu1 %v1953_v48 }
 0xddc   :  { %1951 = vmax.xlane.f32.xlu0 %v1950_v17 }
 0xde5   :  { %2024 = vrot.lane.b32.xlu1 %v3674_v60, %s3005_s17 }
 0xded   :  { %2104 = vrot.lane.b32.xlu1 %v3663_v55, %s3004_s16 }
 0xdf5   :  { %2274 = vrot.lane.b32.xlu1 %v3648_v36, %s3006_s18 }
 0xdfd   :  { %2272 = vrot.lane.b32.xlu1 %v3634_v54, %s3006_s18 }
 0xe08   :  { %v1780_v12 = vpop.xlane.xlu2 %1779 }
 0xe09   :  { %2860 = vrcp.f32 %v1780_v12  ;;  %v1777_v24 = vpop.xlane.xlu0 %1776 }
 0xe0a   :  { %2862 = vrcp.f32 %v1777_v24 }
 0xe0f   :  { %v2861_v61 = vpop.eup %2860 }
 0xe10   :  { %v2863_v16 = vpop.eup %2862  ;;  %v1788_v44 = vmul.f32 %v2861_v61, %v2853_v1  ;;  %v1973_v63 = vpop.xlane.xlu2 %1972 }
 0xe11   :  { %v1787_v4 = vmul.f32 %v2863_v16, %v2855_v6  ;;  %v1970_v40 = vpop.xlane.xlu0 %1969  ;;  %2864 = vrcp.f32 %v1973_v63 }
 0xe12   :  { %v1792_v35 = vpack.c.bf16 %v1788_v44, %v1788_v44  ;;  %2866 = vrcp.f32 %v1970_v40 }
 0xe13   :  { %v1791_v42 = vpack.c.bf16 %v1787_v4, %v1787_v4 }
 0xe14   :  { %v1826_v43 = vunpack.c.l.b16 %v1792_v35 }
 0xe15   :  { %v1825_v34 = vunpack.c.l.b16 %v1791_v42 }
 0xe17   :  { %v2865_v10 = vpop.eup %2864  ;;  %v1827_v25 = vpack.c.b16 %v1826_v43, %v1825_v34 }
 0xe18   :  { %v2867_v57 = vpop.eup %2866  ;;  %v1985_v23 = vmul.f32 %v2865_v10, %v2859_v39  ;;  %v2083_v26 = vpop.permute.xlu2 %2082 }
 0xe19   :  { %2693 = vmatmul.msk.bf16.vlgmr.msra.gmra.mxu0 %vm315_vm10, %v1827_v25  ;;  %v1984_v54 = vmul.f32 %v2867_v57, %v2857_v38  ;;  %v2088_v15 = vsel %vm315_vm10, %v2083_v26, 0  ;;  %v3759_v57 = vld [vmem:[#allocation6 + $0x8] ss:$0 sm:$0xff] }
 0xe1a   :  { %v1989_v20 = vpack.c.bf16 %v1985_v23, %v1985_v23 }
 0xe1b   :  { %v1988_v52 = vpack.c.bf16 %v1984_v54, %v1984_v54 }
 0xe1c   :  { %v1995_v59 = vunpack.c.l.b16 %v1989_v20 }
 0xe1d   :  { %v1994_v56 = vunpack.c.l.b16 %v1988_v52 }
 0xe1f   :  { %v1996_v27 = vpack.c.b16 %v1995_v59, %v1994_v56 }
 0xe24   :  { %v1998_v22 = vpop.permute.xlu0 %1997 }
 0xe25   :  { %v2003_v37 = vsel %vm322_vm8, %v1998_v22, 0 }
 0xe26   :  { %2012 = vmatpush.bf16.msrb.mxu0 %v2003_v37 }
 0xe29   :  { %2698 = vmatmul.msk.bf16.vlgmr.msrb.gmra.mxu0 %vm315_vm10, %v1996_v27 }
 0xe2a   :  { %2097 = vmatpush.bf16.xpose.msra.mxu0 %v2088_v15 }
 0xe37   :  { %v1873_v23 = vpop.f32.mrf.mxu1 }
 0xe38   :  { %v1884_v20 = vadd.f32 %v3759_v57, %v1873_v23 }
 0xe39   :  { %2702 = vmatmul.msk.bf16.vlgmr.msra.gmra.mxu0 %vm315_vm10, %v2081_v53 }
 0xe3f   :  { %v1955_v31 = vpop.xlane.xlu1 %1954 }
 0xe40   :  { %v1959_v21 = vsub.f32 %v1943_v8, %v1955_v31 }
 0xe42   :  { %v1966_v51 = vmul.f32 1.442695, %v1959_v21 }
 0xe44   :  { %2868 = vpow2.f32 %v1966_v51 }
 0xe4a   :  { %v2869_v1 = vpop.eup %2868 }
 0xe4b   :  { %v1977_v47 = vsel %vm315_vm10, %v2869_v1, 0.0 }
 0xe4c   :  { %1978 = vadd.xlane.f32.xlu0 %v1977_v47 }
 0xe4f   :  { %v1952_v6 = vpop.xlane.xlu0 %1951 }
 0xe50   :  { %v1958_v29 = vsub.f32 %v1942_v13, %v1952_v6 }
 0xe52   :  { %v1964_v45 = vmul.f32 1.442695, %v1958_v29 }
 0xe54   :  { %2870 = vpow2.f32 %v1964_v45 }
 0xe57   :  { %v2025_v58 = vpop.permute.xlu1 %2024 }
 0xe58   :  { %v2030_v41 = vsel %vm322_vm8, %v2025_v58, 0 }
 0xe59   :  { %2039 = vmatpush.bf16.msrb.mxu2 %v2030_v41 }
 0xe5a   :  { %v2871_v38 = vpop.eup %2870 }
 0xe5b   :  { %v1974_v39 = vsel %vm315_vm10, %v2871_v38, 0.0 }
 0xe5c   :  { %1975 = vadd.xlane.f32.xlu2 %v1974_v39  ;;  %v3775_v39 = vpop.f32.mrf.mxu1 }
 0xe5f   :  { %v2105_v10 = vpop.permute.xlu1 %2104 }
 0xe67   :  { %v2275_v59 = vpop.permute.xlu1 %2274 }
 0xe68   :  { %v2280_v53 = vsel %vm315_vm10, %v2275_v59, 0 }
 0xe96   :  { %v1848_v2 = vpop.f32.mrf.mxu0 }
 0xe9e   :  { %v1850_v46 = vpop.f32.mrf.mxu0 }
 0xe9f   :  { %v1854_v49 = vpack.c.bf16 %v1850_v46, %v1848_v2 }
 0xea1   :  { %2695 = vmatmul.msk.bf16.gmra.mxu1 %vm315_vm10, %v1854_v49 }
 0xea6   :  { %v2014_v50 = vpop.f32.mrf.mxu0 }
 0xeae   :  { %v2016_v14 = vpop.f32.mrf.mxu0 }
 0xeaf   :  { %v2046_v62 = vpack.c.bf16 %v2016_v14, %v2014_v50 }
 0xeb1   :  { %2700 = vmatmul.msk.bf16.vlgmr.msra.gmra.mxu3 %vm315_vm10, %v2046_v62 }
 0xeb6   :  { %v2099_v0 = vpop.f32.mrf.mxu0 }
 0xeb7   :  { %v2128_v18 = vmul.f32 0.35355338, %v2099_v0 }
 0xeb9   :  { %v2132_v8 = vsel %vm3659_vm7, -1e+30, %v2128_v18 }
 0xeba   :  { %v2136_v48 = vsel %vm315_vm10, %v2132_v8, -inf }
 0xebb   :  { %2137 = vmax.xlane.f32.xlu2 %v2136_v48 }
 0xebe   :  { %v2101_v11 = vpop.f32.mrf.mxu0 }
 0xebf   :  { %v2129_v13 = vmul.f32 0.35355338, %v2101_v11  ;;  %v1979_v24 = vpop.xlane.xlu0 %1978 }
 0xec0   :  { %2872 = vrcp.f32 %v1979_v24 }
 0xec1   :  { %v2133_v17 = vsel %vm3659_vm7, -1e+30, %v2129_v13 }
 0xec2   :  { %v2139_v12 = vsel %vm315_vm10, %v2133_v17, -inf }
 0xec3   :  { %2140 = vmax.xlane.f32.xlu0 %v2139_v12 }
 0xec6   :  { %v2873_v16 = vpop.eup %2872 }
 0xec7   :  { %v1987_v44 = vmul.f32 %v2873_v16, %v2869_v1  ;;  %v2273_v16 = vpop.permute.xlu1 %2272 }
 0xec9   :  { %v1991_v4 = vpack.c.bf16 %v1987_v44, %v1987_v44 }
 0xecb   :  { %v2022_v42 = vunpack.c.l.b16 %v1991_v4 }
 0xecf   :  { %v1976_v61 = vpop.xlane.xlu2 %1975 }
 0xed0   :  { %2874 = vrcp.f32 %v1976_v61 }
 0xed3   :  { %2189 = vrot.lane.b32.xlu2 %v3648_v36, %s3007_s2 }
 0xed6   :  { %v2875_v63 = vpop.eup %2874 }
 0xed7   :  { %v1986_v40 = vmul.f32 %v2875_v63, %v2871_v38  ;;  %2106 = vrot.lane.b32.xlu0 %v3674_v60, %s3004_s16 }
 0xed9   :  { %v1990_v35 = vpack.c.bf16 %v1986_v40, %v1986_v40 }
 0xedb   :  { %v2021_v43 = vunpack.c.l.b16 %v1990_v35 }
 0xedd   :  { %v2023_v34 = vpack.c.b16 %v2022_v42, %v2021_v43 }
 0xedf   :  { %2699 = vmatmul.msk.bf16.vlgmr.msrb.gmra.mxu2 %vm315_vm10, %v2023_v34 }
 0xf1e   :  { %v1878_v14 = vpop.f32.mrf.mxu1 }
 0xf1f   :  { %v1886_v42 = vadd.f32 %v3759_v57, %v1878_v14 }
 0xf26   :  { %v3779_v11 = vpop.f32.mrf.mxu1 }
 0xf2e   :  { %v2138_v25 = vpop.xlane.xlu2 %2137 }
 0xf2f   :  { %v2148_v54 = vsub.f32 %v2132_v8, %v2138_v25 }
 0xf31   :  { %v2152_v52 = vmul.f32 1.442695, %v2148_v54 }
 0xf33   :  { %2876 = vpow2.f32 %v2152_v52 }
 0xf34   :  { %v2066_v56 = vpop.f32.mrf.mxu3 }
 0xf35   :  { %v3762_v26 = vadd.f32 %v2066_v56, %v1884_v20 }
 0xf36   :  { %v2190_v22 = vpop.permute.xlu2 %2189  ;;  %v2141_v37 = vpop.xlane.xlu0 %2140 }
 0xf37   :  { %v2195_v15 = vsel %vm322_vm8, %v2190_v22, 0  ;;  %v2149_v27 = vsub.f32 %v2133_v17, %v2141_v37 }
 0xf38   :  { %2204 = vmatpush.bf16.msra.mxu2 %v2195_v15 }
 0xf39   :  { %v2877_v31 = vpop.eup %2876  ;;  %v2154_v21 = vmul.f32 1.442695, %v2149_v27 }
 0xf3a   :  { %v2160_v51 = vsel %vm315_vm10, %v2877_v31, 0.0 }
 0xf3b   :  { %2878 = vpow2.f32 %v2154_v21  ;;  %2161 = vadd.xlane.f32.xlu2 %v2160_v51 }
 0xf3c   :  { %2289 = vmatpush.bf16.xpose.msrb.mxu2 %v2280_v53  ;;  %v3789_v35 = vpop.f32.mrf.mxu3 }
 0xf41   :  { %v2879_v1 = vpop.eup %2878 }
 0xf42   :  { %v2163_v47 = vsel %vm315_vm10, %v2879_v1, 0.0 }
 0xf43   :  { %2164 = vadd.xlane.f32.xlu0 %v2163_v47 }
 0xf49   :  { %v2107_v6 = vpop.permute.xlu0 %2106 }
 0xf4a   :  { %v2112_v29 = vsel %vm315_vm10, %v2107_v6, 0 }
 0xf4b   :  { %2121 = vmatpush.bf16.xpose.msra.mxu1 %v2112_v29 }
 0xf52   :  { %2703 = vmatmul.msk.bf16.vlgmr.msra.gmra.mxu1 %vm315_vm10, %v2105_v10  ;;  %v92_v10 = vld [vmem:[#allocation4 + $0x48] sm:$0xf] }
 0xf53   :  { %2298 = vrot.lane.b32.xlu2 %v3674_v60, %s3006_s18  ;;  %v2247_v25 = vsel %vm322_vm8, %v92_v10, 0 }
 0xf54   :  { %2256 = vmatpush.bf16.msrb.mxu1 %v2247_v25 }
 0xf57   :  { %2296 = vrot.lane.b32.xlu0 %v3663_v55, %s3006_s18 }
 0xf62   :  { %v2041_v45 = vpop.f32.mrf.mxu2 }
 0xf6a   :  { %v2043_v58 = vpop.f32.mrf.mxu2 }
 0xf6b   :  { %v2047_v41 = vpack.c.bf16 %v2043_v58, %v2041_v45 }
 0xf6d   :  { %2701 = vmatmul.msk.bf16.gmra.mxu3 %vm315_vm10, %v2047_v41 }
 0xfae   :  { %v2162_v38 = vpop.xlane.xlu2 %2161 }
 0xfaf   :  { %2880 = vrcp.f32 %v2162_v38 }
 0xfb5   :  { %v2881_v2 = vpop.eup %2880 }
 0xfb6   :  { %v2299_v19 = vpop.permute.xlu2 %2298  ;;  %v2165_v33 = vpop.xlane.xlu0 %2164  ;;  %v2176_v49 = vmul.f32 %v2881_v2, %v2877_v31 }
 0xfb7   :  { %v2304_v46 = vsel %vm315_vm10, %v2299_v19, 0  ;;  %2882 = vrcp.f32 %v2165_v33 }
 0xfb8   :  { %2313 = vmatpush.bf16.xpose.msrb.mxu3 %v2304_v46  ;;  %v2180_v55 = vpack.c.bf16 %v2176_v49, %v2176_v49 }
 0xfba   :  { %v2186_v18 = vunpack.c.l.b16 %v2180_v55 }
 0xfbd   :  { %v2883_v50 = vpop.eup %2882 }
 0xfbe   :  { %v2177_v62 = vmul.f32 %v2883_v50, %v2879_v1 }
 0xfc0   :  { %v2181_v0 = vpack.c.bf16 %v2177_v62, %v2177_v62 }
 0xfc2   :  { %v2187_v8 = vunpack.c.l.b16 %v2181_v0 }
 0xfc4   :  { %v2188_v48 = vpack.c.b16 %v2187_v8, %v2186_v18 }
 0xfc6   :  { %2704 = vmatmul.msk.bf16.vlgmr.msra.gmra.mxu2 %vm315_vm10, %v2188_v48 }
 0xfc9   :  { %v2297_v13 = vpop.permute.xlu0 %2296 }
 0xfca   :  { %2709 = vmatmul.msk.bf16.vlgmr.msrb.gmra.mxu3 %vm315_vm10, %v2297_v13 }
 0xfcf   :  { %v2123_v17 = vpop.f32.mrf.mxu1 }
 0xfd0   :  { %v2130_v12 = vmul.f32 0.35355338, %v2123_v17 }
 0xfd2   :  { %v2134_v24 = vsel %vm3691_vm11, -1e+30, %v2130_v12 }
 0xfd3   :  { %v2142_v61 = vsel %vm315_vm10, %v2134_v24, -inf }
 0xfd4   :  { %2143 = vmax.xlane.f32.xlu1 %v2142_v61 }
 0xfd6   :  { %2708 = vmatmul.msk.bf16.vlgmr.msrb.gmra.mxu2 %vm315_vm10, %v2273_v16 }
 0xfd7   :  { %v2125_v44 = vpop.f32.mrf.mxu1 }
 0xfd8   :  { %v2131_v63 = vmul.f32 0.35355338, %v2125_v44 }
 0xfda   :  { %v2135_v4 = vsel %vm3691_vm11, -1e+30, %v2131_v63 }
 0xfdb   :  { %v2145_v40 = vsel %vm315_vm10, %v2135_v4, -inf }
 0xfdc   :  { %2146 = vmax.xlane.f32.xlu2 %v2145_v40 }
 0xff0   :  { %v2071_v43 = vpop.f32.mrf.mxu3 }
 0xff1   :  { %v3792_v34 = vadd.f32 %v2071_v43, %v1886_v42 }
 0xff8   :  { %v3795_v54 = vpop.f32.mrf.mxu3 }
0x1047   :  { %v2144_v31 = vpop.xlane.xlu1 %2143 }
0x1048   :  { %v2150_v29 = vsub.f32 %v2134_v24, %v2144_v31 }
0x1049   :  { %v2206_v23 = vpop.f32.mrf.mxu2 }
0x104a   :  { %v2156_v38 = vmul.f32 1.442695, %v2150_v29 }
0x104d   :  { %v2315_v52 = vpop.f32.mrf.mxu3 }
0x104e   :  { %v2322_v20 = vmul.f32 0.35355338, %v2315_v52 }
0x104f   :  { %v2147_v56 = vpop.xlane.xlu2 %2146 }
0x1050   :  { %v2151_v59 = vsub.f32 %v2135_v4, %v2147_v56  ;;  %v2326_v22 = vsel %vm3691_vm11, -1e+30, %v2322_v20 }
0x1051   :  { %v2208_v37 = vpop.f32.mrf.mxu2  ;;  %v2334_v15 = vsel %vm315_vm10, %v2326_v22, -inf }
0x1052   :  { %v2158_v27 = vmul.f32 1.442695, %v2151_v59  ;;  %v2238_v53 = vpack.c.bf16 %v2208_v37, %v2206_v23  ;;  %2335 = vmax.xlane.f32.xlu2 %v2334_v15 }
0x1054   :  { %2884 = vpow2.f32 %v2158_v27  ;;  %2706 = vmatmul.msk.bf16.vlgmr.msrb.gmra.mxu1 %vm315_vm10, %v2238_v53 }
0x1055   :  { %v2317_v47 = vpop.f32.mrf.mxu3  ;;  %2886 = vpow2.f32 %v2156_v38 }
0x1056   :  { %v2323_v41 = vmul.f32 0.35355338, %v2317_v47 }
0x1058   :  { %v2327_v2 = vsel %vm3691_vm11, -1e+30, %v2323_v41 }
0x1059   :  { %v2291_v21 = vpop.f32.mrf.mxu2  ;;  %v2337_v49 = vsel %vm315_vm10, %v2327_v2, -inf }
0x105a   :  { %v2885_v51 = vpop.eup %2884  ;;  %v2320_v1 = vmul.f32 0.35355338, %v2291_v21 }
0x105b   :  { %v2169_v6 = vsel %vm315_vm10, %v2885_v51, 0.0  ;;  %v2887_v14 = vpop.eup %2886 }
0x105c   :  { %2170 = vadd.xlane.f32.xlu2 %v2169_v6  ;;  %v2324_v45 = vsel %vm3659_vm7, -1e+30, %v2320_v1  ;;  %v2166_v55 = vsel %vm315_vm10, %v2887_v14, 0.0 }
0x105d   :  { %v2328_v58 = vsel %vm315_vm10, %v2324_v45, -inf }
0x105e   :  { %2329 = vmax.xlane.f32.xlu0 %v2328_v58 }
0x1061   :  { %v2293_v19 = vpop.f32.mrf.mxu2 }
0x1062   :  { %v2321_v33 = vmul.f32 0.35355338, %v2293_v19 }
0x1064   :  { %v2325_v46 = vsel %vm3659_vm7, -1e+30, %v2321_v33 }
0x1065   :  { %v2331_v50 = vsel %vm315_vm10, %v2325_v46, -inf }
0x1066   :  { %2338 = vmax.xlane.f32.xlu0 %v2337_v49  ;;  %2332 = vmax.xlane.f32.xlu1 %v2331_v50 }
0x106e   :  { %2167 = vadd.xlane.f32.xlu1 %v2166_v55 }
0x107a   :  { %2216 = vrot.lane.b32.xlu0 %v3674_v60, %s3007_s2 }
0x1082   :  { %2381 = vrot.lane.b32.xlu0 %v3648_v36, %s3008_s6 }
0x10c5   :  { %v2336_v32 = vpop.xlane.xlu2 %2335 }
0x10c6   :  { %v2342_v0 = vsub.f32 %v2326_v22, %v2336_v32 }
0x10c8   :  { %v2348_v8 = vmul.f32 1.442695, %v2342_v0 }
0x10cf   :  { %v2171_v48 = vpop.xlane.xlu2 %2170 }
0x10d1   :  { %v2330_v62 = vpop.xlane.xlu0 %2329 }
0x10d2   :  { %v2340_v30 = vsub.f32 %v2324_v45, %v2330_v62 }
0x10d4   :  { %v2344_v18 = vmul.f32 1.442695, %v2340_v30 }
0x10d6   :  { %2888 = vpow2.f32 %v2344_v18 }
0x10d7   :  { %2890 = vpow2.f32 %v2348_v8 }
0x10d8   :  { %2892 = vrcp.f32 %v2171_v48 }
0x10d9   :  { %v2339_v13 = vpop.xlane.xlu0 %2338  ;;  %v2333_v17 = vpop.xlane.xlu1 %2332 }
0x10da   :  { %v2341_v12 = vsub.f32 %v2325_v46, %v2333_v17  ;;  %v2343_v61 = vsub.f32 %v2327_v2, %v2339_v13 }
0x10dc   :  { %v2889_v24 = vpop.eup %2888  ;;  %v2346_v16 = vmul.f32 1.442695, %v2341_v12  ;;  %v2350_v36 = vmul.f32 1.442695, %v2343_v61 }
0x10dd   :  { %v2352_v44 = vsel %vm315_vm10, %v2889_v24, 0.0  ;;  %v2891_v63 = vpop.eup %2890 }
0x10de   :  { %2353 = vadd.xlane.f32.xlu1 %v2352_v44  ;;  %2894 = vpow2.f32 %v2346_v16  ;;  %v2893_v40 = vpop.eup %2892  ;;  %v2358_v43 = vsel %vm315_vm10, %v2891_v63, 0.0 }
0x10df   :  { %v2179_v10 = vmul.f32 %v2893_v40, %v2885_v51 }
0x10e1   :  { %v2168_v4 = vpop.xlane.xlu1 %2167  ;;  %v2183_v52 = vpack.c.bf16 %v2179_v10, %v2179_v10 }
0x10e2   :  { %2896 = vrcp.f32 %v2168_v4 }
0x10e3   :  { %2898 = vpow2.f32 %v2350_v36  ;;  %v2214_v15 = vunpack.c.l.b16 %v2183_v52 }
0x10e4   :  { %v2895_v42 = vpop.eup %2894 }
0x10e5   :  { %v2355_v25 = vsel %vm315_vm10, %v2895_v42, 0.0 }
0x10e6   :  { %2359 = vadd.xlane.f32.xlu1 %v2358_v43  ;;  %2356 = vadd.xlane.f32.xlu2 %v2355_v25 }
0x10e8   :  { %v2897_v23 = vpop.eup %2896 }
0x10e9   :  { %v2178_v20 = vmul.f32 %v2897_v23, %v2887_v14  ;;  %v2899_v56 = vpop.eup %2898  ;;  %v1885_v23 = vadd.f32 %v3759_v57, %v3775_v39 }
0x10ea   :  { %v2361_v53 = vsel %vm315_vm10, %v2899_v56, 0.0 }
0x10eb   :  { %v2182_v59 = vpack.c.bf16 %v2178_v20, %v2178_v20 }
0x10ec   :  { %v2217_v22 = vpop.permute.xlu0 %2216 }
0x10ed   :  { %v2222_v37 = vsel %vm322_vm8, %v2217_v22, 0  ;;  %v2213_v27 = vunpack.c.l.b16 %v2182_v59 }
0x10ee   :  { %2231 = vmatpush.bf16.msrb.mxu0 %v2222_v37  ;;  %2362 = vadd.xlane.f32.xlu2 %v2361_v53 }
0x10ef   :  { %v2215_v31 = vpack.c.b16 %v2214_v15, %v2213_v27 }
0x10f1   :  { %2705 = vmatmul.msk.bf16.vlgmr.msrb.gmra.mxu0 %vm315_vm10, %v2215_v31 }
0x10f4   :  { %v2382_v21 = vpop.permute.xlu0 %2381 }
0x10f5   :  { %v2387_v51 = vsel %vm322_vm8, %v2382_v21, 0 }
0x10f6   :  { %2396 = vmatpush.bf16.msra.mxu0 %v2387_v51 }
0x10ff   :  { %2408 = vrot.lane.b32.xlu1 %v3674_v60, %s3008_s6 }
0x1151   :  { %v2354_v1 = vpop.xlane.xlu1 %2353 }
0x1152   :  { %2900 = vrcp.f32 %v2354_v1 }
0x1158   :  { %v2901_v6 = vpop.eup %2900 }
0x1159   :  { %v2357_v47 = vpop.xlane.xlu2 %2356  ;;  %v2368_v29 = vmul.f32 %v2901_v6, %v2889_v24  ;;  %v2360_v45 = vpop.xlane.xlu1 %2359  ;;  %v93_v24 = vld [vmem:[#allocation4 + $0x4c] sm:$0xf] }
0x115a   :  { %2902 = vrcp.f32 %v2357_v47  ;;  %v2439_v61 = vsel %vm322_vm8, %v93_v24, 0 }
0x115b   :  { %2904 = vrcp.f32 %v2360_v45  ;;  %v2372_v41 = vpack.c.bf16 %v2368_v29, %v2368_v29  ;;  %2448 = vmatpush.bf16.msra.mxu3 %v2439_v61 }
0x115d   :  { %v2378_v2 = vunpack.c.l.b16 %v2372_v41 }
0x1160   :  { %v2903_v58 = vpop.eup %2902 }
0x1161   :  { %v2369_v38 = vmul.f32 %v2903_v58, %v2895_v42  ;;  %v2363_v19 = vpop.xlane.xlu2 %2362  ;;  %v2905_v49 = vpop.eup %2904 }
0x1162   :  { %2906 = vrcp.f32 %v2363_v19  ;;  %v2370_v60 = vmul.f32 %v2905_v49, %v2891_v63  ;;  %v2258_v42 = vpop.f32.mrf.mxu1 }
0x1163   :  { %v2373_v33 = vpack.c.bf16 %v2369_v38, %v2369_v38  ;;  %v2268_v43 = vadd.f32 %v2258_v42, %v3762_v26  ;;  %v2729_v42 = vld [vmem:[#allocation4 + $0x50] sm:$0xff] }
0x1164   :  { %v2374_v62 = vpack.c.bf16 %v2370_v60, %v2370_v60 }
0x1165   :  { %v2379_v46 = vunpack.c.l.b16 %v2373_v33 }
0x1166   :  { %v2405_v8 = vunpack.c.l.b16 %v2374_v62 }
0x1167   :  { %v2380_v50 = vpack.c.b16 %v2379_v46, %v2378_v2 }
0x1168   :  { %v2907_v14 = vpop.eup %2906 }
0x1169   :  { %v2371_v55 = vmul.f32 %v2907_v14, %v2899_v56  ;;  %2710 = vmatmul.msk.bf16.vlgmr.msra.gmra.mxu0 %vm315_vm10, %v2380_v50  ;;  %v2077_v56 = vadd.f32 %v3789_v35, %v1885_v23 }
0x116a   :  { %v2260_v20 = vpop.f32.mrf.mxu1 }
0x116b   :  { %v2375_v32 = vpack.c.bf16 %v2371_v55, %v2371_v55  ;;  %v2269_v22 = vadd.f32 %v2260_v20, %v2077_v56 }
0x116d   :  { %v2406_v0 = vunpack.c.l.b16 %v2375_v32 }
0x116e   :  { %v2233_v30 = vpop.f32.mrf.mxu0 }
0x116f   :  { %v2407_v13 = vpack.c.b16 %v2406_v0, %v2405_v8 }
0x1171   :  { %v2409_v18 = vpop.permute.xlu1 %2408 }
0x1172   :  { %v2414_v48 = vsel %vm322_vm8, %v2409_v18, 0 }
0x1173   :  { %2423 = vmatpush.bf16.msra.mxu2 %v2414_v48 }
0x1176   :  { %2711 = vmatmul.msk.bf16.vlgmr.msra.gmra.mxu2 %vm315_vm10, %v2407_v13  ;;  %v2235_v17 = vpop.f32.mrf.mxu0 }
0x1177   :  { %v2239_v12 = vpack.c.bf16 %v2235_v17, %v2233_v30 }
0x1179   :  { %2707 = vmatmul.msk.bf16.gmra.mxu1 %vm315_vm10, %v2239_v12 }
0x11e6   :  { %v2398_v16 = vpop.f32.mrf.mxu0 }
0x11ee   :  { %v2400_v44 = vpop.f32.mrf.mxu0 }
0x11ef   :  { %v2430_v36 = vpack.c.bf16 %v2400_v44, %v2398_v16  ;;  %v2730_v44 = vld [vmem:[#allocation4 + $0x58] sm:$0xff] }
0x11f0   :  { %2593 = vmatpush.bf16.msrb.mxu0 %v2730_v44 }
0x11f1   :  { %2712 = vmatmul.msk.bf16.vlgmr.msra.gmra.mxu3 %vm315_vm10, %v2430_v36 }
0x11f4   :  { %2594 = vmatpush.bf16.msrb.mxu0 %v2729_v42 }
0x11f6   :  { %v2263_v53 = vpop.f32.mrf.mxu1 }
0x11f7   :  { %v2270_v31 = vadd.f32 %v2263_v53, %v3792_v34 }
0x11f9   :  { %v2425_v63 = vpop.f32.mrf.mxu2 }
0x11fe   :  { %v2265_v51 = vpop.f32.mrf.mxu1 }
0x1201   :  { %v2427_v4 = vpop.f32.mrf.mxu2 }
0x1202   :  { %v2431_v40 = vpack.c.bf16 %v2427_v4, %v2425_v63 }
0x1204   :  { %2713 = vmatmul.msk.bf16.gmra.mxu3 %vm315_vm10, %v2431_v40 }
0x1274   :  { %v2450_v10 = vpop.f32.mrf.mxu3 }
0x1275   :  { %v2460_v25 = vadd.f32 %v2450_v10, %v2268_v43 }
0x1277   :  { %v2464_v52 = vadd.f32 %v2460_v25, %v3612_v9  ;;  %v1887_v9 = vadd.f32 %v3759_v57, %v3779_v11 }
0x1279   :  { %v2468_v59 = vsel %vm359_vm9, %v2464_v52, 0.0  ;;  %v2079_v1 = vadd.f32 %v3795_v54, %v1887_v9 }
0x127a   :  { %2469 = vadd.xlane.f32.xlu2 %v2468_v59 }
0x127c   :  { %v2452_v37 = vpop.f32.mrf.mxu3 }
0x127d   :  { %v2461_v15 = vadd.f32 %v2452_v37, %v2269_v22  ;;  %v2767_v22 = vld [vmem:[#allocation6 + $0x9] ss:$0 sm:$0xff] }
0x127f   :  { %v2465_v27 = vadd.f32 %v2461_v15, %v3615_v3  ;;  %v2271_v3 = vadd.f32 %v2265_v51, %v2079_v1 }
0x1281   :  { %v2471_v26 = vsel %vm359_vm9, %v2465_v27, 0.0 }
0x1282   :  { %2472 = vadd.xlane.f32.xlu0 %v2471_v26 }
0x1287   :  { %v2455_v39 = vpop.f32.mrf.mxu3 }
0x1288   :  { %v2462_v21 = vadd.f32 %v2455_v39, %v2270_v31 }
0x128a   :  { %v2466_v35 = vadd.f32 %v2462_v21, %v3637_v28  ;;  %v2768_v21 = vld [vmem:[#allocation6 + $0xa] ss:$0 sm:$0xff] }
0x128c   :  { %v2474_v47 = vsel %vm359_vm9, %v2466_v35, 0.0 }
0x128d   :  { %2475 = vadd.xlane.f32.xlu2 %v2474_v47 }
0x128f   :  { %v2457_v6 = vpop.f32.mrf.mxu3 }
0x1290   :  { %v2463_v29 = vadd.f32 %v2457_v6, %v2271_v3 }
0x1292   :  { %v2467_v45 = vadd.f32 %v2463_v29, %v3640_v5 }
0x1294   :  { %v2477_v34 = vsel %vm359_vm9, %v2467_v45, 0.0 }
0x1295   :  { %2478 = vadd.xlane.f32.xlu2 %v2477_v34 }
0x12ed   :  { %v2470_v58 = vpop.xlane.xlu2 %2469 }
0x12ee   :  { %v2480_v41 = vmul.f32 %v2470_v58, %v3574_v7 }
0x12f0   :  { %v2484_v57 = vsub.f32 %v2464_v52, %v2480_v41 }
0x12f2   :  { %v2488_v11 = vmul.f32 %v2484_v57, %v2484_v57 }
0x12f4   :  { %v2492_v28 = vsel %vm359_vm9, %v2488_v11, 0.0 }
0x12f5   :  { %2493 = vadd.xlane.f32.xlu1 %v2492_v28  ;;  %v2473_v54 = vpop.xlane.xlu0 %2472 }
0x12f6   :  { %v2481_v38 = vmul.f32 %v2473_v54, %v3574_v7 }
0x12f8   :  { %v2485_v19 = vsub.f32 %v2465_v27, %v2481_v38 }
0x12fa   :  { %v2489_v33 = vmul.f32 %v2485_v19, %v2485_v19 }
0x12fc   :  { %v2495_v2 = vsel %vm359_vm9, %v2489_v33, 0.0 }
0x12fd   :  { %2496 = vadd.xlane.f32.xlu2 %v2495_v2 }
0x1300   :  { %v2476_v5 = vpop.xlane.xlu2 %2475 }
0x1301   :  { %v2482_v46 = vmul.f32 %v2476_v5, %v3574_v7 }
0x1303   :  { %v3853_v49 = vsub.f32 %v2466_v35, %v2482_v46 }
0x1305   :  { %v2490_v50 = vmul.f32 %v3853_v49, %v3853_v49 }
0x1307   :  { %v2498_v14 = vsel %vm359_vm9, %v2490_v50, 0.0 }
0x1308   :  { %2499 = vadd.xlane.f32.xlu2 %v2498_v14  ;;  %v2479_v60 = vpop.xlane.xlu2 %2478 }
0x1309   :  { %v2483_v55 = vmul.f32 %v2479_v60, %v3574_v7  ;;  %v2769_v60 = vld [vmem:[#allocation6 + $0xb] ss:$0 sm:$0xff] }
0x130b   :  { %v3859_v32 = vsub.f32 %v2467_v45, %v2483_v55 }
0x130d   :  { %v2491_v62 = vmul.f32 %v3859_v32, %v3859_v32 }
0x130f   :  { %v2501_v30 = vsel %vm359_vm9, %v2491_v62, 0.0 }
0x1310   :  { %2502 = vadd.xlane.f32.xlu2 %v2501_v30 }
0x1368   :  { %v2494_v0 = vpop.xlane.xlu1 %2493 }
0x1369   :  { %v2504_v18 = vmul.f32 %v2494_v0, %v3574_v7 }
0x136b   :  { %v2508_v8 = vadd.f32 1e-05, %v2504_v18 }
0x136d   :  { %2908 = vrsqrt.f32 %v2508_v8  ;;  %vm2518_vm10 = vweird.f32 %v2508_v8 }
0x1370   :  { %v2497_v48 = vpop.xlane.xlu2 %2496 }
0x1371   :  { %v2505_v13 = vmul.f32 %v2497_v48, %v3574_v7 }
0x1373   :  { %v2909_v17 = vpop.eup %2908  ;;  %v2509_v12 = vadd.f32 1e-05, %v2505_v13 }
0x1374   :  { %v2513_v24 = vmul.f32 %v2909_v17, %v2508_v8  ;;  %vm2519_vm8 = vweird.f32 %v2909_v17 }
0x1375   :  { %2910 = vrsqrt.f32 %v2509_v12  ;;  %vm2520_vm12 = vmor %vm2518_vm10, %vm2519_vm8  ;;  %vm2528_vm14 = vweird.f32 %v2509_v12 }
0x1376   :  { %v2514_v61 = vmul.f32 %v2909_v17, %v2513_v24 }
0x1378   :  { %v2515_v16 = vmul.f32 0.5, %v2514_v61 }
0x137a   :  { %v2516_v36 = vsub.f32 1.5, %v2515_v16 }
0x137b   :  { %v2500_v63 = vpop.xlane.xlu2 %2499  ;;  %v2911_v4 = vpop.eup %2910 }
0x137c   :  { %v2506_v40 = vmul.f32 %v2500_v63, %v3574_v7  ;;  %v2517_v43 = vmul.f32 %v2909_v17, %v2516_v36  ;;  %v2523_v10 = vmul.f32 %v2911_v4, %v2509_v12  ;;  %vm2529_vm13 = vweird.f32 %v2911_v4 }
0x137d   :  { %vm2530_vm15 = vmor %vm2528_vm14, %vm2529_vm13 }
0x137e   :  { %v2510_v25 = vadd.f32 1e-05, %v2506_v40  ;;  %v2524_v23 = vmul.f32 %v2911_v4, %v2523_v10  ;;  %v2521_v52 = vsel %vm2520_vm12, %v2909_v17, %v2517_v43 }
0x137f   :  { %v2552_v37 = vmul.f32 %v2521_v52, %v2484_v57 }
0x1380   :  { %2912 = vrsqrt.f32 %v2510_v25  ;;  %v2525_v20 = vmul.f32 0.5, %v2524_v23  ;;  %vm2538_vm2 = vweird.f32 %v2510_v25 }
0x1381   :  { %v2557_v9 = vmul.f32 %v2767_v22, %v2552_v37 }
0x1382   :  { %v2526_v56 = vsub.f32 1.5, %v2525_v20 }
0x1383   :  { %v2503_v59 = vpop.xlane.xlu2 %2502  ;;  %v2562_v3 = vadd.f32 %v2768_v21, %v2557_v9 }
0x1384   :  { %v2507_v15 = vmul.f32 %v2503_v59, %v3574_v7  ;;  %v2527_v27 = vmul.f32 %v2911_v4, %v2526_v56 }
0x1386   :  { %v2913_v53 = vpop.eup %2912  ;;  %v2511_v26 = vadd.f32 1e-05, %v2507_v15  ;;  %v2531_v31 = vsel %vm2530_vm15, %v2911_v4, %v2527_v27 }
0x1387   :  { %v2533_v39 = vmul.f32 %v2913_v53, %v2510_v25  ;;  %v2553_v35 = vmul.f32 %v2531_v31, %v2485_v19  ;;  %vm2539_vm0 = vweird.f32 %v2913_v53 }
0x1388   :  { %2914 = vrsqrt.f32 %v2511_v26  ;;  %vm2540_vm3 = vmor %vm2538_vm2, %vm2539_vm0  ;;  %vm2548_vm5 = vweird.f32 %v2511_v26 }
0x1389   :  { %v2534_v51 = vmul.f32 %v2913_v53, %v2533_v39  ;;  %v2558_v1 = vmul.f32 %v2767_v22, %v2553_v35 }
0x138b   :  { %v2535_v47 = vmul.f32 0.5, %v2534_v51  ;;  %v2563_v6 = vadd.f32 %v2768_v21, %v2558_v1 }
0x138d   :  { %v2536_v29 = vsub.f32 1.5, %v2535_v47  ;;  %v2566_v34 = vpack.c.bf16 %v2563_v6, %v2562_v3 }
0x138e   :  { %v2915_v45 = vpop.eup %2914 }
0x138f   :  { %v2537_v7 = vmul.f32 %v2913_v53, %v2536_v29  ;;  %v2543_v58 = vmul.f32 %v2915_v45, %v2511_v26  ;;  %2722 = vmatmul.msk.bf16.vlgmr.msrb.gmra.mxu0 %vm359_vm9, %v2566_v34  ;;  %vm2549_vm4 = vweird.f32 %v2915_v45 }
0x1390   :  { %vm2550_vm6 = vmor %vm2548_vm5, %vm2549_vm4 }
0x1391   :  { %v2544_v41 = vmul.f32 %v2915_v45, %v2543_v58  ;;  %v2541_v57 = vsel %vm2540_vm3, %v2913_v53, %v2537_v7 }
0x1392   :  { %v2554_v54 = vmul.f32 %v2541_v57, %v3853_v49 }
0x1393   :  { %v2545_v11 = vmul.f32 0.5, %v2544_v41 }
0x1394   :  { %v2559_v2 = vmul.f32 %v2767_v22, %v2554_v54 }
0x1395   :  { %v2546_v28 = vsub.f32 1.5, %v2545_v11 }
0x1396   :  { %v2564_v46 = vadd.f32 %v2768_v21, %v2559_v2 }
0x1397   :  { %v2547_v38 = vmul.f32 %v2915_v45, %v2546_v28 }
0x1399   :  { %v2551_v19 = vsel %vm2550_vm6, %v2915_v45, %v2547_v38 }
0x139a   :  { %v2555_v33 = vmul.f32 %v2551_v19, %v3859_v32 }
0x139c   :  { %v2560_v5 = vmul.f32 %v2767_v22, %v2555_v33 }
0x139e   :  { %v2565_v50 = vadd.f32 %v2768_v21, %v2560_v5 }
0x13a0   :  { %v2567_v14 = vpack.c.bf16 %v2565_v50, %v2564_v46 }
0x13a2   :  { %2723 = vmatmul.msk.bf16.gmra.mxu0 %vm359_vm9, %v2567_v14 }
0x140c   :  { %v2596_v55 = vpop.f32.mrf.mxu0 }
0x140d   :  { %v2597_v62 = vadd.f32 %v2769_v60, %v2596_v55 }
0x140f   :  { %2606 = vst.msk [vmem:[%s3895_s7] sm:$0xff] %vm220_vm1, %v2597_v62 }
0x1414   :  { %v2598_v49 = vpop.f32.mrf.mxu0 }
0x1415   :  { %v2599_v30 = vadd.f32 %v2769_v60, %v2598_v49 }
0x1417   :  { %2607 = vst.msk [vmem:[%s3895_s7 + $0x8] sm:$0xff] %vm220_vm1, %v2599_v30 }
0x141f   :  { %v2601_v32 = vpop.f32.mrf.mxu0 }
0x1420   :  { %v2602_v0 = vadd.f32 %v2769_v60, %v2601_v32 }
0x1422   :  { %2608 = vst.msk [vmem:[%s3895_s7 + $0x10] sm:$0xff] %vm220_vm1, %v2602_v0 }
0x1427   :  { %v2603_v18 = vpop.f32.mrf.mxu0 }
0x1428   :  { %v2604_v8 = vadd.f32 %v2769_v60, %v2603_v18 }
0x142a   :  { %2609 = vst.msk [vmem:[%s3895_s7 + $0x18] sm:$0xff] %vm220_vm1, %v2604_v8 }
0x142b   :  { %2614 = vsyncpa [#allocation3], 1 }
0x142c   :  { %2615 = vsyncpa [#allocation5], 1 }

</bundles_post_ra>
